<compile_context>
chip_gen: v6e
topology: v6e:2x2x1
jax: 0.10.0
libtpu: 0.0.40
codegen_flags: <defaults>
</compile_context>

<pallas_src>
import functools

import numpy as np
import jax
import jax.numpy as jnp
from jax.experimental import pallas as pl
from jax.experimental.pallas import tpu as pltpu

FRAMES = 3
H_IMG = 7
W_IMG = 7
HW = H_IMG * W_IMG          # 49
C1 = 16
C2 = 20
FLAT = C2 * HW              # 980
RNN_IN = 256
RNN_HID = 256
LEAK = 0.01                 # nn.LeakyReLU default negative_slope


def _leaky(x):
    return jnp.where(x > 0, x, LEAK * x)


def _num_chunks(nseq):
    # Two independent sequence chunks when possible: feeds both TensorCores on
    # v7x ("parallel" grid axis) and gives the pipeliner something to overlap
    # on v5e/v6e.  Falls back to one chunk otherwise.
    return 2 if (nseq >= 2 and nseq % 2 == 0) else 1


def _const_spec(shape):
    # whole-array block, same block for every grid step (weights stay resident)
    n = len(shape)
    return pl.BlockSpec(shape, lambda i, _n=n: (0,) * _n)


# --------------------------- fused forward kernel ----------------------------
def _agent_kernel(x_ref, w1_ref, b1_ref, w2_ref, b2_ref, w3_ref, b3_ref,
                  wih_ref, whh_ref, lb_ref, h0_ref, c0_ref,
                  y_ref, hT_ref, cT_ref,
                  *, bc, sc, seq_len):
    f32 = jnp.float32
    bf16 = jnp.bfloat16
    Hh = RNN_HID

    # ---- conv1 (1x1, 3->16) and conv2 (1x1, 16->20): pixel-batched MXU dots --
    # rows of x_ref are ordered: pixel-major, then time, then local sequence
    x = x_ref[...]                                        # (HW*bc, 3) f32
    z = jnp.dot(x, w1_ref[...], preferred_element_type=f32) + b1_ref[...]
    z = _leaky(z)                                         # (HW*bc, 16)
    z = jnp.dot(z, w2_ref[...], preferred_element_type=f32) + b2_ref[...]
    feat16 = _leaky(z).astype(bf16)                       # (HW*bc, 20) bf16

    # ---- Flatten + Linear(980 -> 256), blocked over the 49 pixels ------------
    # bf16 activations x bf16 weights straight into the MXU, f32 accumulation.
    acc = jnp.zeros((bc, RNN_IN), f32)
    for hw in range(HW):                                  # static 49-dot loop
        z_hw = feat16[hw * bc:(hw + 1) * bc, :]           # (bc, 20) bf16
        acc = acc + jnp.dot(z_hw, w3_ref[hw], preferred_element_type=f32)
    x_lin = acc + b3_ref[...]                             # (bc, 256) f32

    # ---- LSTM: input projection hoisted out of the recurrence ----------------
    gx = (jnp.dot(x_lin.astype(bf16), wih_ref[...],
                  preferred_element_type=f32) + lb_ref[...])   # (bc, 4H) f32

    whh = whh_ref[...]                                    # (256, 4H) bf16
    h = h0_ref[...]                                       # (sc, H) f32
    c = c0_ref[...]
    hs = []
    for t in range(seq_len):                              # short static loop
        gates = (gx[t * sc:(t + 1) * sc, :]
                 + jnp.dot(h.astype(bf16), whh, preferred_element_type=f32))
        i_g = jax.nn.sigmoid(gates[:, 0:Hh])
        f_g = jax.nn.sigmoid(gates[:, Hh:2 * Hh])
        g_g = jnp.tanh(gates[:, 2 * Hh:3 * Hh])
        o_g = jax.nn.sigmoid(gates[:, 3 * Hh:4 * Hh])
        c = f_g * c + i_g * g_g
        h = o_g * jnp.tanh(c)
        hs.append(h)
    y_ref[...] = jnp.stack(hs, axis=0)                    # one store of (T,sc,H)
    hT_ref[...] = h
    cT_ref[...] = c


def _fused_forward(params, x_pix, h0, c0, seq_len, nc, sc):
    T = seq_len
    bc = sc * T                                           # batch rows per chunk
    kernel = functools.partial(_agent_kernel, bc=bc, sc=sc, seq_len=T)
    ins = (x_pix, params['w1t'], params['b1'], params['w2t'], params['b2'],
           params['w3blk'], params['b3'], params['wih_t'], params['whh_t'],
           params['lstm_bias'], h0, c0)

    in_specs = [pl.BlockSpec((None, HW * bc, FRAMES), lambda i: (i, 0, 0))]
    in_specs += [_const_spec(a.shape) for a in ins[1:10]]     # weights: resident
    in_specs += [pl.BlockSpec((None, sc, RNN_HID), lambda i: (i, 0, 0)),
                 pl.BlockSpec((None, sc, RNN_HID), lambda i: (i, 0, 0))]

    out_shape = (jax.ShapeDtypeStruct((nc, T, sc, RNN_HID), jnp.float32),
                 jax.ShapeDtypeStruct((nc, sc, RNN_HID), jnp.float32),
                 jax.ShapeDtypeStruct((nc, sc, RNN_HID), jnp.float32))
    out_specs = (pl.BlockSpec((None, T, sc, RNN_HID), lambda i: (i, 0, 0, 0)),
                 pl.BlockSpec((None, sc, RNN_HID), lambda i: (i, 0, 0)),
                 pl.BlockSpec((None, sc, RNN_HID), lambda i: (i, 0, 0)))

    return pl.pallas_call(
        kernel,
        out_shape=out_shape,
        grid=(nc,),
        in_specs=in_specs,
        out_specs=out_specs,
        compiler_params=pltpu.CompilerParams(
            dimension_semantics=("parallel",)),
    )(*ins)


# ------------------ Agent.forward (Pallas) ------------------------------------
@functools.partial(jax.jit, static_argnames=("sequence_length",))
def agent_forward(params, x_nchw, rnn_state, sequence_length=1):
    B = x_nchw.shape[0]
    T = sequence_length
    assert B % T == 0, "batch must be divisible by sequence_length"
    nseq = B // T
    nc = _num_chunks(nseq)
    sc = nseq // nc

    # (B, 3, 7, 7) -> (chunk, pixel-major rows, channel); within a chunk the row
    # index is hw*(T*sc) + t*sc + s_local, so every per-pixel and per-timestep
    # slice inside the kernel is a contiguous static slice.
    x_r = x_nchw.reshape(nc, sc, T, FRAMES, HW)               # (i, sl, t, c, hw)
    x_pix = jnp.transpose(x_r, (0, 4, 2, 1, 3)).reshape(nc, HW * T * sc, FRAMES)

    if T == 1:
        h0 = rnn_state[0][0].reshape(nc, sc, RNN_HID)
        c0 = rnn_state[1][0].reshape(nc, sc, RNN_HID)
    else:
        # PyTorch calls self.rnn(x) with no state for T > 1 -> zero-initialized.
        h0 = jnp.zeros((nc, sc, RNN_HID), jnp.float32)
        c0 = jnp.zeros_like(h0)

    y4, hT, cT = _fused_forward(params, x_pix, h0, c0, T, nc, sc)
    # (nc, T, sc, H) -> PyTorch row order b = s*T + t with s = i*sc + sl
    y = jnp.transpose(y4, (0, 2, 1, 3)).reshape(B, RNN_HID)
    hT = hT.reshape(nseq, RNN_HID)
    cT = cT.reshape(nseq, RNN_HID)
    return y, (hT[None], cT[None])                            # state: (1, nseq, H)


# ------------------ parameter init (deterministic, mirrors layer_init) --------
def init_params(key):
    ortho = jax.nn.initializers.orthogonal
    k1, k2, k3, k4, k5 = jax.random.split(key, 5)
    W1 = ortho(np.sqrt(2))(k1, (C1, FRAMES), jnp.float32)     # Conv2d(3,16,1x1)
    b1 = jnp.zeros((C1,), jnp.float32)
    W2 = ortho(np.sqrt(2))(k2, (C2, C1), jnp.float32)         # Conv2d(16,20,1x1)
    b2 = jnp.zeros((C2,), jnp.float32)
    W3 = ortho(np.sqrt(2))(k3, (RNN_IN, FLAT), jnp.float32)   # Linear(980,256)
    b3 = jnp.zeros((RNN_IN,), jnp.float32)
    Wih = ortho(np.sqrt(2))(k4, (4 * RNN_HID, RNN_IN), jnp.float32)
    Whh = ortho(np.sqrt(2))(k5, (4 * RNN_HID, RNN_HID), jnp.float32)
    bih = jnp.zeros((4 * RNN_HID,), jnp.float32)
    bhh = jnp.zeros((4 * RNN_HID,), jnp.float32)

    # Big matrices stored in bf16 (halves HBM->VMEM weight DMA) and consumed by
    # the MXU directly as bf16 with f32 accumulation.
    W3_bf = W3.astype(jnp.bfloat16)
    Wih_bf = Wih.astype(jnp.bfloat16)
    Whh_bf = Whh.astype(jnp.bfloat16)

    # W3 columns are indexed c*49 + hw (PyTorch channel-major Flatten); the
    # kernel contracts pixel-by-pixel, so pre-arrange as (hw, c, out).
    w3blk = W3_bf.reshape(RNN_IN, C2, HW).transpose(2, 1, 0)  # (49, 20, 256)

    params = dict(
        w1t=W1.T, b1=b1[None, :],
        w2t=W2.T, b2=b2[None, :],
        w3blk=w3blk, b3=b3[None, :],
        wih_t=Wih_bf.T, whh_t=Whh_bf.T,
        lstm_bias=(bih + bhh)[None, :],
    )
    # Reference uses the same bf16-rounded big weights (cast back to f32) so the
    # check isolates kernel correctness rather than quantization error.
    params_ref = dict(W1=W1, b1=b1, W2=W2, b2=b2,
                      W3=W3_bf.astype(jnp.float32), b3=b3,
                      Wih=Wih_bf.astype(jnp.float32),
                      Whh=Whh_bf.astype(jnp.float32),
                      bih=bih, bhh=bhh)
    return params, params_ref


# ------------------ pure-JAX reference for validation --------------------------
def _round_bf16(x):
    # mirror the kernel's bf16 rounding of MXU activation operands
    return x.astype(jnp.bfloat16).astype(jnp.float32)


def ref_forward(p, x_nchw, rnn_state, sequence_length=1):
    z = jnp.einsum('oc,bchw->bohw', p['W1'], x_nchw) + p['b1'][None, :, None, None]
    z = _leaky(z)
    z = jnp.einsum('oc,bchw->bohw', p['W2'], z) + p['b2'][None, :, None, None]
    z = _leaky(z)
    B = x_nchw.shape[0]
    x = _round_bf16(z.reshape(B, -1)) @ p['W3'].T + p['b3']
    T = sequence_length
    nseq = B // T
    xs = x.reshape(nseq, T, RNN_IN)
    if T == 1:
        h, c = rnn_state[0][0], rnn_state[1][0]
    else:
        h = jnp.zeros((nseq, RNN_HID), jnp.float32)
        c = jnp.zeros_like(h)
    ys = []
    for t in range(T):
        g = (_round_bf16(xs[:, t]) @ p['Wih'].T + p['bih']
             + _round_bf16(h) @ p['Whh'].T + p['bhh'])
        i = jax.nn.sigmoid(g[:, :RNN_HID])
        f = jax.nn.sigmoid(g[:, RNN_HID:2 * RNN_HID])
        gg = jnp.tanh(g[:, 2 * RNN_HID:3 * RNN_HID])
        o = jax.nn.sigmoid(g[:, 3 * RNN_HID:])
        c = f * c + i * gg
        h = o * jnp.tanh(c)
        ys.append(h)
    y = jnp.stack(ys, axis=1).reshape(B, RNN_HID)
    return y, (h[None], c[None])


if __name__ == "__main__":
    root = jax.random.PRNGKey(0)
    kp, kx, kh, kc = jax.random.split(root, 4)
    params, params_ref = init_params(kp)

    B = 8
    x = jax.random.normal(kx, (B, FRAMES, H_IMG, W_IMG), jnp.float32)
    h0 = jax.random.normal(kh, (1, B, RNN_HID), jnp.float32)
    c0 = jax.random.normal(kc, (1, B, RNN_HID), jnp.float32)

    ATOL = 1e-2  # bf16 MXU operands; reference mirrors the rounding

    # sequence_length == 1 path (single LSTM step with provided recurrent state)
    y, (hT, cT) = agent_forward(params, x, (h0, c0), sequence_length=1)
    jax.block_until_ready((y, hT, cT))
    y_r, (h_r, c_r) = ref_forward(params_ref, x, (h0, c0), sequence_length=1)
    assert jnp.allclose(y, y_r, atol=ATOL), float(jnp.max(jnp.abs(y - y_r)))
    assert jnp.allclose(hT, h_r, atol=ATOL), float(jnp.max(jnp.abs(hT - h_r)))
    assert jnp.allclose(cT, c_r, atol=ATOL), float(jnp.max(jnp.abs(cT - c_r)))

    # sequence_length > 1 path (B rows -> B//T sequences, zero-initialized state)
    T = 4
    y2, (h2, c2) = agent_forward(params, x, (h0, c0), sequence_length=T)
    jax.block_until_ready((y2, h2, c2))
    y2_r, (h2_r, c2_r) = ref_forward(params_ref, x, (h0, c0), sequence_length=T)
    assert jnp.allclose(y2, y2_r, atol=ATOL), float(jnp.max(jnp.abs(y2 - y2_r)))
    assert jnp.allclose(h2, h2_r, atol=ATOL), float(jnp.max(jnp.abs(h2 - h2_r)))
    assert jnp.allclose(c2, c2_r, atol=ATOL), float(jnp.max(jnp.abs(c2 - c2_r)))

    print("KERNEL_OK")
</pallas_src>

<mosaic_0001>
module attributes {stable_mosaic.version = 11 : i64} {
  func.func @_agent_kernel(%arg0: i32, %arg1: memref<1x196x3xf32, #tpu.memory_space<vmem>>, %arg2: memref<3x16xf32, #tpu.memory_space<vmem>>, %arg3: memref<1x16xf32, #tpu.memory_space<vmem>>, %arg4: memref<16x20xf32, #tpu.memory_space<vmem>>, %arg5: memref<1x20xf32, #tpu.memory_space<vmem>>, %arg6: memref<49x20x256xbf16, #tpu.memory_space<vmem>>, %arg7: memref<1x256xf32, #tpu.memory_space<vmem>>, %arg8: memref<256x1024xbf16, #tpu.memory_space<vmem>>, %arg9: memref<256x1024xbf16, #tpu.memory_space<vmem>>, %arg10: memref<1x1024xf32, #tpu.memory_space<vmem>>, %arg11: memref<1x4x256xf32, #tpu.memory_space<vmem>>, %arg12: memref<1x4x256xf32, #tpu.memory_space<vmem>>, %arg13: memref<1x1x4x256xf32, #tpu.memory_space<vmem>>, %arg14: memref<1x4x256xf32, #tpu.memory_space<vmem>>, %arg15: memref<1x4x256xf32, #tpu.memory_space<vmem>>) attributes {dimension_semantics = [#tpu.dimension_semantics<parallel>], iteration_bounds = array<i64: 2>, scalar_prefetch = 0 : i64, scratch_operands = 0 : i64, tpu.core_type = #tpu.core_type<tc>, window_params = [{transform_indices = @transform_0, window_bounds = array<i64: 1, 196, 3>}, {pipeline_mode = #tpu.pipeline_mode<synchronous>, transform_indices = @transform_1, window_bounds = array<i64: 3, 16>}, {pipeline_mode = #tpu.pipeline_mode<synchronous>, transform_indices = @transform_2, window_bounds = array<i64: 1, 16>}, {pipeline_mode = #tpu.pipeline_mode<synchronous>, transform_indices = @transform_3, window_bounds = array<i64: 16, 20>}, {pipeline_mode = #tpu.pipeline_mode<synchronous>, transform_indices = @transform_4, window_bounds = array<i64: 1, 20>}, {pipeline_mode = #tpu.pipeline_mode<synchronous>, transform_indices = @transform_5, window_bounds = array<i64: 49, 20, 256>}, {pipeline_mode = #tpu.pipeline_mode<synchronous>, transform_indices = @transform_6, window_bounds = array<i64: 1, 256>}, {pipeline_mode = #tpu.pipeline_mode<synchronous>, transform_indices = @transform_7, window_bounds = array<i64: 256, 1024>}, {pipeline_mode = #tpu.pipeline_mode<synchronous>, transform_indices = @transform_8, window_bounds = array<i64: 256, 1024>}, {pipeline_mode = #tpu.pipeline_mode<synchronous>, transform_indices = @transform_9, window_bounds = array<i64: 1, 1024>}, {transform_indices = @transform_10, window_bounds = array<i64: 1, 4, 256>}, {transform_indices = @transform_11, window_bounds = array<i64: 1, 4, 256>}, {transform_indices = @transform_12, window_bounds = array<i64: 1, 1, 4, 256>}, {transform_indices = @transform_13, window_bounds = array<i64: 1, 4, 256>}, {transform_indices = @transform_14, window_bounds = array<i64: 1, 4, 256>}]} {
    %c0 = arith.constant 0 : index
    %c0_0 = arith.constant 0 : index
    %c0_1 = arith.constant 0 : index
    %0 = vector.load %arg1[%c0, %c0_0, %c0_1] : memref<1x196x3xf32, #tpu.memory_space<vmem>>, vector<1x196x3xf32>
    %1 = vector.shape_cast %0 : vector<1x196x3xf32> to vector<196x3xf32>
    %c0_2 = arith.constant 0 : index
    %c0_3 = arith.constant 0 : index
    %2 = vector.load %arg2[%c0_2, %c0_3] : memref<3x16xf32, #tpu.memory_space<vmem>>, vector<3x16xf32>
    %cst = arith.constant dense<0.000000e+00> : vector<196x16xf32>
    %3 = tpu.matmul %1, %2, %cst {dimension_numbers = #tpu.dot_dimension_numbers<[1], [0], [0], [1], [0, 0, 1, 1], [], []>} : vector<196x3xf32>, vector<3x16xf32>, vector<196x16xf32> -> vector<196x16xf32>
    %c0_4 = arith.constant 0 : index
    %c0_5 = arith.constant 0 : index
    %4 = vector.load %arg3[%c0_4, %c0_5] : memref<1x16xf32, #tpu.memory_space<vmem>>, vector<1x16xf32>
    %5 = vector.broadcast %4 : vector<1x16xf32> to vector<196x16xf32>
    %6 = arith.addf %3, %5 : vector<196x16xf32>
    %cst_6 = arith.constant 0.000000e+00 : f32
    %7 = vector.broadcast %cst_6 : f32 to vector<196x16xf32>
    %8 = arith.cmpf ogt, %6, %7 : vector<196x16xf32>
    %cst_7 = arith.constant 0.00999999977 : f32
    %9 = vector.broadcast %cst_7 : f32 to vector<196x16xf32>
    %10 = arith.mulf %9, %6 : vector<196x16xf32>
    %11 = arith.select %8, %6, %10 : vector<196x16xi1>, vector<196x16xf32>
    %c0_8 = arith.constant 0 : index
    %c0_9 = arith.constant 0 : index
    %12 = vector.load %arg4[%c0_8, %c0_9] : memref<16x20xf32, #tpu.memory_space<vmem>>, vector<16x20xf32>
    %cst_10 = arith.constant dense<0.000000e+00> : vector<196x20xf32>
    %13 = tpu.matmul %11, %12, %cst_10 {dimension_numbers = #tpu.dot_dimension_numbers<[1], [0], [0], [1], [0, 0, 1, 1], [], []>} : vector<196x16xf32>, vector<16x20xf32>, vector<196x20xf32> -> vector<196x20xf32>
    %c0_11 = arith.constant 0 : index
    %c0_12 = arith.constant 0 : index
    %14 = vector.load %arg5[%c0_11, %c0_12] : memref<1x20xf32, #tpu.memory_space<vmem>>, vector<1x20xf32>
    %15 = vector.broadcast %14 : vector<1x20xf32> to vector<196x20xf32>
    %16 = arith.addf %13, %15 : vector<196x20xf32>
    %cst_13 = arith.constant 0.000000e+00 : f32
    %17 = vector.broadcast %cst_13 : f32 to vector<196x20xf32>
    %18 = arith.cmpf ogt, %16, %17 : vector<196x20xf32>
    %cst_14 = arith.constant 0.00999999977 : f32
    %19 = vector.broadcast %cst_14 : f32 to vector<196x20xf32>
    %20 = arith.mulf %19, %16 : vector<196x20xf32>
    %21 = arith.select %18, %16, %20 : vector<196x20xi1>, vector<196x20xf32>
    %22 = arith.truncf %21 : vector<196x20xf32> to vector<196x20xbf16>
    %cst_15 = arith.constant 0.000000e+00 : f32
    %23 = vector.broadcast %cst_15 : f32 to vector<4x256xf32>
    %24 = vector.extract_strided_slice %22 {offsets = [0, 0], sizes = [4, 20], strides = [1, 1]} : vector<196x20xbf16> to vector<4x20xbf16>
    %c0_16 = arith.constant 0 : index
    %c0_17 = arith.constant 0 : index
    %c0_18 = arith.constant 0 : index
    %25 = vector.load %arg6[%c0_16, %c0_17, %c0_18] : memref<49x20x256xbf16, #tpu.memory_space<vmem>>, vector<1x20x256xbf16>
    %26 = vector.shape_cast %25 : vector<1x20x256xbf16> to vector<20x256xbf16>
    %cst_19 = arith.constant dense<0.000000e+00> : vector<4x256xf32>
    %27 = tpu.matmul %24, %26, %cst_19 {dimension_numbers = #tpu.dot_dimension_numbers<[1], [0], [0], [1], [0, 0, 1, 1], [], []>} : vector<4x20xbf16>, vector<20x256xbf16>, vector<4x256xf32> -> vector<4x256xf32>
    %28 = arith.addf %23, %27 : vector<4x256xf32>
    %29 = vector.extract_strided_slice %22 {offsets = [4, 0], sizes = [4, 20], strides = [1, 1]} : vector<196x20xbf16> to vector<4x20xbf16>
    %c1 = arith.constant 1 : index
    %c0_20 = arith.constant 0 : index
    %c0_21 = arith.constant 0 : index
    %30 = vector.load %arg6[%c1, %c0_20, %c0_21] : memref<49x20x256xbf16, #tpu.memory_space<vmem>>, vector<1x20x256xbf16>
    %31 = vector.shape_cast %30 : vector<1x20x256xbf16> to vector<20x256xbf16>
    %cst_22 = arith.constant dense<0.000000e+00> : vector<4x256xf32>
    %32 = tpu.matmul %29, %31, %cst_22 {dimension_numbers = #tpu.dot_dimension_numbers<[1], [0], [0], [1], [0, 0, 1, 1], [], []>} : vector<4x20xbf16>, vector<20x256xbf16>, vector<4x256xf32> -> vector<4x256xf32>
    %33 = arith.addf %28, %32 : vector<4x256xf32>
    %34 = vector.extract_strided_slice %22 {offsets = [8, 0], sizes = [4, 20], strides = [1, 1]} : vector<196x20xbf16> to vector<4x20xbf16>
    %c2 = arith.constant 2 : index
    %c0_23 = arith.constant 0 : index
    %c0_24 = arith.constant 0 : index
    %35 = vector.load %arg6[%c2, %c0_23, %c0_24] : memref<49x20x256xbf16, #tpu.memory_space<vmem>>, vector<1x20x256xbf16>
    %36 = vector.shape_cast %35 : vector<1x20x256xbf16> to vector<20x256xbf16>
    %cst_25 = arith.constant dense<0.000000e+00> : vector<4x256xf32>
    %37 = tpu.matmul %34, %36, %cst_25 {dimension_numbers = #tpu.dot_dimension_numbers<[1], [0], [0], [1], [0, 0, 1, 1], [], []>} : vector<4x20xbf16>, vector<20x256xbf16>, vector<4x256xf32> -> vector<4x256xf32>
    %38 = arith.addf %33, %37 : vector<4x256xf32>
    %39 = vector.extract_strided_slice %22 {offsets = [12, 0], sizes = [4, 20], strides = [1, 1]} : vector<196x20xbf16> to vector<4x20xbf16>
    %c3 = arith.constant 3 : index
    %c0_26 = arith.constant 0 : index
    %c0_27 = arith.constant 0 : index
    %40 = vector.load %arg6[%c3, %c0_26, %c0_27] : memref<49x20x256xbf16, #tpu.memory_space<vmem>>, vector<1x20x256xbf16>
    %41 = vector.shape_cast %40 : vector<1x20x256xbf16> to vector<20x256xbf16>
    %cst_28 = arith.constant dense<0.000000e+00> : vector<4x256xf32>
    %42 = tpu.matmul %39, %41, %cst_28 {dimension_numbers = #tpu.dot_dimension_numbers<[1], [0], [0], [1], [0, 0, 1, 1], [], []>} : vector<4x20xbf16>, vector<20x256xbf16>, vector<4x256xf32> -> vector<4x256xf32>
    %43 = arith.addf %38, %42 : vector<4x256xf32>
    %44 = vector.extract_strided_slice %22 {offsets = [16, 0], sizes = [4, 20], strides = [1, 1]} : vector<196x20xbf16> to vector<4x20xbf16>
    %c4 = arith.constant 4 : index
    %c0_29 = arith.constant 0 : index
    %c0_30 = arith.constant 0 : index
    %45 = vector.load %arg6[%c4, %c0_29, %c0_30] : memref<49x20x256xbf16, #tpu.memory_space<vmem>>, vector<1x20x256xbf16>
    %46 = vector.shape_cast %45 : vector<1x20x256xbf16> to vector<20x256xbf16>
    %cst_31 = arith.constant dense<0.000000e+00> : vector<4x256xf32>
    %47 = tpu.matmul %44, %46, %cst_31 {dimension_numbers = #tpu.dot_dimension_numbers<[1], [0], [0], [1], [0, 0, 1, 1], [], []>} : vector<4x20xbf16>, vector<20x256xbf16>, vector<4x256xf32> -> vector<4x256xf32>
    %48 = arith.addf %43, %47 : vector<4x256xf32>
    %49 = vector.extract_strided_slice %22 {offsets = [20, 0], sizes = [4, 20], strides = [1, 1]} : vector<196x20xbf16> to vector<4x20xbf16>
    %c5 = arith.constant 5 : index
    %c0_32 = arith.constant 0 : index
    %c0_33 = arith.constant 0 : index
    %50 = vector.load %arg6[%c5, %c0_32, %c0_33] : memref<49x20x256xbf16, #tpu.memory_space<vmem>>, vector<1x20x256xbf16>
    %51 = vector.shape_cast %50 : vector<1x20x256xbf16> to vector<20x256xbf16>
    %cst_34 = arith.constant dense<0.000000e+00> : vector<4x256xf32>
    %52 = tpu.matmul %49, %51, %cst_34 {dimension_numbers = #tpu.dot_dimension_numbers<[1], [0], [0], [1], [0, 0, 1, 1], [], []>} : vector<4x20xbf16>, vector<20x256xbf16>, vector<4x256xf32> -> vector<4x256xf32>
    %53 = arith.addf %48, %52 : vector<4x256xf32>
    %54 = vector.extract_strided_slice %22 {offsets = [24, 0], sizes = [4, 20], strides = [1, 1]} : vector<196x20xbf16> to vector<4x20xbf16>
    %c6 = arith.constant 6 : index
    %c0_35 = arith.constant 0 : index
    %c0_36 = arith.constant 0 : index
    %55 = vector.load %arg6[%c6, %c0_35, %c0_36] : memref<49x20x256xbf16, #tpu.memory_space<vmem>>, vector<1x20x256xbf16>
    %56 = vector.shape_cast %55 : vector<1x20x256xbf16> to vector<20x256xbf16>
    %cst_37 = arith.constant dense<0.000000e+00> : vector<4x256xf32>
    %57 = tpu.matmul %54, %56, %cst_37 {dimension_numbers = #tpu.dot_dimension_numbers<[1], [0], [0], [1], [0, 0, 1, 1], [], []>} : vector<4x20xbf16>, vector<20x256xbf16>, vector<4x256xf32> -> vector<4x256xf32>
    %58 = arith.addf %53, %57 : vector<4x256xf32>
    %59 = vector.extract_strided_slice %22 {offsets = [28, 0], sizes = [4, 20], strides = [1, 1]} : vector<196x20xbf16> to vector<4x20xbf16>
    %c7 = arith.constant 7 : index
    %c0_38 = arith.constant 0 : index
    %c0_39 = arith.constant 0 : index
    %60 = vector.load %arg6[%c7, %c0_38, %c0_39] : memref<49x20x256xbf16, #tpu.memory_space<vmem>>, vector<1x20x256xbf16>
    %61 = vector.shape_cast %60 : vector<1x20x256xbf16> to vector<20x256xbf16>
    %cst_40 = arith.constant dense<0.000000e+00> : vector<4x256xf32>
    %62 = tpu.matmul %59, %61, %cst_40 {dimension_numbers = #tpu.dot_dimension_numbers<[1], [0], [0], [1], [0, 0, 1, 1], [], []>} : vector<4x20xbf16>, vector<20x256xbf16>, vector<4x256xf32> -> vector<4x256xf32>
    %63 = arith.addf %58, %62 : vector<4x256xf32>
    %64 = vector.extract_strided_slice %22 {offsets = [32, 0], sizes = [4, 20], strides = [1, 1]} : vector<196x20xbf16> to vector<4x20xbf16>
    %c8 = arith.constant 8 : index
    %c0_41 = arith.constant 0 : index
    %c0_42 = arith.constant 0 : index
    %65 = vector.load %arg6[%c8, %c0_41, %c0_42] : memref<49x20x256xbf16, #tpu.memory_space<vmem>>, vector<1x20x256xbf16>
    %66 = vector.shape_cast %65 : vector<1x20x256xbf16> to vector<20x256xbf16>
    %cst_43 = arith.constant dense<0.000000e+00> : vector<4x256xf32>
    %67 = tpu.matmul %64, %66, %cst_43 {dimension_numbers = #tpu.dot_dimension_numbers<[1], [0], [0], [1], [0, 0, 1, 1], [], []>} : vector<4x20xbf16>, vector<20x256xbf16>, vector<4x256xf32> -> vector<4x256xf32>
    %68 = arith.addf %63, %67 : vector<4x256xf32>
    %69 = vector.extract_strided_slice %22 {offsets = [36, 0], sizes = [4, 20], strides = [1, 1]} : vector<196x20xbf16> to vector<4x20xbf16>
    %c9 = arith.constant 9 : index
    %c0_44 = arith.constant 0 : index
    %c0_45 = arith.constant 0 : index
    %70 = vector.load %arg6[%c9, %c0_44, %c0_45] : memref<49x20x256xbf16, #tpu.memory_space<vmem>>, vector<1x20x256xbf16>
    %71 = vector.shape_cast %70 : vector<1x20x256xbf16> to vector<20x256xbf16>
    %cst_46 = arith.constant dense<0.000000e+00> : vector<4x256xf32>
    %72 = tpu.matmul %69, %71, %cst_46 {dimension_numbers = #tpu.dot_dimension_numbers<[1], [0], [0], [1], [0, 0, 1, 1], [], []>} : vector<4x20xbf16>, vector<20x256xbf16>, vector<4x256xf32> -> vector<4x256xf32>
    %73 = arith.addf %68, %72 : vector<4x256xf32>
    %74 = vector.extract_strided_slice %22 {offsets = [40, 0], sizes = [4, 20], strides = [1, 1]} : vector<196x20xbf16> to vector<4x20xbf16>
    %c10 = arith.constant 10 : index
    %c0_47 = arith.constant 0 : index
    %c0_48 = arith.constant 0 : index
    %75 = vector.load %arg6[%c10, %c0_47, %c0_48] : memref<49x20x256xbf16, #tpu.memory_space<vmem>>, vector<1x20x256xbf16>
    %76 = vector.shape_cast %75 : vector<1x20x256xbf16> to vector<20x256xbf16>
    %cst_49 = arith.constant dense<0.000000e+00> : vector<4x256xf32>
    %77 = tpu.matmul %74, %76, %cst_49 {dimension_numbers = #tpu.dot_dimension_numbers<[1], [0], [0], [1], [0, 0, 1, 1], [], []>} : vector<4x20xbf16>, vector<20x256xbf16>, vector<4x256xf32> -> vector<4x256xf32>
    %78 = arith.addf %73, %77 : vector<4x256xf32>
    %79 = vector.extract_strided_slice %22 {offsets = [44, 0], sizes = [4, 20], strides = [1, 1]} : vector<196x20xbf16> to vector<4x20xbf16>
    %c11 = arith.constant 11 : index
    %c0_50 = arith.constant 0 : index
    %c0_51 = arith.constant 0 : index
    %80 = vector.load %arg6[%c11, %c0_50, %c0_51] : memref<49x20x256xbf16, #tpu.memory_space<vmem>>, vector<1x20x256xbf16>
    %81 = vector.shape_cast %80 : vector<1x20x256xbf16> to vector<20x256xbf16>
    %cst_52 = arith.constant dense<0.000000e+00> : vector<4x256xf32>
    %82 = tpu.matmul %79, %81, %cst_52 {dimension_numbers = #tpu.dot_dimension_numbers<[1], [0], [0], [1], [0, 0, 1, 1], [], []>} : vector<4x20xbf16>, vector<20x256xbf16>, vector<4x256xf32> -> vector<4x256xf32>
    %83 = arith.addf %78, %82 : vector<4x256xf32>
    %84 = vector.extract_strided_slice %22 {offsets = [48, 0], sizes = [4, 20], strides = [1, 1]} : vector<196x20xbf16> to vector<4x20xbf16>
    %c12 = arith.constant 12 : index
    %c0_53 = arith.constant 0 : index
    %c0_54 = arith.constant 0 : index
    %85 = vector.load %arg6[%c12, %c0_53, %c0_54] : memref<49x20x256xbf16, #tpu.memory_space<vmem>>, vector<1x20x256xbf16>
    %86 = vector.shape_cast %85 : vector<1x20x256xbf16> to vector<20x256xbf16>
    %cst_55 = arith.constant dense<0.000000e+00> : vector<4x256xf32>
    %87 = tpu.matmul %84, %86, %cst_55 {dimension_numbers = #tpu.dot_dimension_numbers<[1], [0], [0], [1], [0, 0, 1, 1], [], []>} : vector<4x20xbf16>, vector<20x256xbf16>, vector<4x256xf32> -> vector<4x256xf32>
    %88 = arith.addf %83, %87 : vector<4x256xf32>
    %89 = vector.extract_strided_slice %22 {offsets = [52, 0], sizes = [4, 20], strides = [1, 1]} : vector<196x20xbf16> to vector<4x20xbf16>
    %c13 = arith.constant 13 : index
    %c0_56 = arith.constant 0 : index
    %c0_57 = arith.constant 0 : index
    %90 = vector.load %arg6[%c13, %c0_56, %c0_57] : memref<49x20x256xbf16, #tpu.memory_space<vmem>>, vector<1x20x256xbf16>
    %91 = vector.shape_cast %90 : vector<1x20x256xbf16> to vector<20x256xbf16>
    %cst_58 = arith.constant dense<0.000000e+00> : vector<4x256xf32>
    %92 = tpu.matmul %89, %91, %cst_58 {dimension_numbers = #tpu.dot_dimension_numbers<[1], [0], [0], [1], [0, 0, 1, 1], [], []>} : vector<4x20xbf16>, vector<20x256xbf16>, vector<4x256xf32> -> vector<4x256xf32>
    %93 = arith.addf %88, %92 : vector<4x256xf32>
    %94 = vector.extract_strided_slice %22 {offsets = [56, 0], sizes = [4, 20], strides = [1, 1]} : vector<196x20xbf16> to vector<4x20xbf16>
    %c14 = arith.constant 14 : index
    %c0_59 = arith.constant 0 : index
    %c0_60 = arith.constant 0 : index
    %95 = vector.load %arg6[%c14, %c0_59, %c0_60] : memref<49x20x256xbf16, #tpu.memory_space<vmem>>, vector<1x20x256xbf16>
    %96 = vector.shape_cast %95 : vector<1x20x256xbf16> to vector<20x256xbf16>
    %cst_61 = arith.constant dense<0.000000e+00> : vector<4x256xf32>
    %97 = tpu.matmul %94, %96, %cst_61 {dimension_numbers = #tpu.dot_dimension_numbers<[1], [0], [0], [1], [0, 0, 1, 1], [], []>} : vector<4x20xbf16>, vector<20x256xbf16>, vector<4x256xf32> -> vector<4x256xf32>
    %98 = arith.addf %93, %97 : vector<4x256xf32>
    %99 = vector.extract_strided_slice %22 {offsets = [60, 0], sizes = [4, 20], strides = [1, 1]} : vector<196x20xbf16> to vector<4x20xbf16>
    %c15 = arith.constant 15 : index
    %c0_62 = arith.constant 0 : index
    %c0_63 = arith.constant 0 : index
    %100 = vector.load %arg6[%c15, %c0_62, %c0_63] : memref<49x20x256xbf16, #tpu.memory_space<vmem>>, vector<1x20x256xbf16>
    %101 = vector.shape_cast %100 : vector<1x20x256xbf16> to vector<20x256xbf16>
    %cst_64 = arith.constant dense<0.000000e+00> : vector<4x256xf32>
    %102 = tpu.matmul %99, %101, %cst_64 {dimension_numbers = #tpu.dot_dimension_numbers<[1], [0], [0], [1], [0, 0, 1, 1], [], []>} : vector<4x20xbf16>, vector<20x256xbf16>, vector<4x256xf32> -> vector<4x256xf32>
    %103 = arith.addf %98, %102 : vector<4x256xf32>
    %104 = vector.extract_strided_slice %22 {offsets = [64, 0], sizes = [4, 20], strides = [1, 1]} : vector<196x20xbf16> to vector<4x20xbf16>
    %c16 = arith.constant 16 : index
    %c0_65 = arith.constant 0 : index
    %c0_66 = arith.constant 0 : index
    %105 = vector.load %arg6[%c16, %c0_65, %c0_66] : memref<49x20x256xbf16, #tpu.memory_space<vmem>>, vector<1x20x256xbf16>
    %106 = vector.shape_cast %105 : vector<1x20x256xbf16> to vector<20x256xbf16>
    %cst_67 = arith.constant dense<0.000000e+00> : vector<4x256xf32>
    %107 = tpu.matmul %104, %106, %cst_67 {dimension_numbers = #tpu.dot_dimension_numbers<[1], [0], [0], [1], [0, 0, 1, 1], [], []>} : vector<4x20xbf16>, vector<20x256xbf16>, vector<4x256xf32> -> vector<4x256xf32>
    %108 = arith.addf %103, %107 : vector<4x256xf32>
    %109 = vector.extract_strided_slice %22 {offsets = [68, 0], sizes = [4, 20], strides = [1, 1]} : vector<196x20xbf16> to vector<4x20xbf16>
    %c17 = arith.constant 17 : index
    %c0_68 = arith.constant 0 : index
    %c0_69 = arith.constant 0 : index
    %110 = vector.load %arg6[%c17, %c0_68, %c0_69] : memref<49x20x256xbf16, #tpu.memory_space<vmem>>, vector<1x20x256xbf16>
    %111 = vector.shape_cast %110 : vector<1x20x256xbf16> to vector<20x256xbf16>
    %cst_70 = arith.constant dense<0.000000e+00> : vector<4x256xf32>
    %112 = tpu.matmul %109, %111, %cst_70 {dimension_numbers = #tpu.dot_dimension_numbers<[1], [0], [0], [1], [0, 0, 1, 1], [], []>} : vector<4x20xbf16>, vector<20x256xbf16>, vector<4x256xf32> -> vector<4x256xf32>
    %113 = arith.addf %108, %112 : vector<4x256xf32>
    %114 = vector.extract_strided_slice %22 {offsets = [72, 0], sizes = [4, 20], strides = [1, 1]} : vector<196x20xbf16> to vector<4x20xbf16>
    %c18 = arith.constant 18 : index
    %c0_71 = arith.constant 0 : index
    %c0_72 = arith.constant 0 : index
    %115 = vector.load %arg6[%c18, %c0_71, %c0_72] : memref<49x20x256xbf16, #tpu.memory_space<vmem>>, vector<1x20x256xbf16>
    %116 = vector.shape_cast %115 : vector<1x20x256xbf16> to vector<20x256xbf16>
    %cst_73 = arith.constant dense<0.000000e+00> : vector<4x256xf32>
    %117 = tpu.matmul %114, %116, %cst_73 {dimension_numbers = #tpu.dot_dimension_numbers<[1], [0], [0], [1], [0, 0, 1, 1], [], []>} : vector<4x20xbf16>, vector<20x256xbf16>, vector<4x256xf32> -> vector<4x256xf32>
    %118 = arith.addf %113, %117 : vector<4x256xf32>
    %119 = vector.extract_strided_slice %22 {offsets = [76, 0], sizes = [4, 20], strides = [1, 1]} : vector<196x20xbf16> to vector<4x20xbf16>
    %c19 = arith.constant 19 : index
    %c0_74 = arith.constant 0 : index
    %c0_75 = arith.constant 0 : index
    %120 = vector.load %arg6[%c19, %c0_74, %c0_75] : memref<49x20x256xbf16, #tpu.memory_space<vmem>>, vector<1x20x256xbf16>
    %121 = vector.shape_cast %120 : vector<1x20x256xbf16> to vector<20x256xbf16>
    %cst_76 = arith.constant dense<0.000000e+00> : vector<4x256xf32>
    %122 = tpu.matmul %119, %121, %cst_76 {dimension_numbers = #tpu.dot_dimension_numbers<[1], [0], [0], [1], [0, 0, 1, 1], [], []>} : vector<4x20xbf16>, vector<20x256xbf16>, vector<4x256xf32> -> vector<4x256xf32>
    %123 = arith.addf %118, %122 : vector<4x256xf32>
    %124 = vector.extract_strided_slice %22 {offsets = [80, 0], sizes = [4, 20], strides = [1, 1]} : vector<196x20xbf16> to vector<4x20xbf16>
    %c20 = arith.constant 20 : index
    %c0_77 = arith.constant 0 : index
    %c0_78 = arith.constant 0 : index
    %125 = vector.load %arg6[%c20, %c0_77, %c0_78] : memref<49x20x256xbf16, #tpu.memory_space<vmem>>, vector<1x20x256xbf16>
    %126 = vector.shape_cast %125 : vector<1x20x256xbf16> to vector<20x256xbf16>
    %cst_79 = arith.constant dense<0.000000e+00> : vector<4x256xf32>
    %127 = tpu.matmul %124, %126, %cst_79 {dimension_numbers = #tpu.dot_dimension_numbers<[1], [0], [0], [1], [0, 0, 1, 1], [], []>} : vector<4x20xbf16>, vector<20x256xbf16>, vector<4x256xf32> -> vector<4x256xf32>
    %128 = arith.addf %123, %127 : vector<4x256xf32>
    %129 = vector.extract_strided_slice %22 {offsets = [84, 0], sizes = [4, 20], strides = [1, 1]} : vector<196x20xbf16> to vector<4x20xbf16>
    %c21 = arith.constant 21 : index
    %c0_80 = arith.constant 0 : index
    %c0_81 = arith.constant 0 : index
    %130 = vector.load %arg6[%c21, %c0_80, %c0_81] : memref<49x20x256xbf16, #tpu.memory_space<vmem>>, vector<1x20x256xbf16>
    %131 = vector.shape_cast %130 : vector<1x20x256xbf16> to vector<20x256xbf16>
    %cst_82 = arith.constant dense<0.000000e+00> : vector<4x256xf32>
    %132 = tpu.matmul %129, %131, %cst_82 {dimension_numbers = #tpu.dot_dimension_numbers<[1], [0], [0], [1], [0, 0, 1, 1], [], []>} : vector<4x20xbf16>, vector<20x256xbf16>, vector<4x256xf32> -> vector<4x256xf32>
    %133 = arith.addf %128, %132 : vector<4x256xf32>
    %134 = vector.extract_strided_slice %22 {offsets = [88, 0], sizes = [4, 20], strides = [1, 1]} : vector<196x20xbf16> to vector<4x20xbf16>
    %c22 = arith.constant 22 : index
    %c0_83 = arith.constant 0 : index
    %c0_84 = arith.constant 0 : index
    %135 = vector.load %arg6[%c22, %c0_83, %c0_84] : memref<49x20x256xbf16, #tpu.memory_space<vmem>>, vector<1x20x256xbf16>
    %136 = vector.shape_cast %135 : vector<1x20x256xbf16> to vector<20x256xbf16>
    %cst_85 = arith.constant dense<0.000000e+00> : vector<4x256xf32>
    %137 = tpu.matmul %134, %136, %cst_85 {dimension_numbers = #tpu.dot_dimension_numbers<[1], [0], [0], [1], [0, 0, 1, 1], [], []>} : vector<4x20xbf16>, vector<20x256xbf16>, vector<4x256xf32> -> vector<4x256xf32>
    %138 = arith.addf %133, %137 : vector<4x256xf32>
    %139 = vector.extract_strided_slice %22 {offsets = [92, 0], sizes = [4, 20], strides = [1, 1]} : vector<196x20xbf16> to vector<4x20xbf16>
    %c23 = arith.constant 23 : index
    %c0_86 = arith.constant 0 : index
    %c0_87 = arith.constant 0 : index
    %140 = vector.load %arg6[%c23, %c0_86, %c0_87] : memref<49x20x256xbf16, #tpu.memory_space<vmem>>, vector<1x20x256xbf16>
    %141 = vector.shape_cast %140 : vector<1x20x256xbf16> to vector<20x256xbf16>
    %cst_88 = arith.constant dense<0.000000e+00> : vector<4x256xf32>
    %142 = tpu.matmul %139, %141, %cst_88 {dimension_numbers = #tpu.dot_dimension_numbers<[1], [0], [0], [1], [0, 0, 1, 1], [], []>} : vector<4x20xbf16>, vector<20x256xbf16>, vector<4x256xf32> -> vector<4x256xf32>
    %143 = arith.addf %138, %142 : vector<4x256xf32>
    %144 = vector.extract_strided_slice %22 {offsets = [96, 0], sizes = [4, 20], strides = [1, 1]} : vector<196x20xbf16> to vector<4x20xbf16>
    %c24 = arith.constant 24 : index
    %c0_89 = arith.constant 0 : index
    %c0_90 = arith.constant 0 : index
    %145 = vector.load %arg6[%c24, %c0_89, %c0_90] : memref<49x20x256xbf16, #tpu.memory_space<vmem>>, vector<1x20x256xbf16>
    %146 = vector.shape_cast %145 : vector<1x20x256xbf16> to vector<20x256xbf16>
    %cst_91 = arith.constant dense<0.000000e+00> : vector<4x256xf32>
    %147 = tpu.matmul %144, %146, %cst_91 {dimension_numbers = #tpu.dot_dimension_numbers<[1], [0], [0], [1], [0, 0, 1, 1], [], []>} : vector<4x20xbf16>, vector<20x256xbf16>, vector<4x256xf32> -> vector<4x256xf32>
    %148 = arith.addf %143, %147 : vector<4x256xf32>
    %149 = vector.extract_strided_slice %22 {offsets = [100, 0], sizes = [4, 20], strides = [1, 1]} : vector<196x20xbf16> to vector<4x20xbf16>
    %c25 = arith.constant 25 : index
    %c0_92 = arith.constant 0 : index
    %c0_93 = arith.constant 0 : index
    %150 = vector.load %arg6[%c25, %c0_92, %c0_93] : memref<49x20x256xbf16, #tpu.memory_space<vmem>>, vector<1x20x256xbf16>
    %151 = vector.shape_cast %150 : vector<1x20x256xbf16> to vector<20x256xbf16>
    %cst_94 = arith.constant dense<0.000000e+00> : vector<4x256xf32>
    %152 = tpu.matmul %149, %151, %cst_94 {dimension_numbers = #tpu.dot_dimension_numbers<[1], [0], [0], [1], [0, 0, 1, 1], [], []>} : vector<4x20xbf16>, vector<20x256xbf16>, vector<4x256xf32> -> vector<4x256xf32>
    %153 = arith.addf %148, %152 : vector<4x256xf32>
    %154 = vector.extract_strided_slice %22 {offsets = [104, 0], sizes = [4, 20], strides = [1, 1]} : vector<196x20xbf16> to vector<4x20xbf16>
    %c26 = arith.constant 26 : index
    %c0_95 = arith.constant 0 : index
    %c0_96 = arith.constant 0 : index
    %155 = vector.load %arg6[%c26, %c0_95, %c0_96] : memref<49x20x256xbf16, #tpu.memory_space<vmem>>, vector<1x20x256xbf16>
    %156 = vector.shape_cast %155 : vector<1x20x256xbf16> to vector<20x256xbf16>
    %cst_97 = arith.constant dense<0.000000e+00> : vector<4x256xf32>
    %157 = tpu.matmul %154, %156, %cst_97 {dimension_numbers = #tpu.dot_dimension_numbers<[1], [0], [0], [1], [0, 0, 1, 1], [], []>} : vector<4x20xbf16>, vector<20x256xbf16>, vector<4x256xf32> -> vector<4x256xf32>
    %158 = arith.addf %153, %157 : vector<4x256xf32>
    %159 = vector.extract_strided_slice %22 {offsets = [108, 0], sizes = [4, 20], strides = [1, 1]} : vector<196x20xbf16> to vector<4x20xbf16>
    %c27 = arith.constant 27 : index
    %c0_98 = arith.constant 0 : index
    %c0_99 = arith.constant 0 : index
    %160 = vector.load %arg6[%c27, %c0_98, %c0_99] : memref<49x20x256xbf16, #tpu.memory_space<vmem>>, vector<1x20x256xbf16>
    %161 = vector.shape_cast %160 : vector<1x20x256xbf16> to vector<20x256xbf16>
    %cst_100 = arith.constant dense<0.000000e+00> : vector<4x256xf32>
    %162 = tpu.matmul %159, %161, %cst_100 {dimension_numbers = #tpu.dot_dimension_numbers<[1], [0], [0], [1], [0, 0, 1, 1], [], []>} : vector<4x20xbf16>, vector<20x256xbf16>, vector<4x256xf32> -> vector<4x256xf32>
    %163 = arith.addf %158, %162 : vector<4x256xf32>
    %164 = vector.extract_strided_slice %22 {offsets = [112, 0], sizes = [4, 20], strides = [1, 1]} : vector<196x20xbf16> to vector<4x20xbf16>
    %c28 = arith.constant 28 : index
    %c0_101 = arith.constant 0 : index
    %c0_102 = arith.constant 0 : index
    %165 = vector.load %arg6[%c28, %c0_101, %c0_102] : memref<49x20x256xbf16, #tpu.memory_space<vmem>>, vector<1x20x256xbf16>
    %166 = vector.shape_cast %165 : vector<1x20x256xbf16> to vector<20x256xbf16>
    %cst_103 = arith.constant dense<0.000000e+00> : vector<4x256xf32>
    %167 = tpu.matmul %164, %166, %cst_103 {dimension_numbers = #tpu.dot_dimension_numbers<[1], [0], [0], [1], [0, 0, 1, 1], [], []>} : vector<4x20xbf16>, vector<20x256xbf16>, vector<4x256xf32> -> vector<4x256xf32>
    %168 = arith.addf %163, %167 : vector<4x256xf32>
    %169 = vector.extract_strided_slice %22 {offsets = [116, 0], sizes = [4, 20], strides = [1, 1]} : vector<196x20xbf16> to vector<4x20xbf16>
    %c29 = arith.constant 29 : index
    %c0_104 = arith.constant 0 : index
    %c0_105 = arith.constant 0 : index
    %170 = vector.load %arg6[%c29, %c0_104, %c0_105] : memref<49x20x256xbf16, #tpu.memory_space<vmem>>, vector<1x20x256xbf16>
    %171 = vector.shape_cast %170 : vector<1x20x256xbf16> to vector<20x256xbf16>
    %cst_106 = arith.constant dense<0.000000e+00> : vector<4x256xf32>
    %172 = tpu.matmul %169, %171, %cst_106 {dimension_numbers = #tpu.dot_dimension_numbers<[1], [0], [0], [1], [0, 0, 1, 1], [], []>} : vector<4x20xbf16>, vector<20x256xbf16>, vector<4x256xf32> -> vector<4x256xf32>
    %173 = arith.addf %168, %172 : vector<4x256xf32>
    %174 = vector.extract_strided_slice %22 {offsets = [120, 0], sizes = [4, 20], strides = [1, 1]} : vector<196x20xbf16> to vector<4x20xbf16>
    %c30 = arith.constant 30 : index
    %c0_107 = arith.constant 0 : index
    %c0_108 = arith.constant 0 : index
    %175 = vector.load %arg6[%c30, %c0_107, %c0_108] : memref<49x20x256xbf16, #tpu.memory_space<vmem>>, vector<1x20x256xbf16>
    %176 = vector.shape_cast %175 : vector<1x20x256xbf16> to vector<20x256xbf16>
    %cst_109 = arith.constant dense<0.000000e+00> : vector<4x256xf32>
    %177 = tpu.matmul %174, %176, %cst_109 {dimension_numbers = #tpu.dot_dimension_numbers<[1], [0], [0], [1], [0, 0, 1, 1], [], []>} : vector<4x20xbf16>, vector<20x256xbf16>, vector<4x256xf32> -> vector<4x256xf32>
    %178 = arith.addf %173, %177 : vector<4x256xf32>
    %179 = vector.extract_strided_slice %22 {offsets = [124, 0], sizes = [4, 20], strides = [1, 1]} : vector<196x20xbf16> to vector<4x20xbf16>
    %c31 = arith.constant 31 : index
    %c0_110 = arith.constant 0 : index
    %c0_111 = arith.constant 0 : index
    %180 = vector.load %arg6[%c31, %c0_110, %c0_111] : memref<49x20x256xbf16, #tpu.memory_space<vmem>>, vector<1x20x256xbf16>
    %181 = vector.shape_cast %180 : vector<1x20x256xbf16> to vector<20x256xbf16>
    %cst_112 = arith.constant dense<0.000000e+00> : vector<4x256xf32>
    %182 = tpu.matmul %179, %181, %cst_112 {dimension_numbers = #tpu.dot_dimension_numbers<[1], [0], [0], [1], [0, 0, 1, 1], [], []>} : vector<4x20xbf16>, vector<20x256xbf16>, vector<4x256xf32> -> vector<4x256xf32>
    %183 = arith.addf %178, %182 : vector<4x256xf32>
    %184 = vector.extract_strided_slice %22 {offsets = [128, 0], sizes = [4, 20], strides = [1, 1]} : vector<196x20xbf16> to vector<4x20xbf16>
    %c32 = arith.constant 32 : index
    %c0_113 = arith.constant 0 : index
    %c0_114 = arith.constant 0 : index
    %185 = vector.load %arg6[%c32, %c0_113, %c0_114] : memref<49x20x256xbf16, #tpu.memory_space<vmem>>, vector<1x20x256xbf16>
    %186 = vector.shape_cast %185 : vector<1x20x256xbf16> to vector<20x256xbf16>
    %cst_115 = arith.constant dense<0.000000e+00> : vector<4x256xf32>
    %187 = tpu.matmul %184, %186, %cst_115 {dimension_numbers = #tpu.dot_dimension_numbers<[1], [0], [0], [1], [0, 0, 1, 1], [], []>} : vector<4x20xbf16>, vector<20x256xbf16>, vector<4x256xf32> -> vector<4x256xf32>
    %188 = arith.addf %183, %187 : vector<4x256xf32>
    %189 = vector.extract_strided_slice %22 {offsets = [132, 0], sizes = [4, 20], strides = [1, 1]} : vector<196x20xbf16> to vector<4x20xbf16>
    %c33 = arith.constant 33 : index
    %c0_116 = arith.constant 0 : index
    %c0_117 = arith.constant 0 : index
    %190 = vector.load %arg6[%c33, %c0_116, %c0_117] : memref<49x20x256xbf16, #tpu.memory_space<vmem>>, vector<1x20x256xbf16>
    %191 = vector.shape_cast %190 : vector<1x20x256xbf16> to vector<20x256xbf16>
    %cst_118 = arith.constant dense<0.000000e+00> : vector<4x256xf32>
    %192 = tpu.matmul %189, %191, %cst_118 {dimension_numbers = #tpu.dot_dimension_numbers<[1], [0], [0], [1], [0, 0, 1, 1], [], []>} : vector<4x20xbf16>, vector<20x256xbf16>, vector<4x256xf32> -> vector<4x256xf32>
    %193 = arith.addf %188, %192 : vector<4x256xf32>
    %194 = vector.extract_strided_slice %22 {offsets = [136, 0], sizes = [4, 20], strides = [1, 1]} : vector<196x20xbf16> to vector<4x20xbf16>
    %c34 = arith.constant 34 : index
    %c0_119 = arith.constant 0 : index
    %c0_120 = arith.constant 0 : index
    %195 = vector.load %arg6[%c34, %c0_119, %c0_120] : memref<49x20x256xbf16, #tpu.memory_space<vmem>>, vector<1x20x256xbf16>
    %196 = vector.shape_cast %195 : vector<1x20x256xbf16> to vector<20x256xbf16>
    %cst_121 = arith.constant dense<0.000000e+00> : vector<4x256xf32>
    %197 = tpu.matmul %194, %196, %cst_121 {dimension_numbers = #tpu.dot_dimension_numbers<[1], [0], [0], [1], [0, 0, 1, 1], [], []>} : vector<4x20xbf16>, vector<20x256xbf16>, vector<4x256xf32> -> vector<4x256xf32>
    %198 = arith.addf %193, %197 : vector<4x256xf32>
    %199 = vector.extract_strided_slice %22 {offsets = [140, 0], sizes = [4, 20], strides = [1, 1]} : vector<196x20xbf16> to vector<4x20xbf16>
    %c35 = arith.constant 35 : index
    %c0_122 = arith.constant 0 : index
    %c0_123 = arith.constant 0 : index
    %200 = vector.load %arg6[%c35, %c0_122, %c0_123] : memref<49x20x256xbf16, #tpu.memory_space<vmem>>, vector<1x20x256xbf16>
    %201 = vector.shape_cast %200 : vector<1x20x256xbf16> to vector<20x256xbf16>
    %cst_124 = arith.constant dense<0.000000e+00> : vector<4x256xf32>
    %202 = tpu.matmul %199, %201, %cst_124 {dimension_numbers = #tpu.dot_dimension_numbers<[1], [0], [0], [1], [0, 0, 1, 1], [], []>} : vector<4x20xbf16>, vector<20x256xbf16>, vector<4x256xf32> -> vector<4x256xf32>
    %203 = arith.addf %198, %202 : vector<4x256xf32>
    %204 = vector.extract_strided_slice %22 {offsets = [144, 0], sizes = [4, 20], strides = [1, 1]} : vector<196x20xbf16> to vector<4x20xbf16>
    %c36 = arith.constant 36 : index
    %c0_125 = arith.constant 0 : index
    %c0_126 = arith.constant 0 : index
    %205 = vector.load %arg6[%c36, %c0_125, %c0_126] : memref<49x20x256xbf16, #tpu.memory_space<vmem>>, vector<1x20x256xbf16>
    %206 = vector.shape_cast %205 : vector<1x20x256xbf16> to vector<20x256xbf16>
    %cst_127 = arith.constant dense<0.000000e+00> : vector<4x256xf32>
    %207 = tpu.matmul %204, %206, %cst_127 {dimension_numbers = #tpu.dot_dimension_numbers<[1], [0], [0], [1], [0, 0, 1, 1], [], []>} : vector<4x20xbf16>, vector<20x256xbf16>, vector<4x256xf32> -> vector<4x256xf32>
    %208 = arith.addf %203, %207 : vector<4x256xf32>
    %209 = vector.extract_strided_slice %22 {offsets = [148, 0], sizes = [4, 20], strides = [1, 1]} : vector<196x20xbf16> to vector<4x20xbf16>
    %c37 = arith.constant 37 : index
    %c0_128 = arith.constant 0 : index
    %c0_129 = arith.constant 0 : index
    %210 = vector.load %arg6[%c37, %c0_128, %c0_129] : memref<49x20x256xbf16, #tpu.memory_space<vmem>>, vector<1x20x256xbf16>
    %211 = vector.shape_cast %210 : vector<1x20x256xbf16> to vector<20x256xbf16>
    %cst_130 = arith.constant dense<0.000000e+00> : vector<4x256xf32>
    %212 = tpu.matmul %209, %211, %cst_130 {dimension_numbers = #tpu.dot_dimension_numbers<[1], [0], [0], [1], [0, 0, 1, 1], [], []>} : vector<4x20xbf16>, vector<20x256xbf16>, vector<4x256xf32> -> vector<4x256xf32>
    %213 = arith.addf %208, %212 : vector<4x256xf32>
    %214 = vector.extract_strided_slice %22 {offsets = [152, 0], sizes = [4, 20], strides = [1, 1]} : vector<196x20xbf16> to vector<4x20xbf16>
    %c38 = arith.constant 38 : index
    %c0_131 = arith.constant 0 : index
    %c0_132 = arith.constant 0 : index
    %215 = vector.load %arg6[%c38, %c0_131, %c0_132] : memref<49x20x256xbf16, #tpu.memory_space<vmem>>, vector<1x20x256xbf16>
    %216 = vector.shape_cast %215 : vector<1x20x256xbf16> to vector<20x256xbf16>
    %cst_133 = arith.constant dense<0.000000e+00> : vector<4x256xf32>
    %217 = tpu.matmul %214, %216, %cst_133 {dimension_numbers = #tpu.dot_dimension_numbers<[1], [0], [0], [1], [0, 0, 1, 1], [], []>} : vector<4x20xbf16>, vector<20x256xbf16>, vector<4x256xf32> -> vector<4x256xf32>
    %218 = arith.addf %213, %217 : vector<4x256xf32>
    %219 = vector.extract_strided_slice %22 {offsets = [156, 0], sizes = [4, 20], strides = [1, 1]} : vector<196x20xbf16> to vector<4x20xbf16>
    %c39 = arith.constant 39 : index
    %c0_134 = arith.constant 0 : index
    %c0_135 = arith.constant 0 : index
    %220 = vector.load %arg6[%c39, %c0_134, %c0_135] : memref<49x20x256xbf16, #tpu.memory_space<vmem>>, vector<1x20x256xbf16>
    %221 = vector.shape_cast %220 : vector<1x20x256xbf16> to vector<20x256xbf16>
    %cst_136 = arith.constant dense<0.000000e+00> : vector<4x256xf32>
    %222 = tpu.matmul %219, %221, %cst_136 {dimension_numbers = #tpu.dot_dimension_numbers<[1], [0], [0], [1], [0, 0, 1, 1], [], []>} : vector<4x20xbf16>, vector<20x256xbf16>, vector<4x256xf32> -> vector<4x256xf32>
    %223 = arith.addf %218, %222 : vector<4x256xf32>
    %224 = vector.extract_strided_slice %22 {offsets = [160, 0], sizes = [4, 20], strides = [1, 1]} : vector<196x20xbf16> to vector<4x20xbf16>
    %c40 = arith.constant 40 : index
    %c0_137 = arith.constant 0 : index
    %c0_138 = arith.constant 0 : index
    %225 = vector.load %arg6[%c40, %c0_137, %c0_138] : memref<49x20x256xbf16, #tpu.memory_space<vmem>>, vector<1x20x256xbf16>
    %226 = vector.shape_cast %225 : vector<1x20x256xbf16> to vector<20x256xbf16>
    %cst_139 = arith.constant dense<0.000000e+00> : vector<4x256xf32>
    %227 = tpu.matmul %224, %226, %cst_139 {dimension_numbers = #tpu.dot_dimension_numbers<[1], [0], [0], [1], [0, 0, 1, 1], [], []>} : vector<4x20xbf16>, vector<20x256xbf16>, vector<4x256xf32> -> vector<4x256xf32>
    %228 = arith.addf %223, %227 : vector<4x256xf32>
    %229 = vector.extract_strided_slice %22 {offsets = [164, 0], sizes = [4, 20], strides = [1, 1]} : vector<196x20xbf16> to vector<4x20xbf16>
    %c41 = arith.constant 41 : index
    %c0_140 = arith.constant 0 : index
    %c0_141 = arith.constant 0 : index
    %230 = vector.load %arg6[%c41, %c0_140, %c0_141] : memref<49x20x256xbf16, #tpu.memory_space<vmem>>, vector<1x20x256xbf16>
    %231 = vector.shape_cast %230 : vector<1x20x256xbf16> to vector<20x256xbf16>
    %cst_142 = arith.constant dense<0.000000e+00> : vector<4x256xf32>
    %232 = tpu.matmul %229, %231, %cst_142 {dimension_numbers = #tpu.dot_dimension_numbers<[1], [0], [0], [1], [0, 0, 1, 1], [], []>} : vector<4x20xbf16>, vector<20x256xbf16>, vector<4x256xf32> -> vector<4x256xf32>
    %233 = arith.addf %228, %232 : vector<4x256xf32>
    %234 = vector.extract_strided_slice %22 {offsets = [168, 0], sizes = [4, 20], strides = [1, 1]} : vector<196x20xbf16> to vector<4x20xbf16>
    %c42 = arith.constant 42 : index
    %c0_143 = arith.constant 0 : index
    %c0_144 = arith.constant 0 : index
    %235 = vector.load %arg6[%c42, %c0_143, %c0_144] : memref<49x20x256xbf16, #tpu.memory_space<vmem>>, vector<1x20x256xbf16>
    %236 = vector.shape_cast %235 : vector<1x20x256xbf16> to vector<20x256xbf16>
    %cst_145 = arith.constant dense<0.000000e+00> : vector<4x256xf32>
    %237 = tpu.matmul %234, %236, %cst_145 {dimension_numbers = #tpu.dot_dimension_numbers<[1], [0], [0], [1], [0, 0, 1, 1], [], []>} : vector<4x20xbf16>, vector<20x256xbf16>, vector<4x256xf32> -> vector<4x256xf32>
    %238 = arith.addf %233, %237 : vector<4x256xf32>
    %239 = vector.extract_strided_slice %22 {offsets = [172, 0], sizes = [4, 20], strides = [1, 1]} : vector<196x20xbf16> to vector<4x20xbf16>
    %c43 = arith.constant 43 : index
    %c0_146 = arith.constant 0 : index
    %c0_147 = arith.constant 0 : index
    %240 = vector.load %arg6[%c43, %c0_146, %c0_147] : memref<49x20x256xbf16, #tpu.memory_space<vmem>>, vector<1x20x256xbf16>
    %241 = vector.shape_cast %240 : vector<1x20x256xbf16> to vector<20x256xbf16>
    %cst_148 = arith.constant dense<0.000000e+00> : vector<4x256xf32>
    %242 = tpu.matmul %239, %241, %cst_148 {dimension_numbers = #tpu.dot_dimension_numbers<[1], [0], [0], [1], [0, 0, 1, 1], [], []>} : vector<4x20xbf16>, vector<20x256xbf16>, vector<4x256xf32> -> vector<4x256xf32>
    %243 = arith.addf %238, %242 : vector<4x256xf32>
    %244 = vector.extract_strided_slice %22 {offsets = [176, 0], sizes = [4, 20], strides = [1, 1]} : vector<196x20xbf16> to vector<4x20xbf16>
    %c44 = arith.constant 44 : index
    %c0_149 = arith.constant 0 : index
    %c0_150 = arith.constant 0 : index
    %245 = vector.load %arg6[%c44, %c0_149, %c0_150] : memref<49x20x256xbf16, #tpu.memory_space<vmem>>, vector<1x20x256xbf16>
    %246 = vector.shape_cast %245 : vector<1x20x256xbf16> to vector<20x256xbf16>
    %cst_151 = arith.constant dense<0.000000e+00> : vector<4x256xf32>
    %247 = tpu.matmul %244, %246, %cst_151 {dimension_numbers = #tpu.dot_dimension_numbers<[1], [0], [0], [1], [0, 0, 1, 1], [], []>} : vector<4x20xbf16>, vector<20x256xbf16>, vector<4x256xf32> -> vector<4x256xf32>
    %248 = arith.addf %243, %247 : vector<4x256xf32>
    %249 = vector.extract_strided_slice %22 {offsets = [180, 0], sizes = [4, 20], strides = [1, 1]} : vector<196x20xbf16> to vector<4x20xbf16>
    %c45 = arith.constant 45 : index
    %c0_152 = arith.constant 0 : index
    %c0_153 = arith.constant 0 : index
    %250 = vector.load %arg6[%c45, %c0_152, %c0_153] : memref<49x20x256xbf16, #tpu.memory_space<vmem>>, vector<1x20x256xbf16>
    %251 = vector.shape_cast %250 : vector<1x20x256xbf16> to vector<20x256xbf16>
    %cst_154 = arith.constant dense<0.000000e+00> : vector<4x256xf32>
    %252 = tpu.matmul %249, %251, %cst_154 {dimension_numbers = #tpu.dot_dimension_numbers<[1], [0], [0], [1], [0, 0, 1, 1], [], []>} : vector<4x20xbf16>, vector<20x256xbf16>, vector<4x256xf32> -> vector<4x256xf32>
    %253 = arith.addf %248, %252 : vector<4x256xf32>
    %254 = vector.extract_strided_slice %22 {offsets = [184, 0], sizes = [4, 20], strides = [1, 1]} : vector<196x20xbf16> to vector<4x20xbf16>
    %c46 = arith.constant 46 : index
    %c0_155 = arith.constant 0 : index
    %c0_156 = arith.constant 0 : index
    %255 = vector.load %arg6[%c46, %c0_155, %c0_156] : memref<49x20x256xbf16, #tpu.memory_space<vmem>>, vector<1x20x256xbf16>
    %256 = vector.shape_cast %255 : vector<1x20x256xbf16> to vector<20x256xbf16>
    %cst_157 = arith.constant dense<0.000000e+00> : vector<4x256xf32>
    %257 = tpu.matmul %254, %256, %cst_157 {dimension_numbers = #tpu.dot_dimension_numbers<[1], [0], [0], [1], [0, 0, 1, 1], [], []>} : vector<4x20xbf16>, vector<20x256xbf16>, vector<4x256xf32> -> vector<4x256xf32>
    %258 = arith.addf %253, %257 : vector<4x256xf32>
    %259 = vector.extract_strided_slice %22 {offsets = [188, 0], sizes = [4, 20], strides = [1, 1]} : vector<196x20xbf16> to vector<4x20xbf16>
    %c47 = arith.constant 47 : index
    %c0_158 = arith.constant 0 : index
    %c0_159 = arith.constant 0 : index
    %260 = vector.load %arg6[%c47, %c0_158, %c0_159] : memref<49x20x256xbf16, #tpu.memory_space<vmem>>, vector<1x20x256xbf16>
    %261 = vector.shape_cast %260 : vector<1x20x256xbf16> to vector<20x256xbf16>
    %cst_160 = arith.constant dense<0.000000e+00> : vector<4x256xf32>
    %262 = tpu.matmul %259, %261, %cst_160 {dimension_numbers = #tpu.dot_dimension_numbers<[1], [0], [0], [1], [0, 0, 1, 1], [], []>} : vector<4x20xbf16>, vector<20x256xbf16>, vector<4x256xf32> -> vector<4x256xf32>
    %263 = arith.addf %258, %262 : vector<4x256xf32>
    %264 = vector.extract_strided_slice %22 {offsets = [192, 0], sizes = [4, 20], strides = [1, 1]} : vector<196x20xbf16> to vector<4x20xbf16>
    %c48 = arith.constant 48 : index
    %c0_161 = arith.constant 0 : index
    %c0_162 = arith.constant 0 : index
    %265 = vector.load %arg6[%c48, %c0_161, %c0_162] : memref<49x20x256xbf16, #tpu.memory_space<vmem>>, vector<1x20x256xbf16>
    %266 = vector.shape_cast %265 : vector<1x20x256xbf16> to vector<20x256xbf16>
    %cst_163 = arith.constant dense<0.000000e+00> : vector<4x256xf32>
    %267 = tpu.matmul %264, %266, %cst_163 {dimension_numbers = #tpu.dot_dimension_numbers<[1], [0], [0], [1], [0, 0, 1, 1], [], []>} : vector<4x20xbf16>, vector<20x256xbf16>, vector<4x256xf32> -> vector<4x256xf32>
    %268 = arith.addf %263, %267 : vector<4x256xf32>
    %c0_164 = arith.constant 0 : index
    %c0_165 = arith.constant 0 : index
    %269 = vector.load %arg7[%c0_164, %c0_165] : memref<1x256xf32, #tpu.memory_space<vmem>>, vector<1x256xf32>
    %270 = vector.broadcast %269 : vector<1x256xf32> to vector<4x256xf32>
    %271 = arith.addf %268, %270 : vector<4x256xf32>
    %272 = arith.truncf %271 : vector<4x256xf32> to vector<4x256xbf16>
    %c0_166 = arith.constant 0 : index
    %c0_167 = arith.constant 0 : index
    %273 = vector.load %arg8[%c0_166, %c0_167] : memref<256x1024xbf16, #tpu.memory_space<vmem>>, vector<256x1024xbf16>
    %cst_168 = arith.constant dense<0.000000e+00> : vector<4x1024xf32>
    %274 = tpu.matmul %272, %273, %cst_168 {dimension_numbers = #tpu.dot_dimension_numbers<[1], [0], [0], [1], [0, 0, 1, 1], [], []>} : vector<4x256xbf16>, vector<256x1024xbf16>, vector<4x1024xf32> -> vector<4x1024xf32>
    %c0_169 = arith.constant 0 : index
    %c0_170 = arith.constant 0 : index
    %275 = vector.load %arg10[%c0_169, %c0_170] : memref<1x1024xf32, #tpu.memory_space<vmem>>, vector<1x1024xf32>
    %276 = vector.broadcast %275 : vector<1x1024xf32> to vector<4x1024xf32>
    %277 = arith.addf %274, %276 : vector<4x1024xf32>
    %c0_171 = arith.constant 0 : index
    %c0_172 = arith.constant 0 : index
    %278 = vector.load %arg9[%c0_171, %c0_172] : memref<256x1024xbf16, #tpu.memory_space<vmem>>, vector<256x1024xbf16>
    %c0_173 = arith.constant 0 : index
    %c0_174 = arith.constant 0 : index
    %c0_175 = arith.constant 0 : index
    %279 = vector.load %arg11[%c0_173, %c0_174, %c0_175] : memref<1x4x256xf32, #tpu.memory_space<vmem>>, vector<1x4x256xf32>
    %280 = vector.shape_cast %279 : vector<1x4x256xf32> to vector<4x256xf32>
    %c0_176 = arith.constant 0 : index
    %c0_177 = arith.constant 0 : index
    %c0_178 = arith.constant 0 : index
    %281 = vector.load %arg12[%c0_176, %c0_177, %c0_178] : memref<1x4x256xf32, #tpu.memory_space<vmem>>, vector<1x4x256xf32>
    %282 = vector.shape_cast %281 : vector<1x4x256xf32> to vector<4x256xf32>
    %283 = arith.truncf %280 : vector<4x256xf32> to vector<4x256xbf16>
    %cst_179 = arith.constant dense<0.000000e+00> : vector<4x1024xf32>
    %284 = tpu.matmul %283, %278, %cst_179 {dimension_numbers = #tpu.dot_dimension_numbers<[1], [0], [0], [1], [0, 0, 1, 1], [], []>} : vector<4x256xbf16>, vector<256x1024xbf16>, vector<4x1024xf32> -> vector<4x1024xf32>
    %285 = arith.addf %277, %284 : vector<4x1024xf32>
    %286 = vector.extract_strided_slice %285 {offsets = [0, 0], sizes = [4, 256], strides = [1, 1]} : vector<4x1024xf32> to vector<4x256xf32>
    %287 = arith.negf %286 : vector<4x256xf32>
    %288 = math.exp %287 : vector<4x256xf32>
    %cst_180 = arith.constant 1.000000e+00 : f32
    %289 = vector.broadcast %cst_180 : f32 to vector<4x256xf32>
    %290 = arith.addf %289, %288 : vector<4x256xf32>
    %291 = arith.divf %289, %290 : vector<4x256xf32>
    %292 = vector.extract_strided_slice %285 {offsets = [0, 256], sizes = [4, 256], strides = [1, 1]} : vector<4x1024xf32> to vector<4x256xf32>
    %293 = arith.negf %292 : vector<4x256xf32>
    %294 = math.exp %293 : vector<4x256xf32>
    %cst_181 = arith.constant 1.000000e+00 : f32
    %295 = vector.broadcast %cst_181 : f32 to vector<4x256xf32>
    %296 = arith.addf %295, %294 : vector<4x256xf32>
    %297 = arith.divf %295, %296 : vector<4x256xf32>
    %298 = vector.extract_strided_slice %285 {offsets = [0, 512], sizes = [4, 256], strides = [1, 1]} : vector<4x1024xf32> to vector<4x256xf32>
    %299 = math.tanh %298 : vector<4x256xf32>
    %300 = vector.extract_strided_slice %285 {offsets = [0, 768], sizes = [4, 256], strides = [1, 1]} : vector<4x1024xf32> to vector<4x256xf32>
    %301 = arith.negf %300 : vector<4x256xf32>
    %302 = math.exp %301 : vector<4x256xf32>
    %cst_182 = arith.constant 1.000000e+00 : f32
    %303 = vector.broadcast %cst_182 : f32 to vector<4x256xf32>
    %304 = arith.addf %303, %302 : vector<4x256xf32>
    %305 = arith.divf %303, %304 : vector<4x256xf32>
    %306 = arith.mulf %297, %282 : vector<4x256xf32>
    %307 = arith.mulf %291, %299 : vector<4x256xf32>
    %308 = arith.addf %306, %307 : vector<4x256xf32>
    %309 = math.tanh %308 : vector<4x256xf32>
    %310 = arith.mulf %305, %309 : vector<4x256xf32>
    %311 = vector.shape_cast %310 : vector<4x256xf32> to vector<1x4x256xf32>
    %c0_183 = arith.constant 0 : index
    %c0_184 = arith.constant 0 : index
    %c0_185 = arith.constant 0 : index
    %c0_186 = arith.constant 0 : index
    %312 = vector.load %arg13[%c0_183, %c0_184, %c0_185, %c0_186] : memref<1x1x4x256xf32, #tpu.memory_space<vmem>>, vector<1x1x4x256xf32>
    %313 = vector.shape_cast %312 : vector<1x1x4x256xf32> to vector<1x4x256xf32>
    %314 = vector.shape_cast %311 : vector<1x4x256xf32> to vector<1x1x4x256xf32>
    tpu.vector_store %arg13[%c0_183, %c0_184, %c0_185, %c0_186], %314 {strides = array<i32>} : memref<1x1x4x256xf32, #tpu.memory_space<vmem>>, vector<1x1x4x256xf32>,
    %c0_187 = arith.constant 0 : index
    %c0_188 = arith.constant 0 : index
    %c0_189 = arith.constant 0 : index
    %315 = vector.load %arg14[%c0_187, %c0_188, %c0_189] : memref<1x4x256xf32, #tpu.memory_space<vmem>>, vector<1x4x256xf32>
    %316 = vector.shape_cast %315 : vector<1x4x256xf32> to vector<4x256xf32>
    %317 = vector.shape_cast %310 : vector<4x256xf32> to vector<1x4x256xf32>
    tpu.vector_store %arg14[%c0_187, %c0_188, %c0_189], %317 {strides = array<i32>} : memref<1x4x256xf32, #tpu.memory_space<vmem>>, vector<1x4x256xf32>,
    %c0_190 = arith.constant 0 : index
    %c0_191 = arith.constant 0 : index
    %c0_192 = arith.constant 0 : index
    %318 = vector.load %arg15[%c0_190, %c0_191, %c0_192] : memref<1x4x256xf32, #tpu.memory_space<vmem>>, vector<1x4x256xf32>
    %319 = vector.shape_cast %318 : vector<1x4x256xf32> to vector<4x256xf32>
    %320 = vector.shape_cast %308 : vector<4x256xf32> to vector<1x4x256xf32>
    tpu.vector_store %arg15[%c0_190, %c0_191, %c0_192], %320 {strides = array<i32>} : memref<1x4x256xf32, #tpu.memory_space<vmem>>, vector<1x4x256xf32>,
    return
  }
  func.func @transform_0(%arg0: i32) -> (i32, i32, i32) {
    %c0_i32 = arith.constant 0 : i32
    %c0_i32_0 = arith.constant 0 : i32
    %c0_i32_1 = arith.constant 0 : i32
    return %arg0, %c0_i32, %c0_i32_0 : i32, i32, i32
  }
  func.func @transform_1(%arg0: i32) -> (i32, i32) {
    %c0_i32 = arith.constant 0 : i32
    %c0_i32_0 = arith.constant 0 : i32
    %c0_i32_1 = arith.constant 0 : i32
    return %c0_i32, %c0_i32_0 : i32, i32
  }
  func.func @transform_2(%arg0: i32) -> (i32, i32) {
    %c0_i32 = arith.constant 0 : i32
    %c0_i32_0 = arith.constant 0 : i32
    %c0_i32_1 = arith.constant 0 : i32
    return %c0_i32, %c0_i32_0 : i32, i32
  }
  func.func @transform_3(%arg0: i32) -> (i32, i32) {
    %c0_i32 = arith.constant 0 : i32
    %c0_i32_0 = arith.constant 0 : i32
    %c0_i32_1 = arith.constant 0 : i32
    return %c0_i32, %c0_i32_0 : i32, i32
  }
  func.func @transform_4(%arg0: i32) -> (i32, i32) {
    %c0_i32 = arith.constant 0 : i32
    %c0_i32_0 = arith.constant 0 : i32
    %c0_i32_1 = arith.constant 0 : i32
    return %c0_i32, %c0_i32_0 : i32, i32
  }
  func.func @transform_5(%arg0: i32) -> (i32, i32, i32) {
    %c0_i32 = arith.constant 0 : i32
    %c0_i32_0 = arith.constant 0 : i32
    %c0_i32_1 = arith.constant 0 : i32
    %c0_i32_2 = arith.constant 0 : i32
    return %c0_i32, %c0_i32_0, %c0_i32_1 : i32, i32, i32
  }
  func.func @transform_6(%arg0: i32) -> (i32, i32) {
    %c0_i32 = arith.constant 0 : i32
    %c0_i32_0 = arith.constant 0 : i32
    %c0_i32_1 = arith.constant 0 : i32
    return %c0_i32, %c0_i32_0 : i32, i32
  }
  func.func @transform_7(%arg0: i32) -> (i32, i32) {
    %c0_i32 = arith.constant 0 : i32
    %c0_i32_0 = arith.constant 0 : i32
    %c0_i32_1 = arith.constant 0 : i32
    return %c0_i32, %c0_i32_0 : i32, i32
  }
  func.func @transform_8(%arg0: i32) -> (i32, i32) {
    %c0_i32 = arith.constant 0 : i32
    %c0_i32_0 = arith.constant 0 : i32
    %c0_i32_1 = arith.constant 0 : i32
    return %c0_i32, %c0_i32_0 : i32, i32
  }
  func.func @transform_9(%arg0: i32) -> (i32, i32) {
    %c0_i32 = arith.constant 0 : i32
    %c0_i32_0 = arith.constant 0 : i32
    %c0_i32_1 = arith.constant 0 : i32
    return %c0_i32, %c0_i32_0 : i32, i32
  }
  func.func @transform_10(%arg0: i32) -> (i32, i32, i32) {
    %c0_i32 = arith.constant 0 : i32
    %c0_i32_0 = arith.constant 0 : i32
    %c0_i32_1 = arith.constant 0 : i32
    return %arg0, %c0_i32, %c0_i32_0 : i32, i32, i32
  }
  func.func @transform_11(%arg0: i32) -> (i32, i32, i32) {
    %c0_i32 = arith.constant 0 : i32
    %c0_i32_0 = arith.constant 0 : i32
    %c0_i32_1 = arith.constant 0 : i32
    return %arg0, %c0_i32, %c0_i32_0 : i32, i32, i32
  }
  func.func @transform_12(%arg0: i32) -> (i32, i32, i32, i32) {
    %c0_i32 = arith.constant 0 : i32
    %c0_i32_0 = arith.constant 0 : i32
    %c0_i32_1 = arith.constant 0 : i32
    %c0_i32_2 = arith.constant 0 : i32
    return %arg0, %c0_i32, %c0_i32_0, %c0_i32_1 : i32, i32, i32, i32
  }
  func.func @transform_13(%arg0: i32) -> (i32, i32, i32) {
    %c0_i32 = arith.constant 0 : i32
    %c0_i32_0 = arith.constant 0 : i32
    %c0_i32_1 = arith.constant 0 : i32
    return %arg0, %c0_i32, %c0_i32_0 : i32, i32, i32
  }
  func.func @transform_14(%arg0: i32) -> (i32, i32, i32) {
    %c0_i32 = arith.constant 0 : i32
    %c0_i32_0 = arith.constant 0 : i32
    %c0_i32_1 = arith.constant 0 : i32
    return %arg0, %c0_i32, %c0_i32_0 : i32, i32, i32
  }
}

</mosaic_0001>

<bundles_post_ra>
// kernel: squeeze.2
= control target key start
LH: loop header
LB: loop body
LE: loop exit
PB: predicated region body
PF: predicated region fallthrough
CT: control target
= control target key end

     0   :  { %s74_s0 = inlined_call_operand.vmem [shape: f32[1,8,256], index: 0, kind: input, shape index: {}]   ;;  %s75_s1 = inlined_call_operand.vmem [shape: f32[2,4,256], index: 1, kind: output, shape index: {}]  }
   0x1   :  { %v2_v0 = vld [vmem:[%s74_s0] sm:$0xff]   ;;  %v42_v1 = vld [vmem:[%s74_s0 + $0x8] sm:$0xff]  }
   0x2   :  { %3 = vst [vmem:[#allocation0] sm:$0xf] %v2_v0   ;;  %5 = vst [vmem:[#allocation0 + $0xc] sm:$0xf0] %v2_v0  }
   0x3   :  { %9 = vst [vmem:[#allocation0 + $0x8] sm:$0xf] %v42_v1   ;;  %11 = vst [vmem:[#allocation0 + $0x14] sm:$0xf0] %v42_v1  }
   0x9   :  { %v16_v2 = vld [vmem:[#allocation0] sm:$0xf]  ;;  %v27_v4 = vld [vmem:[#allocation0 + $0x10] sm:$0xf] }
   0xa   :  { %v21_v3 = vld [vmem:[#allocation0 + $0x8] sm:$0xf]  ;;  %19 = vst [vmem:[%s75_s1] sm:$0xf] %v16_v2  ;;  %44 = vst [vmem:[%s75_s1 + $0x8] sm:$0xf] %v27_v4 }
   0xb   :  { %43 = vst [vmem:[%s75_s1 + $0x4] sm:$0xf] %v21_v3  ;;  %v34_v5 = vld [vmem:[#allocation0 + $0x18] sm:$0xf] }
   0xc   :  { %45 = vst [vmem:[%s75_s1 + $0xc] sm:$0xf] %v34_v5 }

// kernel: agent_forward.1
= control target key start
LH: loop header
LB: loop body
LE: loop exit
PB: predicated region body
PF: predicated region fallthrough
CT: control target
= control target key end

     0   :  { %s8308_s29 = smov 0   ;;  %s10186_s0 = inlined_call_operand.vmem [shape: f32[2,196,3], index: 0, kind: input, shape index: {}]   ;;  %s10187_s1 = inlined_call_operand.vmem [shape: f32[3,16], index: 1, kind: input, shape index: {}]   ;;  %s10188_s2 = inlined_call_operand.vmem [shape: f32[1,16], index: 2, kind: input, shape index: {}]   ;;  %s10189_s3 = inlined_call_operand.vmem [shape: f32[16,20], index: 3, kind: input, shape index: {}]   ;;  %s10190_s4 = inlined_call_operand.vmem [shape: f32[1,20], index: 4, kind: input, shape index: {}]   ;;  %s10191_s5 = inlined_call_operand.vmem [shape: bf16[49,20,256], index: 5, kind: input, shape index: {}]   ;;  %s10192_s6 = inlined_call_operand.vmem [shape: f32[1,256], index: 6, kind: input, shape index: {}]   ;;  %s10193_s7 = inlined_call_operand.vmem [shape: bf16[256,1024], index: 7, kind: input, shape index: {}]   ;;  %s10194_s8 = inlined_call_operand.vmem [shape: bf16[256,1024], index: 8, kind: input, shape index: {}]   ;;  %s10195_s9 = inlined_call_operand.vmem [shape: f32[1,1024], index: 9, kind: input, shape index: {}]   ;;  %s10196_s10 = inlined_call_operand.vmem [shape: f32[2,4,256], index: 10, kind: input, shape index: {}]   ;;  %s10197_s11 = inlined_call_operand.vmem [shape: f32[2,4,256], index: 11, kind: input, shape index: {}]   ;;  %s10198_s12 = inlined_call_operand.vmem [shape: f32[2,1,4,256], index: 12, kind: output, shape index: {0}]   ;;  %s10199_s13 = inlined_call_operand.vmem [shape: f32[2,4,256], index: 13, kind: output, shape index: {1}]   ;;  %s10200_s14 = inlined_call_operand.vmem [shape: f32[2,4,256], index: 14, kind: output, shape index: {2}]  }
   0x1 LB: > { %s6943_s30 = sadd.s32 4294967295, %s8228_s29   ;;  %p6947_p0 = scmp.ge.s32.totalorder %s8228_s29, 1  ;;  %s8228_s29 = sphi %s8308_s29, %s25_s29  }
   0x2   : > { %p437_p1 = scmp.lt.s32.totalorder %s8228_s29, 3 }
   0x4   : > { %p438_p2 = pnand %p6947_p0, %p437_p1 }
   0x5   : > { %p503_p3 = scmp.lt.s32.totalorder (!%p438_p2), %s6943_s30, 1 }
   0x6   : > { %441 = sbr.rel (%p438_p2) target bundleno = 1241 (0x4d9), region = 68 }
   0xb   : > { %v559_v0 = vld [vmem:[%s10187_s1] sm:$0x7]  ;;  %vm643_vm0 = vcmask 1042432   ;;  %v8230_v1 = vmov 0.0   ;;  %vm8231_vm1 = vmmov 0   ;;  %s10202_s30 = smov (!%p503_p3, %s6943_s30), 1 }
   0xc   : > { %7772 = vmatprep.subr.mxu0 %v8230_v1  ;;  %7774 = vmatprep.mubr.msk.f32.mxu0 %vm8231_vm1, %v8230_v1  ;;  %s7930_s17 = smul.u32 200, %s10202_s30  ;;  %vm567_vm2 = vcmask 23552   ;;  %v913_v21 = vld [vmem:[%s10189_s3 + $0x8] sm:$0xff]  ;;  %v912_v22 = vld [vmem:[%s10189_s3] sm:$0xff]  ;;  %vm1303_vm3 = vcmask 1041408   ;;  %vm921_vm5 = vcmask 130048  }
   0xd   : > { %7773 = vmatpush3.msk.msra.mxu0 %vm643_vm0, %v559_v0  ;;  %7928 = vmatprep.subr.mxu1 %v8230_v1  ;;  %v7014_v29 = vld [vmem:[%s10191_s5 + $0x28] sm:$0x33]  ;;  %v1277_v32 = vld [vmem:[%s10191_s5 + $0x10] sm:$0x33]  ;;  %v7946_v35 = vld [vmem:[%s10191_s5 + $0x18] ss:$8 sps:$4 sm:$0xff]  }
   0xe   : > { %7929 = vmatpush3.msk.msra.mxu1 %vm643_vm0, %v559_v0  ;;  %7846 = vmatprep.mubr.msk.f32.mxu1 %vm8231_vm1, %v8230_v1  ;;  %s8332_s20 = scalar_lea.vmem %s10186_s0, %s7930_s17  ;;  %v7018_v30 = vcombine.high %v7014_v29, %v7014_v29  ;;  %v7017_v31 = vcombine.low %v7014_v29, %v7014_v29  ;;  %v7024_v33 = vcombine.high %v1277_v32, %v1277_v32  ;;  %v7948_v36 = vld [vmem:[%s10191_s5 + $0x1c] ss:$8 sps:$4 sm:$0xff]   ;;  %v8457_v37 = vld [vmem:[%s10188_s2] ss:$0 sm:$0xff]  ;;  %s9735_s17 = sshll.u32 %s10202_s30, 3 }
   0xf   : > { %7849 = vmatprep.subr.mxu1 %v8230_v1  ;;  %v534_v2 = vld [vmem:[%s8332_s20] sm:$0xff]  ;;  %v535_v3 = vld [vmem:[%s8332_s20 + $0x8] sm:$0xff]  ;;  %v536_v4 = vld [vmem:[%s8332_s20 + $0x10] sm:$0xff]  ;;  %v7023_v39 = vcombine.low %v1277_v32, %v1277_v32  ;;  %s512_s25 = scalar_lea.vmem %s10196_s10, %s9735_s17  ;;  %s517_s21 = scalar_lea.vmem %s10197_s11, %s9735_s17 }
  0x10   : > { %7775 = vmatmul.mubr.msk.f32.vlgmr.msra.gmra.mxu0 %vm567_vm2, %v534_v2  ;;  %v537_v5 = vld [vmem:[%s8332_s20 + $0x18] sm:$0xff]  ;;  %v558_v6 = vld [vmem:[%s8332_s20 + $0xc0] sm:$0xf]  ;;  %v539_v8 = vld [vmem:[%s8332_s20 + $0x28] sm:$0xff]  ;;  %7019 = vmatprep.subr.msk.bf16.mxu0 %vm1303_vm3, %v7018_v30  ;;  %v1305_v34 = vsel %vm1303_vm3, %v7017_v31, 0  ;;  %s532_s24 = scalar_lea.vmem %s10200_s14, %s9735_s17  ;;  %s527_s15 = scalar_lea.vmem %s10199_s13, %s9735_s17 }
  0x11   : > { %7777 = vmatprep.mubr.msk.f32.mxu0 %vm8231_vm1, %v8230_v1  ;;  %7847 = vmatmul.mubr.msk.f32.vlgmr.msra.gmra.mxu1 %vm567_vm2, %v558_v6  ;;  %v538_v7 = vld [vmem:[%s8332_s20 + $0x20] sm:$0xff]  ;;  %v540_v9 = vld [vmem:[%s8332_s20 + $0x30] sm:$0xff]  ;;  %v541_v10 = vld [vmem:[%s8332_s20 + $0x38] sm:$0xff]  ;;  %v1370_v44 = vsel %vm1303_vm3, %v7023_v39, 0 }
  0x12   : > { %7853 = vmatprep.mubr.msk.f32.mxu1 %vm8231_vm1, %v8230_v1  ;;  %v542_v11 = vld [vmem:[%s8332_s20 + $0x40] sm:$0xff]  ;;  %v543_v12 = vld [vmem:[%s8332_s20 + $0x48] sm:$0xff]  ;;  %v544_v13 = vld [vmem:[%s8332_s20 + $0x50] sm:$0xff]  ;;  %7850 = vmatpush3.msra.mxu1 %v913_v21 }
  0x13   : > { %v545_v14 = vld [vmem:[%s8332_s20 + $0x58] sm:$0xff]  ;;  %v546_v15 = vld [vmem:[%s8332_s20 + $0x60] sm:$0xff]  ;;  %v547_v16 = vld [vmem:[%s8332_s20 + $0x68] sm:$0xff]  ;;  %7851 = vmatprep.subr.mxu1 %v8230_v1  ;;  %1323 = vmatpush1.bf16.msra.mxu0 %v1305_v34 }
  0x14   : > { %7778 = vmatmul.mubr.msk.f32.gmra.mxu0 %vm567_vm2, %v535_v3  ;;  %v548_v17 = vld [vmem:[%s8332_s20 + $0x70] sm:$0xff]  ;;  %v549_v18 = vld [vmem:[%s8332_s20 + $0x78] sm:$0xff]  ;;  %v550_v19 = vld [vmem:[%s8332_s20 + $0x80] sm:$0xff]  ;;  %7852 = vmatpush3.msra.mxu1 %v912_v22 }
  0x15   : > { %7780 = vmatprep.mubr.msk.f32.mxu0 %vm8231_vm1, %v8230_v1  ;;  %v551_v20 = vld [vmem:[%s8332_s20 + $0x88] sm:$0xff]  ;;  %v552_v23 = vld [vmem:[%s8332_s20 + $0x90] sm:$0xff]  ;;  %v553_v24 = vld [vmem:[%s8332_s20 + $0x98] sm:$0xff]  ;;  %7025 = vmatprep.subr.msk.bf16.mxu1 %vm1303_vm3, %v7024_v33 }
  0x16   : > { %v554_v25 = vld [vmem:[%s8332_s20 + $0xa0] sm:$0xff]  ;;  %v555_v26 = vld [vmem:[%s8332_s20 + $0xa8] sm:$0xff]  ;;  %v556_v27 = vld [vmem:[%s8332_s20 + $0xb0] sm:$0xff]  ;;  %1324 = vmatprep.subr.bf16.mxu0 %v7948_v36 }
  0x17   : > { %v557_v28 = vld [vmem:[%s8332_s20 + $0xb8] sm:$0xff]  ;;  %1325 = vmatpush1.bf16.msra.mxu0 %v7946_v35  ;;  %v7951_v45 = vld [vmem:[%s10191_s5 + $0x4] ss:$8 sps:$4 sm:$0xff]   ;;  %v7949_v50 = vld [vmem:[%s10191_s5] ss:$8 sps:$4 sm:$0xff]  }
  0x18   : > { %7781 = vmatmul.mubr.msk.f32.gmra.mxu0 %vm567_vm2, %v536_v4 }
  0x19   : > { %7783 = vmatprep.mubr.msk.f32.mxu0 %vm8231_vm1, %v8230_v1 }
  0x1c   : > { %7784 = vmatmul.mubr.msk.f32.gmra.mxu0 %vm567_vm2, %v537_v5 }
  0x1d   : > { %7786 = vmatprep.mubr.msk.f32.mxu0 %vm8231_vm1, %v8230_v1 }
  0x20   : > { %7787 = vmatmul.mubr.msk.f32.gmra.mxu0 %vm567_vm2, %v538_v7 }
  0x21   : > { %7789 = vmatprep.mubr.msk.f32.mxu0 %vm8231_vm1, %v8230_v1 }
  0x24   : > { %7790 = vmatmul.mubr.msk.f32.gmra.mxu0 %vm567_vm2, %v539_v8 }
  0x25   : > { %7792 = vmatprep.mubr.msk.f32.mxu0 %vm8231_vm1, %v8230_v1 }
  0x28   : > { %7793 = vmatmul.mubr.msk.f32.gmra.mxu0 %vm567_vm2, %v540_v9 }
  0x29   : > { %7795 = vmatprep.mubr.msk.f32.mxu0 %vm8231_vm1, %v8230_v1 }
  0x2c   : > { %7796 = vmatmul.mubr.msk.f32.gmra.mxu0 %vm567_vm2, %v541_v10 }
  0x2d   : > { %7798 = vmatprep.mubr.msk.f32.mxu0 %vm8231_vm1, %v8230_v1 }
  0x30   : > { %7799 = vmatmul.mubr.msk.f32.gmra.mxu0 %vm567_vm2, %v542_v11 }
  0x31   : > { %7801 = vmatprep.mubr.msk.f32.mxu0 %vm8231_vm1, %v8230_v1 }
  0x34   : > { %7802 = vmatmul.mubr.msk.f32.gmra.mxu0 %vm567_vm2, %v543_v12 }
  0x35   : > { %7804 = vmatprep.mubr.msk.f32.mxu0 %vm8231_vm1, %v8230_v1 }
  0x38   : > { %7805 = vmatmul.mubr.msk.f32.gmra.mxu0 %vm567_vm2, %v544_v13 }
  0x39   : > { %7807 = vmatprep.mubr.msk.f32.mxu0 %vm8231_vm1, %v8230_v1 }
  0x3c   : > { %7808 = vmatmul.mubr.msk.f32.gmra.mxu0 %vm567_vm2, %v545_v14 }
  0x3d   : > { %7810 = vmatprep.mubr.msk.f32.mxu0 %vm8231_vm1, %v8230_v1 }
  0x40   : > { %7811 = vmatmul.mubr.msk.f32.gmra.mxu0 %vm567_vm2, %v546_v15 }
  0x41   : > { %7813 = vmatprep.mubr.msk.f32.mxu0 %vm8231_vm1, %v8230_v1 }
  0x44   : > { %7814 = vmatmul.mubr.msk.f32.gmra.mxu0 %vm567_vm2, %v547_v16 }
  0x45   : > { %7816 = vmatprep.mubr.msk.f32.mxu0 %vm8231_vm1, %v8230_v1 }
  0x48   : > { %7817 = vmatmul.mubr.msk.f32.gmra.mxu0 %vm567_vm2, %v548_v17 }
  0x49   : > { %7819 = vmatprep.mubr.msk.f32.mxu0 %vm8231_vm1, %v8230_v1 }
  0x4c   : > { %7820 = vmatmul.mubr.msk.f32.gmra.mxu0 %vm567_vm2, %v549_v18 }
  0x4d   : > { %7822 = vmatprep.mubr.msk.f32.mxu0 %vm8231_vm1, %v8230_v1 }
  0x50   : > { %7823 = vmatmul.mubr.msk.f32.gmra.mxu0 %vm567_vm2, %v550_v19 }
  0x51   : > { %7825 = vmatprep.mubr.msk.f32.mxu0 %vm8231_vm1, %v8230_v1 }
  0x54   : > { %7826 = vmatmul.mubr.msk.f32.gmra.mxu0 %vm567_vm2, %v551_v20 }
  0x55   : > { %7828 = vmatprep.mubr.msk.f32.mxu0 %vm8231_vm1, %v8230_v1 }
  0x58   : > { %7829 = vmatmul.mubr.msk.f32.gmra.mxu0 %vm567_vm2, %v552_v23 }
  0x59   : > { %7831 = vmatprep.mubr.msk.f32.mxu0 %vm8231_vm1, %v8230_v1 }
  0x5c   : > { %7832 = vmatmul.mubr.msk.f32.gmra.mxu0 %vm567_vm2, %v553_v24 }
  0x5d   : > { %7834 = vmatprep.mubr.msk.f32.mxu0 %vm8231_vm1, %v8230_v1 }
  0x60   : > { %7835 = vmatmul.mubr.msk.f32.gmra.mxu0 %vm567_vm2, %v554_v25 }
  0x61   : > { %7837 = vmatprep.mubr.msk.f32.mxu0 %vm8231_vm1, %v8230_v1 }
  0x64   : > { %7838 = vmatmul.mubr.msk.f32.gmra.mxu0 %vm567_vm2, %v555_v26 }
  0x65   : > { %7840 = vmatprep.mubr.msk.f32.mxu0 %vm8231_vm1, %v8230_v1 }
  0x68   : > { %7841 = vmatmul.mubr.msk.f32.gmra.mxu0 %vm567_vm2, %v556_v27 }
  0x69   : > { %7843 = vmatprep.mubr.msk.f32.mxu0 %vm8231_vm1, %v8230_v1 }
  0x6c   : > { %7844 = vmatmul.mubr.msk.f32.gmra.mxu0 %vm567_vm2, %v557_v28 }
  0xd0   : > { %v713_v38 = vpop.f32.mrf.mxu0 }
  0xd1   : > { %v714_v40 = vadd.f32 %v8457_v37, %v713_v38  ;;  %v8471_v52 = vpop.f32.mrf.mxu1 }
  0xd2   : > { %v7776_v41 = vpop.f32.mrf.mxu0 }
  0xd3   : > { %vm837_vm4 = vcmp.gt.f32.partialorder %v714_v40, 0.0  ;;  %v862_v42 = vmul.f32 0.01, %v714_v40  ;;  %v7848_v56 = vpop.f32.mrf.mxu1 }
  0xd4   : > { %v718_v43 = vpop.f32.mrf.mxu0 }
  0xd5   : > { %v887_v46 = vsel %vm837_vm4, %v714_v40, %v862_v42  ;;  %v719_v47 = vadd.f32 %v8457_v37, %v718_v43 }
  0xd6   : > { %v7779_v48 = vpop.f32.mrf.mxu0  ;;  %7854 = vmatmul.mubr.msk.f32.vlgmr.msra.gmra.mxu1 %vm921_vm5, %v887_v46 }
  0xd7   : > { %vm838_vm6 = vcmp.gt.f32.partialorder %v719_v47, 0.0  ;;  %v863_v49 = vmul.f32 0.01, %v719_v47  ;;  %7856 = vmatprep.mubr.msk.f32.mxu1 %vm8231_vm1, %v8230_v1  ;;  %1388 = vmatpush1.bf16.msra.mxu1 %v1370_v44 }
  0xd8   : > { %v723_v51 = vpop.f32.mrf.mxu0  ;;  %1389 = vmatprep.subr.bf16.mxu1 %v7951_v45 }
  0xd9   : > { %v724_v53 = vadd.f32 %v8457_v37, %v723_v51  ;;  %v888_v54 = vsel %vm838_vm6, %v719_v47, %v863_v49 }
  0xda   : > { %7857 = vmatmul.mubr.msk.f32.gmra.mxu1 %vm921_vm5, %v888_v54  ;;  %v7782_v55 = vpop.f32.mrf.mxu0 }
  0xdb   : > { %vm839_vm7 = vcmp.gt.f32.partialorder %v724_v53, 0.0  ;;  %v864_v57 = vmul.f32 0.01, %v724_v53  ;;  %7859 = vmatprep.mubr.msk.f32.mxu1 %vm8231_vm1, %v8230_v1  ;;  %1390 = vmatpush1.bf16.msra.mxu1 %v7949_v50 }
  0xdc   : > { %v728_v58 = vpop.f32.mrf.mxu0 }
  0xdd   : > { %v729_v59 = vadd.f32 %v8457_v37, %v728_v58  ;;  %v889_v60 = vsel %vm839_vm7, %v724_v53, %v864_v57 }
  0xde   : > { %7860 = vmatmul.mubr.msk.f32.gmra.mxu1 %vm921_vm5, %v889_v60  ;;  %v7785_v61 = vpop.f32.mrf.mxu0 }
  0xdf   : > { %vm840_vm8 = vcmp.gt.f32.partialorder %v729_v59, 0.0  ;;  %v865_v62 = vmul.f32 0.01, %v729_v59  ;;  %7862 = vmatprep.mubr.msk.f32.mxu1 %vm8231_vm1, %v8230_v1 }
  0xe0   : > { %v733_v63 = vpop.f32.mrf.mxu0 }
  0xe1   : > { %v890_v0 = vsel %vm840_vm8, %v729_v59, %v865_v62  ;;  %v734_v2 = vadd.f32 %v8457_v37, %v733_v63 }
  0xe2   : > { %7863 = vmatmul.mubr.msk.f32.gmra.mxu1 %vm921_vm5, %v890_v0  ;;  %v7788_v3 = vpop.f32.mrf.mxu0 }
  0xe3   : > { %vm841_vm9 = vcmp.gt.f32.partialorder %v734_v2, 0.0  ;;  %v866_v4 = vmul.f32 0.01, %v734_v2  ;;  %7865 = vmatprep.mubr.msk.f32.mxu1 %vm8231_vm1, %v8230_v1 }
  0xe4   : > { %v738_v5 = vpop.f32.mrf.mxu0 }
  0xe5   : > { %v739_v6 = vadd.f32 %v8457_v37, %v738_v5  ;;  %v891_v7 = vsel %vm841_vm9, %v734_v2, %v866_v4 }
  0xe6   : > { %7866 = vmatmul.mubr.msk.f32.gmra.mxu1 %vm921_vm5, %v891_v7  ;;  %v7791_v8 = vpop.f32.mrf.mxu0 }
  0xe7   : > { %vm842_vm10 = vcmp.gt.f32.partialorder %v739_v6, 0.0  ;;  %v867_v9 = vmul.f32 0.01, %v739_v6  ;;  %7868 = vmatprep.mubr.msk.f32.mxu1 %vm8231_vm1, %v8230_v1 }
  0xe8   : > { %v743_v10 = vpop.f32.mrf.mxu0 }
  0xe9   : > { %v892_v11 = vsel %vm842_vm10, %v739_v6, %v867_v9  ;;  %v744_v12 = vadd.f32 %v8457_v37, %v743_v10 }
  0xea   : > { %7869 = vmatmul.mubr.msk.f32.gmra.mxu1 %vm921_vm5, %v892_v11  ;;  %v7794_v13 = vpop.f32.mrf.mxu0 }
  0xeb   : > { %vm843_vm11 = vcmp.gt.f32.partialorder %v744_v12, 0.0  ;;  %v868_v14 = vmul.f32 0.01, %v744_v12  ;;  %7871 = vmatprep.mubr.msk.f32.mxu1 %vm8231_vm1, %v8230_v1 }
  0xec   : > { %v748_v15 = vpop.f32.mrf.mxu0 }
  0xed   : > { %v749_v16 = vadd.f32 %v8457_v37, %v748_v15  ;;  %v893_v17 = vsel %vm843_vm11, %v744_v12, %v868_v14 }
  0xee   : > { %7872 = vmatmul.mubr.msk.f32.gmra.mxu1 %vm921_vm5, %v893_v17  ;;  %v7797_v18 = vpop.f32.mrf.mxu0 }
  0xef   : > { %vm844_vm12 = vcmp.gt.f32.partialorder %v749_v16, 0.0  ;;  %v869_v19 = vmul.f32 0.01, %v749_v16  ;;  %7874 = vmatprep.mubr.msk.f32.mxu1 %vm8231_vm1, %v8230_v1 }
  0xf0   : > { %v753_v20 = vpop.f32.mrf.mxu0 }
  0xf1   : > { %v894_v21 = vsel %vm844_vm12, %v749_v16, %v869_v19  ;;  %v754_v22 = vadd.f32 %v8457_v37, %v753_v20  ;;  %v8548_v19 = vld [vmem:[%s10191_s5 + $0x58] sm:$0x33] }
  0xf2   : > { %7875 = vmatmul.mubr.msk.f32.gmra.mxu1 %vm921_vm5, %v894_v21  ;;  %v7800_v23 = vpop.f32.mrf.mxu0  ;;  %v7042_v21 = vcombine.high %v8548_v19, %v8548_v19 }
  0xf3   : > { %vm845_vm13 = vcmp.gt.f32.partialorder %v754_v22, 0.0  ;;  %v870_v24 = vmul.f32 0.01, %v754_v22  ;;  %7877 = vmatprep.mubr.msk.f32.mxu1 %vm8231_vm1, %v8230_v1 }
  0xf4   : > { %v758_v25 = vpop.f32.mrf.mxu0  ;;  %7043 = vmatprep.subr.msk.bf16.mxu1 %vm1303_vm3, %v7042_v21 }
  0xf5   : > { %v759_v26 = vadd.f32 %v8457_v37, %v758_v25  ;;  %v895_v27 = vsel %vm845_vm13, %v754_v22, %v870_v24  ;;  %v8232_v24 = vmov 0   ;;  %v8557_v25 = vld [vmem:[%s10191_s5 + $0x40] sm:$0x33] }
  0xf6   : > { %7878 = vmatmul.mubr.msk.f32.gmra.mxu1 %vm921_vm5, %v895_v27  ;;  %v7803_v28 = vpop.f32.mrf.mxu0  ;;  %1342 = vmatprep.mubr.bf16.mxu0 %v8232_v24  ;;  %v7033_v27 = vcombine.high %v8557_v25, %v8557_v25 }
  0xf7   : > { %vm846_vm14 = vcmp.gt.f32.partialorder %v759_v26, 0.0  ;;  %v871_v29 = vmul.f32 0.01, %v759_v26  ;;  %7880 = vmatprep.mubr.msk.f32.mxu1 %vm8231_vm1, %v8230_v1 }
  0xf8   : > { %v763_v30 = vpop.f32.mrf.mxu0  ;;  %7034 = vmatprep.subr.msk.bf16.mxu0 %vm1303_vm3, %v7033_v27  ;;  %v7074_v27 = vld [vmem:[%s10191_s5 + $0xb8] sm:$0x33] }
  0xf9   : > { %v896_v31 = vsel %vm846_vm14, %v759_v26, %v871_v29  ;;  %v764_v32 = vadd.f32 %v8457_v37, %v763_v30 }
  0xfa   : > { %7881 = vmatmul.mubr.msk.f32.gmra.mxu1 %vm921_vm5, %v896_v31  ;;  %v7806_v33 = vpop.f32.mrf.mxu0 }
  0xfb   : > { %vm847_vm15 = vcmp.gt.f32.partialorder %v764_v32, 0.0  ;;  %v872_v34 = vmul.f32 0.01, %v764_v32  ;;  %7883 = vmatprep.mubr.msk.f32.mxu1 %vm8231_vm1, %v8230_v1 }
  0xfc   : > { %v768_v35 = vpop.f32.mrf.mxu0 }
  0xfd   : > { %v769_v36 = vadd.f32 %v8457_v37, %v768_v35  ;;  %v897_v38 = vsel %vm847_vm15, %v764_v32, %v872_v34 }
  0xfe   : > { %7884 = vmatmul.mubr.msk.f32.gmra.mxu1 %vm921_vm5, %v897_v38  ;;  %v7809_v39 = vpop.f32.mrf.mxu0 }
  0xff   : > { %vm848_vm0 = vcmp.gt.f32.partialorder %v769_v36, 0.0  ;;  %v873_v40 = vmul.f32 0.01, %v769_v36  ;;  %7886 = vmatprep.mubr.msk.f32.mxu1 %vm8231_vm1, %v8230_v1 }
 0x100   : > { %v773_v41 = vpop.f32.mrf.mxu0 }
 0x101   : > { %v898_v42 = vsel %vm848_vm0, %v769_v36, %v873_v40  ;;  %v774_v43 = vadd.f32 %v8457_v37, %v773_v41  ;;  %v834_v40 = vadd.f32 %v8457_v37, %v8471_v52 }
 0x102   : > { %7887 = vmatmul.mubr.msk.f32.gmra.mxu1 %vm921_vm5, %v898_v42  ;;  %v7812_v44 = vpop.f32.mrf.mxu0 }
 0x103   : > { %vm849_vm2 = vcmp.gt.f32.partialorder %v774_v43, 0.0  ;;  %v874_v45 = vmul.f32 0.01, %v774_v43  ;;  %7889 = vmatprep.mubr.msk.f32.mxu1 %vm8231_vm1, %v8230_v1  ;;  %vm861_vm0 = vcmp.gt.f32.partialorder %v834_v40, 0.0 }
 0x104   : > { %v778_v46 = vpop.f32.mrf.mxu0 }
 0x105   : > { %v779_v47 = vadd.f32 %v8457_v37, %v778_v46  ;;  %v899_v48 = vsel %vm849_vm2, %v774_v43, %v874_v45  ;;  %v886_v46 = vmul.f32 0.01, %v834_v40 }
 0x106   : > { %7890 = vmatmul.mubr.msk.f32.gmra.mxu1 %vm921_vm5, %v899_v48  ;;  %v7815_v49 = vpop.f32.mrf.mxu0 }
 0x107   : > { %vm850_vm4 = vcmp.gt.f32.partialorder %v779_v47, 0.0  ;;  %v875_v50 = vmul.f32 0.01, %v779_v47  ;;  %7892 = vmatprep.mubr.msk.f32.mxu1 %vm8231_vm1, %v8230_v1  ;;  %v911_v52 = vsel %vm861_vm0, %v834_v40, %v886_v46 }
 0x108   : > { %v783_v51 = vpop.f32.mrf.mxu0 }
 0x109   : > { %v900_v53 = vsel %vm850_vm4, %v779_v47, %v875_v50  ;;  %v784_v54 = vadd.f32 %v8457_v37, %v783_v51 }
 0x10a   : > { %7893 = vmatmul.mubr.msk.f32.gmra.mxu1 %vm921_vm5, %v900_v53  ;;  %v7818_v55 = vpop.f32.mrf.mxu0 }
 0x10b   : > { %vm851_vm6 = vcmp.gt.f32.partialorder %v784_v54, 0.0  ;;  %v876_v56 = vmul.f32 0.01, %v784_v54  ;;  %7895 = vmatprep.mubr.msk.f32.mxu1 %vm8231_vm1, %v8230_v1  ;;  %v7041_v55 = vcombine.low %v8548_v19, %v8548_v19 }
 0x10c   : > { %v788_v57 = vpop.f32.mrf.mxu0 }
 0x10d   : > { %v789_v58 = vadd.f32 %v8457_v37, %v788_v57  ;;  %v901_v59 = vsel %vm851_vm6, %v784_v54, %v876_v56 }
 0x10e   : > { %7896 = vmatmul.mubr.msk.f32.gmra.mxu1 %vm921_vm5, %v901_v59  ;;  %v7821_v60 = vpop.f32.mrf.mxu0 }
 0x10f   : > { %vm852_vm7 = vcmp.gt.f32.partialorder %v789_v58, 0.0  ;;  %v877_v61 = vmul.f32 0.01, %v789_v58  ;;  %7898 = vmatprep.mubr.msk.f32.mxu1 %vm8231_vm1, %v8230_v1 }
 0x110   : > { %v793_v62 = vpop.f32.mrf.mxu0 }
 0x111   : > { %v902_v63 = vsel %vm852_vm7, %v789_v58, %v877_v61  ;;  %v794_v0 = vadd.f32 %v8457_v37, %v793_v62  ;;  %v7032_v58 = vcombine.low %v8557_v25, %v8557_v25 }
 0x112   : > { %7899 = vmatmul.mubr.msk.f32.gmra.mxu1 %vm921_vm5, %v902_v63  ;;  %v7824_v2 = vpop.f32.mrf.mxu0  ;;  %v1512_v63 = vsel %vm1303_vm3, %v7041_v55, 0 }
 0x113   : > { %vm853_vm8 = vcmp.gt.f32.partialorder %v794_v0, 0.0  ;;  %v878_v3 = vmul.f32 0.01, %v794_v0  ;;  %7901 = vmatprep.mubr.msk.f32.mxu1 %vm8231_vm1, %v8230_v1 }
 0x114   : > { %v798_v4 = vpop.f32.mrf.mxu0 }
 0x115   : > { %v799_v5 = vadd.f32 %v8457_v37, %v798_v4  ;;  %v903_v6 = vsel %vm853_vm8, %v794_v0, %v878_v3  ;;  %v7958_v0 = vld [vmem:[%s10191_s5 + $0x4c] ss:$8 sps:$4 sm:$0xff]  }
 0x116   : > { %7902 = vmatmul.mubr.msk.f32.gmra.mxu1 %vm921_vm5, %v903_v6  ;;  %v7827_v7 = vpop.f32.mrf.mxu0  ;;  %v7056_v3 = vld [vmem:[%s10191_s5 + $0x88] sm:$0x33]  ;;  %v1440_v6 = vsel %vm1303_vm3, %v7032_v58, 0 }
 0x117   : > { %vm854_vm9 = vcmp.gt.f32.partialorder %v799_v5, 0.0  ;;  %v879_v8 = vmul.f32 0.01, %v799_v5  ;;  %7904 = vmatprep.mubr.msk.f32.mxu1 %vm8231_vm1, %v8230_v1  ;;  %v7961_v7 = vld [vmem:[%s10191_s5 + $0x34] ss:$8 sps:$4 sm:$0xff]  }
 0x118   : > { %v803_v9 = vpop.f32.mrf.mxu0 }
 0x119   : > { %v904_v10 = vsel %vm854_vm9, %v799_v5, %v879_v8  ;;  %v804_v11 = vadd.f32 %v8457_v37, %v803_v9  ;;  %v7956_v9 = vld [vmem:[%s10191_s5 + $0x48] ss:$8 sps:$4 sm:$0xff]  }
 0x11a   : > { %7905 = vmatmul.mubr.msk.f32.gmra.mxu1 %vm921_vm5, %v904_v10  ;;  %v7830_v12 = vpop.f32.mrf.mxu0  ;;  %v7047_v10 = vld [vmem:[%s10191_s5 + $0x70] sm:$0x33] }
 0x11b   : > { %vm855_vm10 = vcmp.gt.f32.partialorder %v804_v11, 0.0  ;;  %v880_v13 = vmul.f32 0.01, %v804_v11  ;;  %7907 = vmatprep.mubr.msk.f32.mxu1 %vm8231_vm1, %v8230_v1  ;;  %v7060_v12 = vcombine.high %v7056_v3, %v7056_v3 }
 0x11c   : > { %v808_v14 = vpop.f32.mrf.mxu0 }
 0x11d   : > { %v809_v15 = vadd.f32 %v8457_v37, %v808_v14  ;;  %v905_v16 = vsel %vm855_vm10, %v804_v11, %v880_v13  ;;  %v7059_v13 = vcombine.low %v7056_v3, %v7056_v3 }
 0x11e   : > { %7908 = vmatmul.mubr.msk.f32.gmra.mxu1 %vm921_vm5, %v905_v16  ;;  %v7833_v17 = vpop.f32.mrf.mxu0  ;;  %v7959_v16 = vld [vmem:[%s10191_s5 + $0x30] ss:$8 sps:$4 sm:$0xff]  }
 0x11f   : > { %vm856_vm11 = vcmp.gt.f32.partialorder %v809_v15, 0.0  ;;  %v881_v18 = vmul.f32 0.01, %v809_v15  ;;  %7910 = vmatprep.mubr.msk.f32.mxu1 %vm8231_vm1, %v8230_v1  ;;  %v7051_v17 = vcombine.high %v7047_v10, %v7047_v10  ;;  %v1656_v21 = vsel %vm1303_vm3, %v7059_v13, 0 }
 0x120   : > { %v813_v20 = vpop.f32.mrf.mxu0 }
 0x121   : > { %v906_v22 = vsel %vm856_vm11, %v809_v15, %v881_v18  ;;  %v814_v23 = vadd.f32 %v8457_v37, %v813_v20  ;;  %v7050_v18 = vcombine.low %v7047_v10, %v7047_v10 }
 0x122   : > { %7911 = vmatmul.mubr.msk.f32.gmra.mxu1 %vm921_vm5, %v906_v22  ;;  %v7836_v26 = vpop.f32.mrf.mxu0  ;;  %v7968_v22 = vld [vmem:[%s10191_s5 + $0x7c] ss:$8 sps:$4 sm:$0xff]  }
 0x123   : > { %vm857_vm12 = vcmp.gt.f32.partialorder %v814_v23, 0.0  ;;  %v882_v28 = vmul.f32 0.01, %v814_v23  ;;  %7913 = vmatprep.mubr.msk.f32.mxu1 %vm8231_vm1, %v8230_v1 }
 0x124   : > { %v818_v29 = vpop.f32.mrf.mxu0 }
 0x125   : > { %v819_v30 = vadd.f32 %v8457_v37, %v818_v29  ;;  %v907_v31 = vsel %vm857_vm12, %v814_v23, %v882_v28  ;;  %v1583_v29 = vsel %vm1303_vm3, %v7050_v18, 0 }
 0x126   : > { %7914 = vmatmul.mubr.msk.f32.gmra.mxu1 %vm921_vm5, %v907_v31  ;;  %v7839_v32 = vpop.f32.mrf.mxu0 }
 0x127   : > { %vm858_vm13 = vcmp.gt.f32.partialorder %v819_v30, 0.0  ;;  %v883_v33 = vmul.f32 0.01, %v819_v30  ;;  %7916 = vmatprep.mubr.msk.f32.mxu1 %vm8231_vm1, %v8230_v1  ;;  %v7966_v32 = vld [vmem:[%s10191_s5 + $0x78] ss:$8 sps:$4 sm:$0xff]  }
 0x128   : > { %v823_v34 = vpop.f32.mrf.mxu0 }
 0x129   : > { %v908_v35 = vsel %vm858_vm13, %v819_v30, %v883_v33  ;;  %v824_v36 = vadd.f32 %v8457_v37, %v823_v34  ;;  %v7971_v30 = vld [vmem:[%s10191_s5 + $0x64] ss:$8 sps:$4 sm:$0xff]  }
 0x12a   : > { %7917 = vmatmul.mubr.msk.f32.gmra.mxu1 %vm921_vm5, %v908_v35  ;;  %v7842_v38 = vpop.f32.mrf.mxu0  ;;  %v7065_v33 = vld [vmem:[%s10191_s5 + $0xa0] sm:$0x33]  ;;  %v7078_v35 = vcombine.high %v7074_v27, %v7074_v27 }
 0x12b   : > { %vm859_vm14 = vcmp.gt.f32.partialorder %v824_v36, 0.0  ;;  %v884_v39 = vmul.f32 0.01, %v824_v36  ;;  %7919 = vmatprep.mubr.msk.f32.mxu1 %vm8231_vm1, %v8230_v1  ;;  %v7069_v40 = vcombine.high %v7065_v33, %v7065_v33 }
 0x12c   : > { %v828_v41 = vpop.f32.mrf.mxu0 }
 0x12d   : > { %v829_v42 = vadd.f32 %v8457_v37, %v828_v41  ;;  %v909_v43 = vsel %vm859_vm14, %v824_v36, %v884_v39  ;;  %v8588_v37 = vld [vmem:[%s10190_s4] ss:$0 sm:$0xff]  ;;  %v7077_v36 = vcombine.low %v7074_v27, %v7074_v27  ;;  %v7068_v41 = vcombine.low %v7065_v33, %v7065_v33  ;;  %v7119_v33 = vld [vmem:[%s10191_s5 + $0x130] sm:$0x33] }
 0x12e   : > { %7920 = vmatmul.mubr.msk.f32.gmra.mxu1 %vm921_vm5, %v909_v43  ;;  %v7845_v44 = vpop.f32.mrf.mxu0  ;;  %v7969_v39 = vld [vmem:[%s10191_s5 + $0x60] ss:$8 sps:$4 sm:$0xff]  }
 0x12f   : > { %vm860_vm15 = vcmp.gt.f32.partialorder %v829_v42, 0.0  ;;  %v885_v45 = vmul.f32 0.01, %v829_v42  ;;  %7922 = vmatprep.mubr.msk.f32.mxu1 %vm8231_vm1, %v8230_v1  ;;  %v1800_v44 = vsel %vm1303_vm3, %v7077_v36, 0 }
 0x131   : > { %v910_v47 = vsel %vm860_vm15, %v829_v42, %v885_v45  ;;  %v7978_v45 = vld [vmem:[%s10191_s5 + $0xac] ss:$8 sps:$4 sm:$0xff]  }
 0x132   : > { %7923 = vmatmul.mubr.msk.f32.gmra.mxu1 %vm921_vm5, %v910_v47 }
 0x133   : > { %7925 = vmatprep.mubr.msk.f32.mxu1 %vm8231_vm1, %v8230_v1 }
 0x136   : > { %7926 = vmatmul.mubr.msk.f32.gmra.mxu1 %vm921_vm5, %v911_v52  ;;  %vm1299_vm5 = vcmask 162816  }
 0x137   : > { %1407 = vmatprep.mubr.bf16.mxu1 %v8232_v24 }
 0x196   : > { %v1063_v48 = vpop.f32.mrf.mxu1 }
 0x197   : > { %v1064_v49 = vadd.f32 %v8588_v37, %v1063_v48  ;;  %v7092_v48 = vld [vmem:[%s10191_s5 + $0xe8] sm:$0x33] }
 0x198   : > { %v7855_v50 = vpop.f32.mrf.mxu1  ;;  %v7095_v55 = vcombine.low %v7092_v48, %v7092_v48 }
 0x199   : > { %v1212_v53 = vmul.f32 0.01, %v1064_v49  ;;  %vm1187_vm2 = vcmp.gt.f32.partialorder %v1064_v49, 0.0  ;;  %v7981_v50 = vld [vmem:[%s10191_s5 + $0x94] ss:$8 sps:$4 sm:$0xff]  }
 0x19a   : > { %v1068_v51 = vpop.f32.mrf.mxu1 }
 0x19b   : > { %v1069_v54 = vadd.f32 %v8588_v37, %v1068_v51  ;;  %v1237_v59 = vsel %vm1187_vm2, %v1064_v49, %v1212_v53  ;;  %v1728_v49 = vsel %vm1303_vm3, %v7068_v41, 0  ;;  %v7976_v53 = vld [vmem:[%s10191_s5 + $0xa8] ss:$8 sps:$4 sm:$0xff]   ;;  %v7123_v41 = vcombine.high %v7119_v33, %v7119_v33 }
 0x19c   : > { %v7858_v1 = vpop.f32.mrf.mxu1 }
 0x19d   : > { %vm1188_vm1 = vcmp.gt.f32.partialorder %v1069_v54, 0.0  ;;  %v1213_v56 = vmul.f32 0.01, %v1069_v54  ;;  %v7096_v1 = vcombine.high %v7092_v48, %v7092_v48 }
 0x19e   : > { %v1073_v57 = vpop.f32.mrf.mxu1 }
 0x19f   : > { %v1238_v60 = vsel %vm1188_vm1, %v1069_v54, %v1213_v56  ;;  %v1074_v2 = vadd.f32 %v8588_v37, %v1073_v57  ;;  %v7083_v54 = vld [vmem:[%s10191_s5 + $0xd0] sm:$0x33] }
 0x1a0   : > { %v1262_v61 = vpack.c.bf16 %v1238_v60, %v1237_v59  ;;  %v7861_v62 = vpop.f32.mrf.mxu1  ;;  %v7979_v59 = vld [vmem:[%s10191_s5 + $0x90] ss:$8 sps:$4 sm:$0xff]   ;;  %v7087_v60 = vcombine.high %v7083_v54, %v7083_v54 }
 0x1a1   : > { %v1214_v14 = vmul.f32 0.01, %v1074_v2  ;;  %vm1189_vm4 = vcmp.gt.f32.partialorder %v1074_v2, 0.0 }
 0x1a2   : > { %v1283_v4 = vrot.slane %v1262_v61, 2  ;;  %7026 = vmatmul.mubr.msk.bf16.vlgmr.msra.gmra.mxu1 %vm1299_vm5, %v1262_v61  ;;  %v1078_v5 = vpop.f32.mrf.mxu1  ;;  %v1492_v20 = vrot.slane %v1262_v61, 6  ;;  %v1420_v28 = vrot.slane %v1262_v61, 4  ;;  %v7086_v61 = vcombine.low %v7083_v54, %v7083_v54 }
 0x1a3   : > { %1530 = vmatpush1.bf16.msra.mxu1 %v1512_v63  ;;  %v1079_v8 = vadd.f32 %v8588_v37, %v1078_v5  ;;  %1549 = vmatprep.mubr.bf16.mxu1 %v8232_v24  ;;  %v1239_v25 = vsel %vm1189_vm4, %v1074_v2, %v1214_v14  ;;  %v7988_v2 = vld [vmem:[%s10191_s5 + $0xdc] ss:$8 sps:$4 sm:$0xff]  }
 0x1a4   : > { %7020 = vmatmul.mubr.msk.bf16.vlgmr.msra.gmra.mxu0 %vm1299_vm5, %v1283_v4  ;;  %1531 = vmatprep.subr.bf16.mxu1 %v7958_v0  ;;  %v7864_v11 = vpop.f32.mrf.mxu1  ;;  %v1944_v0 = vsel %vm1303_vm3, %v7095_v55, 0  ;;  %v7137_v55 = vld [vmem:[%s10191_s5 + $0x160] sm:$0x33] }
 0x1a5   : > { %v1215_v15 = vmul.f32 0.01, %v1079_v8  ;;  %1458 = vmatpush1.bf16.msra.mxu0 %v1440_v6  ;;  %1477 = vmatprep.mubr.bf16.mxu0 %v8232_v24  ;;  %vm1190_vm6 = vcmp.gt.f32.partialorder %v1079_v8, 0.0  ;;  %v7110_v6 = vld [vmem:[%s10191_s5 + $0x118] sm:$0x33] }
 0x1a6   : > { %1459 = vmatprep.subr.bf16.mxu0 %v7961_v7  ;;  %v1083_v19 = vpop.f32.mrf.mxu1  ;;  %v7986_v11 = vld [vmem:[%s10191_s5 + $0xd8] ss:$8 sps:$4 sm:$0xff]   ;;  %v7114_v14 = vcombine.high %v7110_v6, %v7110_v6 }
 0x1a7   : > { %1532 = vmatpush1.bf16.msra.mxu1 %v7956_v9  ;;  %v1240_v26 = vsel %vm1190_vm6, %v1079_v8, %v1215_v15  ;;  %v1084_v47 = vadd.f32 %v8588_v37, %v1083_v19  ;;  %v1871_v8 = vsel %vm1303_vm3, %v7086_v61, 0  ;;  %v7991_v9 = vld [vmem:[%s10191_s5 + $0xc4] ss:$8 sps:$4 sm:$0xff]   ;;  %v7113_v15 = vcombine.low %v7110_v6, %v7110_v6 }
 0x1a8   : > { %7061 = vmatprep.subr.msk.bf16.mxu1 %vm1303_vm3, %v7060_v12  ;;  %v7867_v23 = vpop.f32.mrf.mxu1  ;;  %v8643_v34 = vpack.c.bf16 %v1240_v26, %v1239_v25  ;;  %v7101_v12 = vld [vmem:[%s10191_s5 + $0x100] sm:$0x33]  ;;  %v7141_v61 = vcombine.high %v7137_v55, %v7137_v55 }
 0x1a9   : > { %1460 = vmatpush1.bf16.msra.mxu0 %v7959_v16  ;;  %v1216_v57 = vmul.f32 0.01, %v1084_v47  ;;  %vm1191_vm7 = vcmp.gt.f32.partialorder %v1084_v47, 0.0  ;;  %v7105_v18 = vcombine.high %v7101_v12, %v7101_v12  ;;  %v7104_v19 = vcombine.low %v7101_v12, %v7101_v12  ;;  %v7998_v23 = vld [vmem:[%s10191_s5 + $0x10c] ss:$8 sps:$4 sm:$0xff]  }
 0x1aa   : > { %7044 = vmatmul.mubr.msk.bf16.vlgmr.msra.gmra.mxu1 %vm1299_vm5, %v1492_v20  ;;  %7052 = vmatprep.subr.msk.bf16.mxu0 %vm1303_vm3, %v7051_v17  ;;  %v1088_v31 = vpop.f32.mrf.mxu1  ;;  %v1636_v43 = vrot.slane %v8643_v34, 2  ;;  %v1780_v63 = vrot.slane %v8643_v34, 6  ;;  %v1708_v7 = vrot.slane %v8643_v34, 4  ;;  %v7989_v17 = vld [vmem:[%s10191_s5 + $0xc0] ss:$8 sps:$4 sm:$0xff]  }
 0x1ab   : > { %1674 = vmatpush1.bf16.msra.mxu1 %v1656_v21  ;;  %1693 = vmatprep.mubr.bf16.mxu1 %v8232_v24  ;;  %v1089_v52 = vadd.f32 %v8588_v37, %v1088_v31  ;;  %v1241_v4 = vsel %vm1191_vm7, %v1084_v47, %v1216_v57 }
 0x1ac   : > { %7035 = vmatmul.mubr.msk.bf16.vlgmr.msra.gmra.mxu0 %vm1299_vm5, %v1420_v28  ;;  %1675 = vmatprep.subr.bf16.mxu1 %v7968_v22  ;;  %v7870_v38 = vpop.f32.mrf.mxu1  ;;  %v2088_v22 = vsel %vm1303_vm3, %v7113_v15, 0  ;;  %v7128_v28 = vld [vmem:[%s10191_s5 + $0x148] sm:$0x33] }
 0x1ad   : > { %1601 = vmatpush1.bf16.msra.mxu0 %v1583_v29  ;;  %1620 = vmatprep.mubr.bf16.mxu0 %v8232_v24  ;;  %v1217_v58 = vmul.f32 0.01, %v1089_v52  ;;  %vm1192_vm8 = vcmp.gt.f32.partialorder %v1089_v52, 0.0  ;;  %v2016_v29 = vsel %vm1303_vm3, %v7104_v19, 0 }
 0x1ae   : > { %1602 = vmatprep.subr.bf16.mxu0 %v7971_v30  ;;  %v8650_v42 = vpop.f32.mrf.mxu1  ;;  %v8001_v30 = vld [vmem:[%s10191_s5 + $0xf4] ss:$8 sps:$4 sm:$0xff]  }
 0x1af   : > { %1676 = vmatpush1.bf16.msra.mxu1 %v7966_v32  ;;  %v1242_v5 = vsel %vm1192_vm8, %v1089_v52, %v1217_v58  ;;  %v1094_v26 = vadd.f32 %v8588_v37, %v8650_v42  ;;  %v7996_v32 = vld [vmem:[%s10191_s5 + $0x108] ss:$8 sps:$4 sm:$0xff]   ;;  %v7122_v42 = vcombine.low %v7119_v33, %v7119_v33 }
 0x1b0   : > { %7079 = vmatprep.subr.msk.bf16.mxu1 %vm1303_vm3, %v7078_v35  ;;  %v7873_v46 = vpop.f32.mrf.mxu1  ;;  %v8709_v13 = vpack.c.bf16 %v1242_v5, %v1241_v4  ;;  %v7131_v35 = vcombine.low %v7128_v28, %v7128_v28  ;;  %v8018_v4 = vld [vmem:[%s10191_s5 + $0x16c] ss:$8 sps:$4 sm:$0xff]  }
 0x1b1   : > { %1603 = vmatpush1.bf16.msra.mxu0 %v7969_v39  ;;  %v1218_v38 = vmul.f32 0.01, %v1094_v26  ;;  %vm1193_vm9 = vcmp.gt.f32.partialorder %v1094_v26, 0.0  ;;  %v8008_v46 = vld [vmem:[%s10191_s5 + $0x13c] ss:$8 sps:$4 sm:$0xff]  }
 0x1b2   : > { %7062 = vmatmul.mubr.msk.bf16.vlgmr.msra.gmra.mxu1 %vm1299_vm5, %v1636_v43  ;;  %7070 = vmatprep.subr.msk.bf16.mxu0 %vm1303_vm3, %v7069_v40  ;;  %v1098_v51 = vpop.f32.mrf.mxu1  ;;  %v1924_v21 = vrot.slane %v8709_v13, 2  ;;  %v7999_v40 = vld [vmem:[%s10191_s5 + $0xf0] ss:$8 sps:$4 sm:$0xff]  }
 0x1b3   : > { %1818 = vmatpush1.bf16.msra.mxu1 %v1800_v44  ;;  %1837 = vmatprep.mubr.bf16.mxu1 %v8232_v24  ;;  %v1099_v27 = vadd.f32 %v8588_v37, %v1098_v51  ;;  %v2068_v44 = vrot.slane %v8709_v13, 6  ;;  %v1243_v52 = vsel %vm1193_vm9, %v1094_v26, %v1218_v38  ;;  %v2159_v51 = vsel %vm1303_vm3, %v7122_v42, 0  ;;  %v8028_v26 = vld [vmem:[%s10191_s5 + $0x19c] ss:$8 sps:$4 sm:$0xff]  }
 0x1b4   : > { %7053 = vmatmul.mubr.msk.bf16.vlgmr.msra.gmra.mxu0 %vm1299_vm5, %v8643_v34  ;;  %1819 = vmatprep.subr.bf16.mxu1 %v7978_v45  ;;  %v7876_v56 = vpop.f32.mrf.mxu1  ;;  %v7132_v34 = vcombine.high %v7128_v28, %v7128_v28  ;;  %v2232_v45 = vsel %vm1303_vm3, %v7131_v35, 0  ;;  %v7173_v38 = vld [vmem:[%s10191_s5 + $0x1c0] sm:$0x33] }
 0x1b5   : > { %1746 = vmatpush1.bf16.msra.mxu0 %v1728_v49  ;;  %1765 = vmatprep.mubr.bf16.mxu0 %v8232_v24  ;;  %v1219_v39 = vmul.f32 0.01, %v1099_v27  ;;  %vm1194_vm10 = vcmp.gt.f32.partialorder %v1099_v27, 0.0  ;;  %v7146_v49 = vld [vmem:[%s10191_s5 + $0x178] sm:$0x33] }
 0x1b6   : > { %1747 = vmatprep.subr.bf16.mxu0 %v7981_v50  ;;  %v8682_v62 = vpop.f32.mrf.mxu1  ;;  %v1996_v50 = vrot.slane %v8709_v13, 4  ;;  %v7150_v57 = vcombine.high %v7146_v49, %v7146_v49  ;;  %v7149_v58 = vcombine.low %v7146_v49, %v7146_v49 }
 0x1b7   : > { %1820 = vmatpush1.bf16.msra.mxu1 %v7976_v53  ;;  %v1244_v48 = vsel %vm1194_vm10, %v1099_v27, %v1219_v39  ;;  %v8011_v53 = vld [vmem:[%s10191_s5 + $0x124] ss:$8 sps:$4 sm:$0xff]   ;;  %v1104_v6 = vadd.f32 %v8588_v37, %v8682_v62  ;;  %v8016_v62 = vld [vmem:[%s10191_s5 + $0x168] ss:$8 sps:$4 sm:$0xff]  }
 0x1b8   : > { %7097 = vmatprep.subr.msk.bf16.mxu1 %vm1303_vm3, %v7096_v1  ;;  %v7879_v3 = vpop.f32.mrf.mxu1  ;;  %v8006_v1 = vld [vmem:[%s10191_s5 + $0x138] ss:$8 sps:$4 sm:$0xff]   ;;  %v8778_v56 = vpack.c.bf16 %v1244_v48, %v1243_v52 }
 0x1b9   : > { %1748 = vmatpush1.bf16.msra.mxu0 %v7979_v59  ;;  %v2376_v3 = vsel %vm1303_vm3, %v7149_v58, 0  ;;  %vm1195_vm11 = vcmp.gt.f32.partialorder %v1104_v6, 0.0 }
 0x1ba   : > { %7080 = vmatmul.mubr.msk.bf16.vlgmr.msra.gmra.mxu1 %vm1299_vm5, %v1780_v63  ;;  %7088 = vmatprep.subr.msk.bf16.mxu0 %vm1303_vm3, %v7087_v60  ;;  %v8700_v10 = vpop.f32.mrf.mxu1  ;;  %v8009_v60 = vld [vmem:[%s10191_s5 + $0x120] ss:$8 sps:$4 sm:$0xff]   ;;  %v7140_v63 = vcombine.low %v7137_v55, %v7137_v55 }
 0x1bb   : > { %1962 = vmatpush1.bf16.msra.mxu1 %v1944_v0  ;;  %1981 = vmatprep.mubr.bf16.mxu1 %v8232_v24  ;;  %v7200_v55 = vld [vmem:[%s10191_s5 + $0x208] sm:$0x33] }
 0x1bc   : > { %7071 = vmatmul.mubr.msk.bf16.vlgmr.msra.gmra.mxu0 %vm1299_vm5, %v1708_v7  ;;  %1963 = vmatprep.subr.bf16.mxu1 %v7988_v2  ;;  %v7882_v16 = vpop.f32.mrf.mxu1  ;;  %v2212_v2 = vrot.slane %v8778_v56, 2  ;;  %v1109_v7 = vadd.f32 %v8588_v37, %v8700_v10  ;;  %v7155_v10 = vld [vmem:[%s10191_s5 + $0x190] sm:$0x33] }
 0x1bd   : > { %1889 = vmatpush1.bf16.msra.mxu0 %v1871_v8  ;;  %1908 = vmatprep.mubr.bf16.mxu0 %v8232_v24  ;;  %v7164_v8 = vld [vmem:[%s10191_s5 + $0x1a8] sm:$0x33]  ;;  %v1220_v16 = vmul.f32 0.01, %v1104_v6  ;;  %v7159_v19 = vcombine.high %v7155_v10, %v7155_v10 }
 0x1be   : > { %1890 = vmatprep.subr.bf16.mxu0 %v7991_v9  ;;  %v8716_v20 = vpop.f32.mrf.mxu1  ;;  %v2304_v9 = vsel %vm1303_vm3, %v7140_v63, 0  ;;  %vm1196_vm12 = vcmp.gt.f32.partialorder %v1109_v7, 0.0  ;;  %v8039_v63 = vld [vmem:[%s10191_s5 + $0x1b0] ss:$8 sps:$4 sm:$0xff]  }
 0x1bf   : > { %1964 = vmatpush1.bf16.msra.mxu1 %v7986_v11  ;;  %v8021_v11 = vld [vmem:[%s10191_s5 + $0x154] ss:$8 sps:$4 sm:$0xff]   ;;  %v1245_v28 = vsel %vm1195_vm11, %v1104_v6, %v1220_v16  ;;  %v1114_v48 = vadd.f32 %v8588_v37, %v8716_v20 }
 0x1c0   : > { %7115 = vmatprep.subr.msk.bf16.mxu1 %vm1303_vm3, %v7114_v14  ;;  %v7885_v25 = vpop.f32.mrf.mxu1  ;;  %v7167_v14 = vcombine.low %v7164_v8, %v7164_v8 }
 0x1c1   : > { %1891 = vmatpush1.bf16.msra.mxu0 %v7989_v17  ;;  %v1221_v17 = vmul.f32 0.01, %v1109_v7  ;;  %vm1197_vm15 = vcmp.gt.f32.partialorder %v1114_v48, 0.0 }
 0x1c2   : > { %7098 = vmatmul.mubr.msk.bf16.vlgmr.msra.gmra.mxu1 %vm1299_vm5, %v1924_v21  ;;  %7106 = vmatprep.subr.msk.bf16.mxu0 %vm1303_vm3, %v7105_v18  ;;  %v8736_v31 = vpop.f32.mrf.mxu1  ;;  %v8019_v18 = vld [vmem:[%s10191_s5 + $0x150] ss:$8 sps:$4 sm:$0xff]   ;;  %v7158_v21 = vcombine.low %v7155_v10, %v7155_v10  ;;  %v2520_v25 = vsel %vm1303_vm3, %v7167_v14, 0 }
 0x1c3   : > { %2106 = vmatpush1.bf16.msra.mxu1 %v2088_v22  ;;  %2125 = vmatprep.mubr.bf16.mxu1 %v8232_v24 }
 0x1c4   : > { %7089 = vmatmul.mubr.msk.bf16.vlgmr.msra.gmra.mxu0 %vm1299_vm5, %v8709_v13  ;;  %2107 = vmatprep.subr.bf16.mxu1 %v7998_v23  ;;  %v7888_v36 = vpop.f32.mrf.mxu1  ;;  %v7168_v13 = vcombine.high %v7164_v8, %v7164_v8  ;;  %v2356_v23 = vrot.slane %v8778_v56, 6  ;;  %v2447_v33 = vsel %vm1303_vm3, %v7158_v21, 0  ;;  %v7218_v21 = vld [vmem:[%s10191_s5 + $0x238] sm:$0x33] }
 0x1c5   : > { %2034 = vmatpush1.bf16.msra.mxu0 %v2016_v29  ;;  %2053 = vmatprep.mubr.bf16.mxu0 %v8232_v24  ;;  %v1246_v29 = vsel %vm1196_vm12, %v1109_v7, %v1221_v17  ;;  %v8026_v36 = vld [vmem:[%s10191_s5 + $0x198] ss:$8 sps:$4 sm:$0xff]  }
 0x1c6   : > { %2035 = vmatprep.subr.bf16.mxu0 %v8001_v30  ;;  %v8751_v43 = vpop.f32.mrf.mxu1  ;;  %v7182_v30 = vld [vmem:[%s10191_s5 + $0x1d8] sm:$0x33]  ;;  %v8848_v39 = vpack.c.bf16 %v1246_v29, %v1245_v28 }
 0x1c7   : > { %2108 = vmatpush1.bf16.msra.mxu1 %v7996_v32  ;;  %v2284_v32 = vrot.slane %v8778_v56, 4  ;;  %v8046_v29 = vld [vmem:[%s10191_s5 + $0x1f8] ss:$8 sps:$4 sm:$0xff]  }
 0x1c8   : > { %7133 = vmatprep.subr.msk.bf16.mxu1 %vm1303_vm3, %v7132_v34  ;;  %v7891_v47 = vpop.f32.mrf.mxu1  ;;  %v8031_v34 = vld [vmem:[%s10191_s5 + $0x184] ss:$8 sps:$4 sm:$0xff]   ;;  %v2500_v49 = vrot.slane %v8848_v39, 2 }
 0x1c9   : > { %2036 = vmatpush1.bf16.msra.mxu0 %v7999_v40  ;;  %v7186_v40 = vcombine.high %v7182_v30, %v7182_v30 }
 0x1ca   : > { %7116 = vmatmul.mubr.msk.bf16.vlgmr.msra.gmra.mxu1 %vm1299_vm5, %v2068_v44  ;;  %7124 = vmatprep.subr.msk.bf16.mxu0 %vm1303_vm3, %v7123_v41  ;;  %v8769_v54 = vpop.f32.mrf.mxu1  ;;  %v7185_v41 = vcombine.low %v7182_v30, %v7182_v30  ;;  %v8029_v44 = vld [vmem:[%s10191_s5 + $0x180] ss:$8 sps:$4 sm:$0xff]  }
 0x1cb   : > { %2250 = vmatpush1.bf16.msra.mxu1 %v2232_v45  ;;  %2269 = vmatprep.mubr.bf16.mxu1 %v8232_v24  ;;  %v7177_v45 = vcombine.high %v7173_v38, %v7173_v38  ;;  %v7209_v30 = vld [vmem:[%s10191_s5 + $0x220] sm:$0x33] }
 0x1cc   : > { %7107 = vmatmul.mubr.msk.bf16.vlgmr.msra.gmra.mxu0 %vm1299_vm5, %v1996_v50  ;;  %2251 = vmatprep.subr.bf16.mxu1 %v8008_v46  ;;  %v7894_v59 = vpop.f32.mrf.mxu1  ;;  %v7176_v46 = vcombine.low %v7173_v38, %v7173_v38  ;;  %v2664_v50 = vsel %vm1303_vm3, %v7185_v41, 0 }
 0x1cd   : > { %2177 = vmatpush1.bf16.msra.mxu0 %v2159_v51  ;;  %2196 = vmatprep.mubr.bf16.mxu0 %v8232_v24  ;;  %v8038_v51 = vld [vmem:[%s10191_s5 + $0x1cc] ss:$8 sps:$4 sm:$0xff]  }
 0x1ce   : > { %2178 = vmatprep.subr.bf16.mxu0 %v8011_v53  ;;  %v8785_v0 = vpop.f32.mrf.mxu1  ;;  %v7191_v59 = vld [vmem:[%s10191_s5 + $0x1f0] sm:$0x33] }
 0x1cf   : > { %2252 = vmatpush1.bf16.msra.mxu1 %v8006_v1  ;;  %v1119_v1 = vadd.f32 %v8588_v37, %v8736_v31  ;;  %v8036_v31 = vld [vmem:[%s10191_s5 + $0x1c8] ss:$8 sps:$4 sm:$0xff]   ;;  %v7195_v8 = vcombine.high %v7191_v59, %v7191_v59 }
 0x1d0   : > { %7151 = vmatprep.subr.msk.bf16.mxu1 %vm1303_vm3, %v7150_v57  ;;  %v7897_v5 = vpop.f32.mrf.mxu1  ;;  %v8041_v57 = vld [vmem:[%s10191_s5 + $0x1b4] ss:$8 sps:$4 sm:$0xff]  }
 0x1d1   : > { %2179 = vmatpush1.bf16.msra.mxu0 %v8009_v60  ;;  %v1223_v5 = vmul.f32 0.01, %v1119_v1  ;;  %vm1198_vm0 = vcmp.gt.f32.partialorder %v1119_v1, 0.0 }
 0x1d2   : > { %7134 = vmatmul.mubr.msk.bf16.vlgmr.msra.gmra.mxu1 %vm1299_vm5, %v2212_v2  ;;  %7142 = vmatprep.subr.msk.bf16.mxu0 %vm1303_vm3, %v7141_v61  ;;  %v8806_v12 = vpop.f32.mrf.mxu1  ;;  %v1222_v61 = vmul.f32 0.01, %v1114_v48  ;;  %v7204_v2 = vcombine.high %v7200_v55, %v7200_v55 }
 0x1d3   : > { %2394 = vmatpush1.bf16.msra.mxu1 %v2376_v3  ;;  %2413 = vmatprep.mubr.bf16.mxu1 %v8232_v24  ;;  %v7203_v3 = vcombine.low %v7200_v55, %v7200_v55 }
 0x1d4   : > { %7125 = vmatmul.mubr.msk.bf16.vlgmr.msra.gmra.mxu0 %vm1299_vm5, %v8778_v56  ;;  %2395 = vmatprep.subr.bf16.mxu1 %v8018_v4  ;;  %v7900_v15 = vpop.f32.mrf.mxu1  ;;  %v2592_v56 = vsel %vm1303_vm3, %v7176_v46, 0 }
 0x1d5   : > { %2322 = vmatpush1.bf16.msra.mxu0 %v2304_v9  ;;  %2341 = vmatprep.mubr.bf16.mxu0 %v8232_v24  ;;  %v7194_v9 = vcombine.low %v7191_v59, %v7191_v59  ;;  %v2808_v14 = vsel %vm1303_vm3, %v7203_v3, 0  ;;  %v8048_v15 = vld [vmem:[%s10191_s5 + $0x1fc] ss:$8 sps:$4 sm:$0xff]  }
 0x1d6   : > { %2323 = vmatprep.subr.bf16.mxu0 %v8021_v11  ;;  %v8821_v22 = vpop.f32.mrf.mxu1 }
 0x1d7   : > { %2396 = vmatpush1.bf16.msra.mxu1 %v8016_v62 }
 0x1d8   : > { %7169 = vmatprep.subr.msk.bf16.mxu1 %vm1303_vm3, %v7168_v13  ;;  %v7903_v27 = vpop.f32.mrf.mxu1  ;;  %v2644_v13 = vrot.slane %v8848_v39, 6 }
 0x1d9   : > { %2324 = vmatpush1.bf16.msra.mxu0 %v8019_v18  ;;  %v1247_v18 = vsel %vm1197_vm15, %v1114_v48, %v1222_v61  ;;  %v8051_v27 = vld [vmem:[%s10191_s5 + $0x1e4] ss:$8 sps:$4 sm:$0xff]  }
 0x1da   : > { %7152 = vmatmul.mubr.msk.bf16.vlgmr.msra.gmra.mxu1 %vm1299_vm5, %v2356_v23  ;;  %7160 = vmatprep.subr.msk.bf16.mxu0 %vm1303_vm3, %v7159_v19  ;;  %v8839_v35 = vpop.f32.mrf.mxu1  ;;  %v1248_v19 = vsel %vm1198_vm0, %v1119_v1, %v1223_v5  ;;  %v1129_v1 = vadd.f32 %v8588_v37, %v8769_v54  ;;  %v8056_v54 = vld [vmem:[%s10191_s5 + $0x228] ss:$8 sps:$4 sm:$0xff]  }
 0x1db   : > { %2538 = vmatpush1.bf16.msra.mxu1 %v2520_v25  ;;  %2557 = vmatprep.mubr.bf16.mxu1 %v8232_v24  ;;  %v2572_v25 = vrot.slane %v8848_v39, 4 }
 0x1dc   : > { %7143 = vmatmul.mubr.msk.bf16.vlgmr.msra.gmra.mxu0 %vm1299_vm5, %v2284_v32  ;;  %2539 = vmatprep.subr.bf16.mxu1 %v8028_v26  ;;  %v7906_v42 = vpop.f32.mrf.mxu1  ;;  %v2735_v26 = vsel %vm1303_vm3, %v7194_v9, 0  ;;  %v1225_v3 = vmul.f32 0.01, %v1129_v1  ;;  %vm1200_vm8 = vcmp.gt.f32.partialorder %v1129_v1, 0.0 }
 0x1dd   : > { %2465 = vmatpush1.bf16.msra.mxu0 %v2447_v33  ;;  %2484 = vmatprep.mubr.bf16.mxu0 %v8232_v24  ;;  %v8917_v33 = vpack.c.bf16 %v1248_v19, %v1247_v18  ;;  %v7213_v42 = vcombine.high %v7209_v30, %v7209_v30  ;;  %v7254_v18 = vld [vmem:[%s10191_s5 + $0x298] sm:$0x33] }
 0x1de   : > { %2466 = vmatprep.subr.bf16.mxu0 %v8031_v34  ;;  %v1153_v47 = vpop.f32.mrf.mxu1  ;;  %v7222_v34 = vcombine.high %v7218_v21, %v7218_v21 }
 0x1df   : > { %2540 = vmatpush1.bf16.msra.mxu1 %v8026_v36  ;;  %v1154_v52 = vadd.f32 %v8588_v37, %v1153_v47  ;;  %v7221_v36 = vcombine.low %v7218_v21, %v7218_v21  ;;  %v2788_v48 = vrot.slane %v8917_v33, 2  ;;  %v2860_v19 = vrot.slane %v8917_v33, 4 }
 0x1e0   : > { %7187 = vmatprep.subr.msk.bf16.mxu1 %vm1303_vm3, %v7186_v40  ;;  %v7909_v53 = vpop.f32.mrf.mxu1 }
 0x1e1   : > { %2467 = vmatpush1.bf16.msra.mxu0 %v8029_v44  ;;  %v1230_v20 = vmul.f32 0.01, %v1154_v52  ;;  %vm1205_vm13 = vcmp.gt.f32.partialorder %v1154_v52, 0.0  ;;  %v7212_v44 = vcombine.low %v7209_v30, %v7209_v30  ;;  %v8069_v30 = vld [vmem:[%s10191_s5 + $0x240] ss:$8 sps:$4 sm:$0xff]  }
 0x1e2   : > { %7170 = vmatmul.mubr.msk.bf16.vlgmr.msra.gmra.mxu1 %vm1299_vm5, %v2500_v49  ;;  %7178 = vmatprep.subr.msk.bf16.mxu0 %vm1303_vm3, %v7177_v45  ;;  %v1158_v58 = vpop.f32.mrf.mxu1  ;;  %v2952_v49 = vsel %vm1303_vm3, %v7221_v36, 0 }
 0x1e3   : > { %2682 = vmatpush1.bf16.msra.mxu1 %v2664_v50  ;;  %2701 = vmatprep.mubr.bf16.mxu1 %v8232_v24  ;;  %v1159_v60 = vadd.f32 %v8588_v37, %v1158_v58  ;;  %v1255_v6 = vsel %vm1205_vm13, %v1154_v52, %v1230_v20  ;;  %v1124_v52 = vadd.f32 %v8588_v37, %v8751_v43  ;;  %v8058_v50 = vld [vmem:[%s10191_s5 + $0x22c] ss:$8 sps:$4 sm:$0xff]   ;;  %v2880_v20 = vsel %vm1303_vm3, %v7212_v44, 0 }
 0x1e4   : > { %7161 = vmatmul.mubr.msk.bf16.vlgmr.msra.gmra.mxu0 %vm1299_vm5, %v8848_v39  ;;  %2683 = vmatprep.subr.bf16.mxu1 %v8038_v51  ;;  %v7912_v4 = vpop.f32.mrf.mxu1  ;;  %v8049_v39 = vld [vmem:[%s10191_s5 + $0x1e0] ss:$8 sps:$4 sm:$0xff]   ;;  %v7227_v58 = vld [vmem:[%s10191_s5 + $0x250] sm:$0x33] }
 0x1e5   : > { %2610 = vmatpush1.bf16.msra.mxu0 %v2592_v56  ;;  %2629 = vmatprep.mubr.bf16.mxu0 %v8232_v24  ;;  %vm1206_vm14 = vcmp.gt.f32.partialorder %v1159_v60, 0.0  ;;  %v1231_v7 = vmul.f32 0.01, %v1159_v60  ;;  %v7236_v43 = vld [vmem:[%s10191_s5 + $0x268] sm:$0x33]  ;;  %vm1199_vm7 = vcmp.gt.f32.partialorder %v1124_v52, 0.0 }
 0x1e6   : > { %2611 = vmatprep.subr.bf16.mxu0 %v8041_v57  ;;  %v1163_v11 = vpop.f32.mrf.mxu1  ;;  %v8061_v56 = vld [vmem:[%s10191_s5 + $0x214] ss:$8 sps:$4 sm:$0xff]   ;;  %v1224_v59 = vmul.f32 0.01, %v1124_v52  ;;  %v7240_v61 = vcombine.high %v7236_v43, %v7236_v43 }
 0x1e7   : > { %2684 = vmatpush1.bf16.msra.mxu1 %v8036_v31  ;;  %v1256_v62 = vsel %vm1206_vm14, %v1159_v60, %v1231_v7  ;;  %v1164_v10 = vadd.f32 %v8588_v37, %v1163_v11  ;;  %v8059_v60 = vld [vmem:[%s10191_s5 + $0x210] ss:$8 sps:$4 sm:$0xff]   ;;  %v7230_v7 = vcombine.low %v7227_v58, %v7227_v58  ;;  %v2932_v11 = vrot.slane %v8917_v33, 6  ;;  %v8081_v44 = vld [vmem:[%s10191_s5 + $0x274] ss:$8 sps:$4 sm:$0xff]  }
 0x1e8   : > { %7205 = vmatprep.subr.msk.bf16.mxu1 %vm1303_vm3, %v7204_v2  ;;  %v8897_v16 = vpack.c.bf16 %v1256_v62, %v1255_v6  ;;  %v7915_v17 = vpop.f32.mrf.mxu1  ;;  %v7231_v6 = vcombine.high %v7227_v58, %v7227_v58  ;;  %v8091_v58 = vld [vmem:[%s10191_s5 + $0x2a4] ss:$8 sps:$4 sm:$0xff]  }
 0x1e9   : > { %2612 = vmatpush1.bf16.msra.mxu0 %v8039_v63  ;;  %v1232_v23 = vmul.f32 0.01, %v1164_v10  ;;  %vm1207_vm2 = vcmp.gt.f32.partialorder %v1164_v10, 0.0  ;;  %v7239_v63 = vcombine.low %v7236_v43, %v7236_v43  ;;  %v1250_v17 = vsel %vm1200_vm8, %v1129_v1, %v1225_v3  ;;  %v8088_v43 = vld [vmem:[%s10191_s5 + $0x2bc] ss:$8 sps:$4 sm:$0xff]  }
 0x1ea   : > { %7188 = vmatmul.mubr.msk.bf16.vlgmr.msra.gmra.mxu1 %vm1299_vm5, %v2644_v13  ;;  %7196 = vmatprep.subr.msk.bf16.mxu0 %vm1303_vm3, %v7195_v8  ;;  %v1168_v28 = vpop.f32.mrf.mxu1  ;;  %v3023_v21 = vsel %vm1303_vm3, %v7230_v7, 0  ;;  %v8098_v7 = vld [vmem:[%s10191_s5 + $0x2ec] ss:$8 sps:$4 sm:$0xff]  }
 0x1eb   : > { %2826 = vmatpush1.bf16.msra.mxu1 %v2808_v14  ;;  %2845 = vmatprep.mubr.bf16.mxu1 %v8232_v24  ;;  %v1169_v32 = vadd.f32 %v8588_v37, %v1168_v28  ;;  %v1257_v40 = vsel %vm1207_vm2, %v1164_v10, %v1232_v23  ;;  %v3096_v62 = vsel %vm1303_vm3, %v7239_v63, 0  ;;  %v8068_v10 = vld [vmem:[%s10191_s5 + $0x25c] ss:$8 sps:$4 sm:$0xff]   ;;  %v7258_v28 = vcombine.high %v7254_v18, %v7254_v18 }
 0x1ec   : > { %7179 = vmatmul.mubr.msk.bf16.vlgmr.msra.gmra.mxu0 %vm1299_vm5, %v2572_v25  ;;  %2827 = vmatprep.subr.bf16.mxu1 %v8048_v15  ;;  %v7918_v38 = vpop.f32.mrf.mxu1  ;;  %v1249_v15 = vsel %vm1199_vm7, %v1124_v52, %v1224_v59  ;;  %v8071_v23 = vld [vmem:[%s10191_s5 + $0x244] ss:$8 sps:$4 sm:$0xff]   ;;  %v8066_v25 = vld [vmem:[%s10191_s5 + $0x258] ss:$8 sps:$4 sm:$0xff]  }
 0x1ed   : > { %2753 = vmatpush1.bf16.msra.mxu0 %v2735_v26  ;;  %2772 = vmatprep.mubr.bf16.mxu0 %v8232_v24  ;;  %vm1208_vm1 = vcmp.gt.f32.partialorder %v1169_v32, 0.0  ;;  %v1233_v41 = vmul.f32 0.01, %v1169_v32  ;;  %v7245_v26 = vld [vmem:[%s10191_s5 + $0x280] sm:$0x33] }
 0x1ee   : > { %2754 = vmatprep.subr.bf16.mxu0 %v8051_v27  ;;  %v1173_v45 = vpop.f32.mrf.mxu1  ;;  %v1268_v27 = vpack.c.bf16 %v1250_v17, %v1249_v15  ;;  %v8078_v38 = vld [vmem:[%s10191_s5 + $0x28c] ss:$8 sps:$4 sm:$0xff]   ;;  %v7281_v59 = vld [vmem:[%s10191_s5 + $0x2e0] sm:$0x33] }
 0x1ef   : > { %2828 = vmatpush1.bf16.msra.mxu1 %v8046_v29  ;;  %v1258_v46 = vsel %vm1208_vm1, %v1169_v32, %v1233_v41  ;;  %v1174_v47 = vadd.f32 %v8588_v37, %v1173_v45  ;;  %v7257_v29 = vcombine.low %v7254_v18, %v7254_v18  ;;  %v7249_v32 = vcombine.high %v7245_v26, %v7245_v26  ;;  %v7272_v41 = vld [vmem:[%s10191_s5 + $0x2c8] sm:$0x33] }
 0x1f0   : > { %7223 = vmatprep.subr.msk.bf16.mxu1 %vm1303_vm3, %v7222_v34  ;;  %v8934_v51 = vpack.c.bf16 %v1258_v46, %v1257_v40  ;;  %v7921_v53 = vpop.f32.mrf.mxu1  ;;  %v3076_v34 = vrot.slane %v1268_v27, 2  ;;  %v1139_v40 = vadd.f32 %v8588_v37, %v8806_v12  ;;  %v7263_v12 = vld [vmem:[%s10191_s5 + $0x2b0] sm:$0x33]  ;;  %v7276_v45 = vcombine.high %v7272_v41, %v7272_v41 }
 0x1f1   : > { %2755 = vmatpush1.bf16.msra.mxu0 %v8049_v39  ;;  %v1234_v55 = vmul.f32 0.01, %v1174_v47  ;;  %vm1209_vm4 = vcmp.gt.f32.partialorder %v1174_v47, 0.0  ;;  %v3240_v36 = vsel %vm1303_vm3, %v7257_v29, 0  ;;  %v1134_v39 = vadd.f32 %v8588_v37, %v8785_v0  ;;  %v8076_v0 = vld [vmem:[%s10191_s5 + $0x288] ss:$8 sps:$4 sm:$0xff]  }
 0x1f2   : > { %7206 = vmatmul.mubr.msk.bf16.vlgmr.msra.gmra.mxu1 %vm1299_vm5, %v2788_v48  ;;  %7214 = vmatprep.subr.msk.bf16.mxu0 %vm1303_vm3, %v7213_v42  ;;  %v1178_v57 = vpop.f32.mrf.mxu1  ;;  %v7275_v46 = vcombine.low %v7272_v41, %v7272_v41  ;;  %v1227_v52 = vmul.f32 0.01, %v1139_v40  ;;  %v8079_v48 = vld [vmem:[%s10191_s5 + $0x270] ss:$8 sps:$4 sm:$0xff]   ;;  %vm1202_vm10 = vcmp.gt.f32.partialorder %v1139_v40, 0.0  ;;  %v3220_v53 = vrot.slane %v1268_v27, 6 }
 0x1f3   : > { %2970 = vmatpush1.bf16.msra.mxu1 %v2952_v49  ;;  %2989 = vmatprep.mubr.bf16.mxu1 %v8232_v24  ;;  %v1179_v31 = vadd.f32 %v8588_v37, %v1178_v57  ;;  %v1259_v4 = vsel %vm1209_vm4, %v1174_v47, %v1234_v55  ;;  %v1226_v47 = vmul.f32 0.01, %v1134_v39  ;;  %vm1201_vm9 = vcmp.gt.f32.partialorder %v1134_v39, 0.0 }
 0x1f4   : > { %7197 = vmatmul.mubr.msk.bf16.vlgmr.msra.gmra.mxu0 %vm1299_vm5, %v8917_v33  ;;  %2971 = vmatprep.subr.bf16.mxu1 %v8058_v50  ;;  %v7924_v2 = vpop.f32.mrf.mxu1  ;;  %v7248_v33 = vcombine.low %v7245_v26, %v7245_v26  ;;  %v7267_v49 = vcombine.high %v7263_v12, %v7263_v12  ;;  %v7266_v50 = vcombine.low %v7263_v12, %v7263_v12  ;;  %v3384_v1 = vsel %vm1303_vm3, %v7275_v46, 0 }
 0x1f5   : > { %2898 = vmatpush1.bf16.msra.mxu0 %v2880_v20  ;;  %2917 = vmatprep.mubr.bf16.mxu0 %v8232_v24  ;;  %vm1210_vm6 = vcmp.gt.f32.partialorder %v1179_v31, 0.0  ;;  %v1235_v5 = vmul.f32 0.01, %v1179_v31  ;;  %v1251_v55 = vsel %vm1201_vm9, %v1134_v39, %v1226_v47  ;;  %v1252_v20 = vsel %vm1202_vm10, %v1139_v40, %v1227_v52  ;;  %v8089_v2 = vld [vmem:[%s10191_s5 + $0x2a0] ss:$8 sps:$4 sm:$0xff]  }
 0x1f6   : > { %2899 = vmatprep.subr.bf16.mxu0 %v8061_v56  ;;  %v8962_v8 = vpop.f32.mrf.mxu1  ;;  %v3168_v42 = vsel %vm1303_vm3, %v7248_v33, 0  ;;  %v7290_v56 = vld [vmem:[%s10191_s5 + $0x2f8] sm:$0x33]  ;;  %v3148_v57 = vrot.slane %v1268_v27, 4  ;;  %v7285_v3 = vcombine.high %v7281_v59, %v7281_v59  ;;  %v7317_v39 = vld [vmem:[%s10191_s5 + $0x340] sm:$0x33] }
 0x1f7   : > { %2972 = vmatpush1.bf16.msra.mxu1 %v8056_v54  ;;  %v1260_v9 = vsel %vm1210_vm6, %v1179_v31, %v1235_v5  ;;  %v3311_v54 = vsel %vm1303_vm3, %v7266_v50, 0  ;;  %v8086_v31 = vld [vmem:[%s10191_s5 + $0x2b8] ss:$8 sps:$4 sm:$0xff]   ;;  %v7293_v63 = vcombine.low %v7290_v56, %v7290_v56  ;;  %v7320_v12 = vcombine.low %v7317_v39, %v7317_v39  ;;  %v8118_v47 = vld [vmem:[%s10191_s5 + $0x34c] ss:$8 sps:$4 sm:$0xff]  }
 0x1f8   : > { %7241 = vmatprep.subr.msk.bf16.mxu1 %vm1303_vm3, %v7240_v61  ;;  %v8970_v13 = vpack.c.bf16 %v1260_v9, %v1259_v4  ;;  %v7927_v14 = vpop.f32.mrf.mxu1  ;;  %v7294_v61 = vcombine.high %v7290_v56, %v7290_v56  ;;  %v7284_v4 = vcombine.low %v7281_v59, %v7281_v59  ;;  %v1144_v9 = vadd.f32 %v8588_v37, %v8821_v22  ;;  %v8101_v37 = vld [vmem:[%s10191_s5 + $0x2d4] ss:$8 sps:$4 sm:$0xff]   ;;  %v8096_v22 = vld [vmem:[%s10191_s5 + $0x2e8] ss:$8 sps:$4 sm:$0xff]  }
 0x1f9   : > { %2900 = vmatpush1.bf16.msra.mxu0 %v8059_v60  ;;  %v9045_v60 = vpack.c.bf16 %v1252_v20, %v1251_v55  ;;  %v7344_v52 = vld [vmem:[%s10191_s5 + $0x388] sm:$0x33]  ;;  %v8119_v55 = vld [vmem:[%s10191_s5 + $0x330] ss:$8 sps:$4 sm:$0xff]  }
 0x1fa   : > { %7224 = vmatmul.mubr.msk.bf16.vlgmr.msra.gmra.mxu1 %vm1299_vm5, %v2932_v11  ;;  %7232 = vmatprep.subr.msk.bf16.mxu0 %vm1303_vm3, %v7231_v6  ;;  %v3528_v6 = vsel %vm1303_vm3, %v7293_v63, 0  ;;  %v9063_v11 = vld [vmem:[%s10190_s4] ss:$0 sm:$0xff]  ;;  %v3456_v14 = vsel %vm1303_vm3, %v7284_v4, 0  ;;  %v1228_v18 = vmul.f32 0.01, %v1144_v9 }
 0x1fb   : > { %3114 = vmatpush1.bf16.msra.mxu1 %v3096_v62  ;;  %3133 = vmatprep.mubr.bf16.mxu1 %v8232_v24  ;;  %v3364_v5 = vrot.slane %v9045_v60, 2  ;;  %v1149_v62 = vadd.f32 %v9063_v11, %v8839_v35  ;;  %v7299_v35 = vld [vmem:[%s10191_s5 + $0x310] sm:$0x33]  ;;  %vm1203_vm11 = vcmp.gt.f32.partialorder %v1144_v9, 0.0  ;;  %v3508_v26 = vrot.slane %v9045_v60, 6 }
 0x1fc   : > { %7215 = vmatmul.mubr.msk.bf16.vlgmr.msra.gmra.mxu0 %vm1299_vm5, %v2860_v19  ;;  %3115 = vmatprep.subr.bf16.mxu1 %v8068_v10  ;;  %v7308_v10 = vld [vmem:[%s10191_s5 + $0x328] sm:$0x33]  ;;  %v1253_v29 = vsel %vm1203_vm11, %v1144_v9, %v1228_v18  ;;  %v3436_v33 = vrot.slane %v9045_v60, 4  ;;  %v8126_v63 = vld [vmem:[%s10191_s5 + $0x378] ss:$8 sps:$4 sm:$0xff]   ;;  %v3940_v9 = vrot.slane %v8897_v16, 2 }
 0x1fd   : > { %3041 = vmatpush1.bf16.msra.mxu0 %v3023_v21  ;;  %3060 = vmatprep.mubr.bf16.mxu0 %v8232_v24  ;;  %v7312_v15 = vcombine.high %v7308_v10, %v7308_v10  ;;  %v7311_v17 = vcombine.low %v7308_v10, %v7308_v10  ;;  %v1229_v19 = vmul.f32 0.01, %v1149_v62  ;;  %v8099_v21 = vld [vmem:[%s10191_s5 + $0x2d0] ss:$8 sps:$4 sm:$0xff]   ;;  %vm1204_vm12 = vcmp.gt.f32.partialorder %v1149_v62, 0.0 }
 0x1fe   : > { %3042 = vmatprep.subr.bf16.mxu0 %v8071_v23  ;;  %v7303_v23 = vcombine.high %v7299_v35, %v7299_v35  ;;  %v8116_v50 = vld [vmem:[%s10191_s5 + $0x348] ss:$8 sps:$4 sm:$0xff]   ;;  %v8138_v10 = vld [vmem:[%s10191_s5 + $0x3ac] ss:$8 sps:$4 sm:$0xff]  }
 0x1ff   : > { %3116 = vmatpush1.bf16.msra.mxu1 %v8066_v25  ;;  %v7302_v25 = vcombine.low %v7299_v35, %v7299_v35  ;;  %v8136_v35 = vld [vmem:[%s10191_s5 + $0x3a8] ss:$8 sps:$4 sm:$0xff]  }
 0x200   : > { %7259 = vmatprep.subr.msk.bf16.mxu1 %vm1303_vm3, %v7258_v28  ;;  %v8108_v28 = vld [vmem:[%s10191_s5 + $0x31c] ss:$8 sps:$4 sm:$0xff]  }
 0x201   : > { %3043 = vmatpush1.bf16.msra.mxu0 %v8069_v30  ;;  %v1254_v30 = vsel %vm1204_vm12, %v1149_v62, %v1229_v19  ;;  %v8139_v19 = vld [vmem:[%s10191_s5 + $0x390] ss:$8 sps:$4 sm:$0xff]  }
 0x202   : > { %7242 = vmatmul.mubr.msk.bf16.vlgmr.msra.gmra.mxu1 %vm1299_vm5, %v3076_v34  ;;  %7250 = vmatprep.subr.msk.bf16.mxu0 %vm1303_vm3, %v7249_v32  ;;  %v7326_v32 = vld [vmem:[%s10191_s5 + $0x358] sm:$0x33]  ;;  %v3599_v34 = vsel %vm1303_vm3, %v7302_v25, 0  ;;  %v1270_v40 = vpack.c.bf16 %v1254_v30, %v1253_v29  ;;  %v4084_v25 = vrot.slane %v8897_v16, 6  ;;  %v4012_v29 = vrot.slane %v8897_v16, 4 }
 0x203   : > { %3258 = vmatpush1.bf16.msra.mxu1 %v3240_v36  ;;  %3277 = vmatprep.mubr.bf16.mxu1 %v8232_v24  ;;  %v8111_v36 = vld [vmem:[%s10191_s5 + $0x304] ss:$8 sps:$4 sm:$0xff]   ;;  %v7330_v41 = vcombine.high %v7326_v32, %v7326_v32 }
 0x204   : > { %7233 = vmatmul.mubr.msk.bf16.vlgmr.msra.gmra.mxu0 %vm1299_vm5, %v1268_v27  ;;  %3259 = vmatprep.subr.bf16.mxu1 %v8078_v38  ;;  %v3672_v27 = vsel %vm1303_vm3, %v7311_v17, 0  ;;  %v8106_v38 = vld [vmem:[%s10191_s5 + $0x318] ss:$8 sps:$4 sm:$0xff]   ;;  %v3724_v59 = vrot.slane %v1270_v40, 4 }
 0x205   : > { %3186 = vmatpush1.bf16.msra.mxu0 %v3168_v42  ;;  %3205 = vmatprep.mubr.bf16.mxu0 %v8232_v24  ;;  %v7329_v42 = vcombine.low %v7326_v32, %v7326_v32  ;;  %v8151_v32 = vld [vmem:[%s10191_s5 + $0x3c4] ss:$8 sps:$4 sm:$0xff]  }
 0x206   : > { %3187 = vmatprep.subr.bf16.mxu0 %v8081_v44  ;;  %v8109_v44 = vld [vmem:[%s10191_s5 + $0x300] ss:$8 sps:$4 sm:$0xff]  }
 0x207   : > { %3260 = vmatpush1.bf16.msra.mxu1 %v8076_v0  ;;  %v7321_v0 = vcombine.high %v7317_v39, %v7317_v39  ;;  %v3816_v46 = vsel %vm1303_vm3, %v7329_v42, 0 }
 0x208   : > { %7277 = vmatprep.subr.msk.bf16.mxu1 %vm1303_vm3, %v7276_v45  ;;  %v3652_v45 = vrot.slane %v1270_v40, 2 }
 0x209   : > { %3188 = vmatpush1.bf16.msra.mxu0 %v8079_v48  ;;  %v3744_v48 = vsel %vm1303_vm3, %v7320_v12, 0 }
 0x20a   : > { %7260 = vmatmul.mubr.msk.bf16.vlgmr.msra.gmra.mxu1 %vm1299_vm5, %v3220_v53  ;;  %7268 = vmatprep.subr.msk.bf16.mxu0 %vm1303_vm3, %v7267_v49  ;;  %v8121_v49 = vld [vmem:[%s10191_s5 + $0x334] ss:$8 sps:$4 sm:$0xff]  }
 0x20b   : > { %3402 = vmatpush1.bf16.msra.mxu1 %v3384_v1  ;;  %3421 = vmatprep.mubr.bf16.mxu1 %v8232_v24  ;;  %v7335_v53 = vld [vmem:[%s10191_s5 + $0x370] sm:$0x33]  ;;  %v7348_v1 = vcombine.high %v7344_v52, %v7344_v52 }
 0x20c   : > { %7251 = vmatmul.mubr.msk.bf16.vlgmr.msra.gmra.mxu0 %vm1299_vm5, %v3148_v57  ;;  %3403 = vmatprep.subr.bf16.mxu1 %v8088_v43  ;;  %v7347_v43 = vcombine.low %v7344_v52, %v7344_v52  ;;  %v7339_v20 = vcombine.high %v7335_v53, %v7335_v53  ;;  %v7338_v56 = vcombine.low %v7335_v53, %v7335_v53  ;;  %v3796_v57 = vrot.slane %v1270_v40, 6 }
 0x20d   : > { %3329 = vmatpush1.bf16.msra.mxu0 %v3311_v54  ;;  %3348 = vmatprep.mubr.bf16.mxu0 %v8232_v24 }
 0x20e   : > { %3330 = vmatprep.subr.bf16.mxu0 %v8091_v58  ;;  %v3960_v54 = vsel %vm1303_vm3, %v7347_v43, 0  ;;  %v8128_v58 = vld [vmem:[%s10191_s5 + $0x37c] ss:$8 sps:$4 sm:$0xff]  }
 0x20f   : > { %3404 = vmatpush1.bf16.msra.mxu1 %v8086_v31  ;;  %v7362_v31 = vld [vmem:[%s10191_s5 + $0x3b8] sm:$0x33] }
 0x210   : > { %7295 = vmatprep.subr.msk.bf16.mxu1 %vm1303_vm3, %v7294_v61  ;;  %v8131_v61 = vld [vmem:[%s10191_s5 + $0x364] ss:$8 sps:$4 sm:$0xff]   ;;  %v7365_v4 = vcombine.low %v7362_v31, %v7362_v31 }
 0x211   : > { %3331 = vmatpush1.bf16.msra.mxu0 %v8089_v2  ;;  %v7353_v2 = vld [vmem:[%s10191_s5 + $0x3a0] sm:$0x33] }
 0x212   : > { %7278 = vmatmul.mubr.msk.bf16.vlgmr.msra.gmra.mxu1 %vm1299_vm5, %v3364_v5  ;;  %7286 = vmatprep.subr.msk.bf16.mxu0 %vm1303_vm3, %v7285_v3  ;;  %v7366_v3 = vcombine.high %v7362_v31, %v7362_v31  ;;  %v8129_v5 = vld [vmem:[%s10191_s5 + $0x360] ss:$8 sps:$4 sm:$0xff]   ;;  %v4104_v62 = vsel %vm1303_vm3, %v7365_v4, 0  ;;  %v8178_v4 = vld [vmem:[%s10191_s5 + $0x46c] ss:$8 sps:$4 sm:$0xff]  }
 0x213   : > { %3546 = vmatpush1.bf16.msra.mxu1 %v3528_v6  ;;  %3565 = vmatprep.mubr.bf16.mxu1 %v8232_v24  ;;  %v7357_v6 = vcombine.high %v7353_v2, %v7353_v2 }
 0x214   : > { %7269 = vmatmul.mubr.msk.bf16.vlgmr.msra.gmra.mxu0 %vm1299_vm5, %v9045_v60  ;;  %3547 = vmatprep.subr.bf16.mxu1 %v8098_v7  ;;  %v3887_v60 = vsel %vm1303_vm3, %v7338_v56, 0  ;;  %v7356_v7 = vcombine.low %v7353_v2, %v7353_v2  ;;  %v4300_v56 = vrot.slane %v8934_v51, 4  ;;  %v4516_v2 = vrot.slane %v8970_v13, 2 }
 0x215   : > { %3474 = vmatpush1.bf16.msra.mxu0 %v3456_v14  ;;  %3493 = vmatprep.mubr.bf16.mxu0 %v8232_v24  ;;  %v7380_v14 = vld [vmem:[%s10191_s5 + $0x3e8] sm:$0x33] }
 0x216   : > { %3475 = vmatprep.subr.bf16.mxu0 %v8101_v37  ;;  %v4032_v37 = vsel %vm1303_vm3, %v7356_v7, 0  ;;  %v7384_v17 = vcombine.high %v7380_v14, %v7380_v14  ;;  %v7383_v18 = vcombine.low %v7380_v14, %v7380_v14  ;;  %v8176_v7 = vld [vmem:[%s10191_s5 + $0x468] ss:$8 sps:$4 sm:$0xff]  }
 0x217   : > { %3548 = vmatpush1.bf16.msra.mxu1 %v8096_v22  ;;  %v8141_v22 = vld [vmem:[%s10191_s5 + $0x394] ss:$8 sps:$4 sm:$0xff]  }
 0x218   : > { %7313 = vmatprep.subr.msk.bf16.mxu1 %vm1303_vm3, %v7312_v15  ;;  %v7371_v15 = vld [vmem:[%s10191_s5 + $0x3d0] sm:$0x33] }
 0x219   : > { %3476 = vmatpush1.bf16.msra.mxu0 %v8099_v21  ;;  %v7375_v21 = vcombine.high %v7371_v15, %v7371_v15 }
 0x21a   : > { %7296 = vmatmul.mubr.msk.bf16.vlgmr.msra.gmra.mxu1 %vm1299_vm5, %v3508_v26  ;;  %7304 = vmatprep.subr.msk.bf16.mxu0 %vm1303_vm3, %v7303_v23  ;;  %v7374_v23 = vcombine.low %v7371_v15, %v7371_v15  ;;  %v4248_v26 = vsel %vm1303_vm3, %v7383_v18, 0 }
 0x21b   : > { %3690 = vmatpush1.bf16.msra.mxu1 %v3672_v27  ;;  %3709 = vmatprep.mubr.bf16.mxu1 %v8232_v24  ;;  %v8148_v27 = vld [vmem:[%s10191_s5 + $0x3dc] ss:$8 sps:$4 sm:$0xff]  }
 0x21c   : > { %7287 = vmatmul.mubr.msk.bf16.vlgmr.msra.gmra.mxu0 %vm1299_vm5, %v3436_v33  ;;  %3691 = vmatprep.subr.bf16.mxu1 %v8108_v28  ;;  %v7398_v28 = vld [vmem:[%s10191_s5 + $0x418] sm:$0x33]  ;;  %v4175_v30 = vsel %vm1303_vm3, %v7374_v23, 0 }
 0x21d   : > { %3617 = vmatpush1.bf16.msra.mxu0 %v3599_v34  ;;  %3636 = vmatprep.mubr.bf16.mxu0 %v8232_v24  ;;  %v8146_v33 = vld [vmem:[%s10191_s5 + $0x3d8] ss:$8 sps:$4 sm:$0xff]   ;;  %v7402_v34 = vcombine.high %v7398_v28, %v7398_v28 }
 0x21e   : > { %3618 = vmatprep.subr.bf16.mxu0 %v8111_v36  ;;  %v7401_v36 = vcombine.low %v7398_v28, %v7398_v28 }
 0x21f   : > { %3692 = vmatpush1.bf16.msra.mxu1 %v8106_v38  ;;  %v8149_v38 = vld [vmem:[%s10191_s5 + $0x3c0] ss:$8 sps:$4 sm:$0xff]  }
 0x220   : > { %7331 = vmatprep.subr.msk.bf16.mxu1 %vm1303_vm3, %v7330_v41  ;;  %v4228_v41 = vrot.slane %v8934_v51, 2  ;;  %v4392_v42 = vsel %vm1303_vm3, %v7401_v36, 0 }
 0x221   : > { %3619 = vmatpush1.bf16.msra.mxu0 %v8109_v44  ;;  %v8158_v44 = vld [vmem:[%s10191_s5 + $0x40c] ss:$8 sps:$4 sm:$0xff]  }
 0x222   : > { %7314 = vmatmul.mubr.msk.bf16.vlgmr.msra.gmra.mxu1 %vm1299_vm5, %v3652_v45  ;;  %7322 = vmatprep.subr.msk.bf16.mxu0 %vm1303_vm3, %v7321_v0  ;;  %v7416_v0 = vld [vmem:[%s10191_s5 + $0x448] sm:$0x33]  ;;  %v8161_v45 = vld [vmem:[%s10191_s5 + $0x3f4] ss:$8 sps:$4 sm:$0xff]  }
 0x223   : > { %3834 = vmatpush1.bf16.msra.mxu1 %v3816_v46  ;;  %3853 = vmatprep.mubr.bf16.mxu1 %v8232_v24  ;;  %v8156_v46 = vld [vmem:[%s10191_s5 + $0x408] ss:$8 sps:$4 sm:$0xff]   ;;  %v7420_v52 = vcombine.high %v7416_v0, %v7416_v0 }
 0x224   : > { %7305 = vmatmul.mubr.msk.bf16.vlgmr.msra.gmra.mxu0 %vm1299_vm5, %v1270_v40  ;;  %3835 = vmatprep.subr.bf16.mxu1 %v8118_v47  ;;  %v7407_v47 = vld [vmem:[%s10191_s5 + $0x430] sm:$0x33] }
 0x225   : > { %3762 = vmatpush1.bf16.msra.mxu0 %v3744_v48  ;;  %3781 = vmatprep.mubr.bf16.mxu0 %v8232_v24  ;;  %v7419_v48 = vcombine.low %v7416_v0, %v7416_v0  ;;  %v7410_v53 = vcombine.low %v7407_v47, %v7407_v47 }
 0x226   : > { %3763 = vmatprep.subr.bf16.mxu0 %v8121_v49  ;;  %v8159_v49 = vld [vmem:[%s10191_s5 + $0x3f0] ss:$8 sps:$4 sm:$0xff]  }
 0x227   : > { %3836 = vmatpush1.bf16.msra.mxu1 %v8116_v50  ;;  %v7411_v50 = vcombine.high %v7407_v47, %v7407_v47  ;;  %v4536_v43 = vsel %vm1303_vm3, %v7419_v48, 0  ;;  %v4867_v47 = vld [vmem:[%s10193_s7 + $0x1a0] sm:$0xff] }
 0x228   : > { %7349 = vmatprep.subr.msk.bf16.mxu1 %vm1303_vm3, %v7348_v1  ;;  %v4372_v1 = vrot.slane %v8934_v51, 6 }
 0x229   : > { %3764 = vmatpush1.bf16.msra.mxu0 %v8119_v55  ;;  %v8168_v55 = vld [vmem:[%s10191_s5 + $0x43c] ss:$8 sps:$4 sm:$0xff]  }
 0x22a   : > { %7332 = vmatmul.mubr.msk.bf16.vlgmr.msra.gmra.mxu1 %vm1299_vm5, %v3796_v57  ;;  %7340 = vmatprep.subr.msk.bf16.mxu0 %vm1303_vm3, %v7339_v20  ;;  %v7434_v20 = vld [vmem:[%s10191_s5 + $0x478] sm:$0x33]  ;;  %v4463_v57 = vsel %vm1303_vm3, %v7410_v53, 0  ;;  %v4868_v53 = vld [vmem:[%s10193_s7 + $0x1a8] sm:$0xff] }
 0x22b   : > { %3978 = vmatpush1.bf16.msra.mxu1 %v3960_v54  ;;  %3997 = vmatprep.mubr.bf16.mxu1 %v8232_v24  ;;  %v8171_v54 = vld [vmem:[%s10191_s5 + $0x424] ss:$8 sps:$4 sm:$0xff]   ;;  %v7438_v31 = vcombine.high %v7434_v20, %v7434_v20 }
 0x22c   : > { %7323 = vmatmul.mubr.msk.bf16.vlgmr.msra.gmra.mxu0 %vm1299_vm5, %v3724_v59  ;;  %3979 = vmatprep.subr.bf16.mxu1 %v8128_v58  ;;  %v8166_v58 = vld [vmem:[%s10191_s5 + $0x438] ss:$8 sps:$4 sm:$0xff]   ;;  %v7437_v59 = vcombine.low %v7434_v20, %v7434_v20 }
 0x22d   : > { %3905 = vmatpush1.bf16.msra.mxu0 %v3887_v60  ;;  %3924 = vmatprep.mubr.bf16.mxu0 %v8232_v24  ;;  %v8169_v60 = vld [vmem:[%s10191_s5 + $0x420] ss:$8 sps:$4 sm:$0xff]  }
 0x22e   : > { %3906 = vmatprep.subr.bf16.mxu0 %v8131_v61 }
 0x22f   : > { %3980 = vmatpush1.bf16.msra.mxu1 %v8126_v63 }
 0x230   : > { %7367 = vmatprep.subr.msk.bf16.mxu1 %vm1303_vm3, %v7366_v3  ;;  %v4680_v3 = vsel %vm1303_vm3, %v7437_v59, 0  ;;  %v4856_v59 = vld [vmem:[%s10193_s7 + $0x148] sm:$0xff] }
 0x231   : > { %3907 = vmatpush1.bf16.msra.mxu0 %v8129_v5 }
 0x232   : > { %7350 = vmatmul.mubr.msk.bf16.vlgmr.msra.gmra.mxu1 %vm1299_vm5, %v3940_v9  ;;  %7358 = vmatprep.subr.msk.bf16.mxu0 %vm1303_vm3, %v7357_v6  ;;  %v8181_v6 = vld [vmem:[%s10191_s5 + $0x454] ss:$8 sps:$4 sm:$0xff]  }
 0x233   : > { %4122 = vmatpush1.bf16.msra.mxu1 %v4104_v62  ;;  %4141 = vmatprep.mubr.bf16.mxu1 %v8232_v24  ;;  %v7443_v9 = vld [vmem:[%s10191_s5 + $0x490] sm:$0x33] }
 0x234   : > { %7341 = vmatmul.mubr.msk.bf16.vlgmr.msra.gmra.mxu0 %vm1299_vm5, %v8897_v16  ;;  %4123 = vmatprep.subr.bf16.mxu1 %v8138_v10  ;;  %v7389_v16 = vld [vmem:[%s10191_s5 + $0x400] sm:$0x33]  ;;  %v8179_v62 = vld [vmem:[%s10191_s5 + $0x450] ss:$8 sps:$4 sm:$0xff]   ;;  %v7447_v10 = vcombine.high %v7443_v9, %v7443_v9  ;;  %v7446_v14 = vcombine.low %v7443_v9, %v7443_v9 }
 0x235   : > { %4050 = vmatpush1.bf16.msra.mxu0 %v4032_v37  ;;  %4069 = vmatprep.mubr.bf16.mxu0 %v8232_v24  ;;  %v7393_v39 = vcombine.high %v7389_v16, %v7389_v16  ;;  %v7392_v40 = vcombine.low %v7389_v16, %v7389_v16  ;;  %v1184_v37 = vadd.f32 %v9063_v11, %v8962_v8  ;;  %v8184_v8 = vld [vmem:[%s10191_s5 + $0x480] ss:$8 sps:$4 sm:$0xff]  }
 0x236   : > { %4051 = vmatprep.subr.bf16.mxu0 %v8141_v22  ;;  %v4660_v22 = vrot.slane %v8970_v13, 6  ;;  %v4751_v15 = vsel %vm1303_vm3, %v7446_v14, 0  ;;  %v4875_v16 = vld [vmem:[%s10193_s7 + $0x1e0] sm:$0xff]  ;;  %v4848_v14 = vld [vmem:[%s10193_s7 + $0x108] sm:$0xff] }
 0x237   : > { %4124 = vmatpush1.bf16.msra.mxu1 %v8136_v35  ;;  %v4320_v12 = vsel %vm1303_vm3, %v7392_v40, 0  ;;  %v4588_v35 = vrot.slane %v8970_v13, 4  ;;  %v1236_v18 = vmul.f32 0.01, %v1184_v37  ;;  %vm1211_vm13 = vcmp.gt.f32.partialorder %v1184_v37, 0.0 }
 0x238   : > { %7385 = vmatprep.subr.msk.bf16.mxu1 %vm1303_vm3, %v7384_v17  ;;  %v8186_v17 = vld [vmem:[%s10191_s5 + $0x484] ss:$8 sps:$4 sm:$0xff]  }
 0x239   : > { %4052 = vmatpush1.bf16.msra.mxu0 %v8139_v19 }
 0x23a   : > { %7368 = vmatmul.mubr.msk.bf16.vlgmr.msra.gmra.mxu1 %vm1299_vm5, %v4084_v25  ;;  %7376 = vmatprep.subr.msk.bf16.mxu0 %vm1303_vm3, %v7375_v21 }
 0x23b   : > { %4266 = vmatpush1.bf16.msra.mxu1 %v4248_v26  ;;  %4285 = vmatprep.mubr.bf16.mxu1 %v8232_v24 }
 0x23c   : > { %7359 = vmatmul.mubr.msk.bf16.vlgmr.msra.gmra.mxu0 %vm1299_vm5, %v4012_v29  ;;  %4267 = vmatprep.subr.bf16.mxu1 %v8148_v27 }
 0x23d   : > { %4193 = vmatpush1.bf16.msra.mxu0 %v4175_v30  ;;  %4212 = vmatprep.mubr.bf16.mxu0 %v8232_v24 }
 0x23e   : > { %4194 = vmatprep.subr.bf16.mxu0 %v8151_v32 }
 0x23f   : > { %4268 = vmatpush1.bf16.msra.mxu1 %v8146_v33 }
 0x240   : > { %7403 = vmatprep.subr.msk.bf16.mxu1 %vm1303_vm3, %v7402_v34  ;;  %v4872_v34 = vld [vmem:[%s10193_s7 + $0x1c8] sm:$0xff] }
 0x241   : > { %4195 = vmatpush1.bf16.msra.mxu0 %v8149_v38  ;;  %v4876_v38 = vld [vmem:[%s10193_s7 + $0x1e8] sm:$0xff] }
 0x242   : > { %7386 = vmatmul.mubr.msk.bf16.vlgmr.msra.gmra.mxu1 %vm1299_vm5, %v4228_v41  ;;  %7394 = vmatprep.subr.msk.bf16.mxu0 %vm1303_vm3, %v7393_v39 }
 0x243   : > { %4410 = vmatpush1.bf16.msra.mxu1 %v4392_v42  ;;  %4429 = vmatprep.mubr.bf16.mxu1 %v8232_v24  ;;  %v7508_v42 = vcombine.low %v4872_v34, %v4876_v38 }
 0x244   : > { %7377 = vmatmul.mubr.msk.bf16.vlgmr.msra.gmra.mxu0 %vm1299_vm5, %v8934_v51  ;;  %4411 = vmatprep.subr.bf16.mxu1 %v8158_v44  ;;  %v7425_v51 = vld [vmem:[%s10191_s5 + $0x460] sm:$0x33]  ;;  %v7509_v44 = vcombine.high %v4872_v34, %v4876_v38 }
 0x245   : > { %4338 = vmatpush1.bf16.msra.mxu0 %v4320_v12  ;;  %4357 = vmatprep.mubr.bf16.mxu0 %v8232_v24  ;;  %v7429_v61 = vcombine.high %v7425_v51, %v7425_v51  ;;  %v7428_v63 = vcombine.low %v7425_v51, %v7425_v51  ;;  %v4855_v51 = vld [vmem:[%s10193_s7 + $0x140] sm:$0xff] }
 0x246   : > { %4339 = vmatprep.subr.bf16.mxu0 %v8161_v45 }
 0x247   : > { %4412 = vmatpush1.bf16.msra.mxu1 %v8156_v46  ;;  %v4608_v5 = vsel %vm1303_vm3, %v7428_v63, 0  ;;  %v4863_v46 = vld [vmem:[%s10193_s7 + $0x180] sm:$0xff] }
 0x248   : > { %7421 = vmatprep.subr.msk.bf16.mxu1 %vm1303_vm3, %v7420_v52  ;;  %v4864_v52 = vld [vmem:[%s10193_s7 + $0x188] sm:$0xff] }
 0x249   : > { %4340 = vmatpush1.bf16.msra.mxu0 %v8159_v49  ;;  %v7500_v20 = vcombine.low %v4864_v52, %v4868_v53 }
 0x24a   : > { %7404 = vmatmul.mubr.msk.bf16.vlgmr.msra.gmra.mxu1 %vm1299_vm5, %v4372_v1  ;;  %7412 = vmatprep.subr.msk.bf16.mxu0 %vm1303_vm3, %v7411_v50  ;;  %v7499_v50 = vcombine.high %v4863_v46, %v4867_v47 }
 0x24b   : > { %4554 = vmatpush1.bf16.msra.mxu1 %v4536_v43  ;;  %4573 = vmatprep.mubr.bf16.mxu1 %v8232_v24 }
 0x24c   : > { %7395 = vmatmul.mubr.msk.bf16.vlgmr.msra.gmra.mxu0 %vm1299_vm5, %v4300_v56  ;;  %4555 = vmatprep.subr.bf16.mxu1 %v8168_v55  ;;  %v7498_v55 = vcombine.low %v4863_v46, %v4867_v47  ;;  %v7501_v56 = vcombine.high %v4864_v52, %v4868_v53 }
 0x24d   : > { %4481 = vmatpush1.bf16.msra.mxu0 %v4463_v57  ;;  %4500 = vmatprep.mubr.bf16.mxu0 %v8232_v24 }
 0x24e   : > { %4482 = vmatprep.subr.bf16.mxu0 %v8171_v54 }
 0x24f   : > { %4556 = vmatpush1.bf16.msra.mxu1 %v8166_v58 }
 0x250   : > { %7439 = vmatprep.subr.msk.bf16.mxu1 %vm1303_vm3, %v7438_v31  ;;  %v4859_v31 = vld [vmem:[%s10193_s7 + $0x160] sm:$0xff] }
 0x251   : > { %4483 = vmatpush1.bf16.msra.mxu0 %v8169_v60  ;;  %v7491_v60 = vcombine.high %v4855_v51, %v4859_v31 }
 0x252   : > { %7422 = vmatmul.mubr.msk.bf16.vlgmr.msra.gmra.mxu1 %vm1299_vm5, %v4516_v2  ;;  %7430 = vmatprep.subr.msk.bf16.mxu0 %vm1303_vm3, %v7429_v61  ;;  %v4860_v61 = vld [vmem:[%s10193_s7 + $0x168] sm:$0xff] }
 0x253   : > { %4698 = vmatpush1.bf16.msra.mxu1 %v4680_v3  ;;  %4717 = vmatprep.mubr.bf16.mxu1 %v8232_v24  ;;  %v7490_v3 = vcombine.low %v4855_v51, %v4859_v31 }
 0x254   : > { %7413 = vmatmul.mubr.msk.bf16.vlgmr.msra.gmra.mxu0 %vm1299_vm5, %v8970_v13  ;;  %4699 = vmatprep.subr.bf16.mxu1 %v8178_v4  ;;  %v1261_v13 = vsel %vm1211_vm13, %v1184_v37, %v1236_v18  ;;  %v7492_v4 = vcombine.low %v4856_v59, %v4860_v61 }
 0x255   : > { %4626 = vmatpush1.bf16.msra.mxu0 %v4608_v5  ;;  %4645 = vmatprep.mubr.bf16.mxu0 %v8232_v24  ;;  %v1274_v11 = vpack.c.bf16 %v1261_v13, %v1261_v13  ;;  %v7493_v5 = vcombine.high %v4856_v59, %v4860_v61 }
 0x256   : > { %4627 = vmatprep.subr.bf16.mxu0 %v8181_v6 }
 0x257   : > { %4700 = vmatpush1.bf16.msra.mxu1 %v8176_v7 }
 0x259   : > { %4628 = vmatpush1.bf16.msra.mxu0 %v8179_v62  ;;  %v4847_v62 = vld [vmem:[%s10193_s7 + $0x100] sm:$0xff] }
 0x25a   : > { %7440 = vmatmul.mubr.msk.bf16.vlgmr.msra.gmra.mxu1 %vm1299_vm5, %v4660_v22  ;;  %7448 = vmatprep.subr.msk.bf16.mxu0 %vm1303_vm3, %v7447_v10  ;;  %v4851_v10 = vld [vmem:[%s10193_s7 + $0x120] sm:$0xff] }
 0x25c   : > { %7431 = vmatmul.mubr.msk.bf16.vlgmr.msra.gmra.mxu0 %vm1299_vm5, %v4588_v35  ;;  %v7483_v35 = vcombine.high %v4847_v62, %v4851_v10 }
 0x25d   : > { %4769 = vmatpush1.bf16.msra.mxu0 %v4751_v15  ;;  %4788 = vmatprep.mubr.bf16.mxu0 %v8232_v24  ;;  %v4871_v24 = vld [vmem:[%s10193_s7 + $0x1c0] sm:$0xff]  ;;  %v4852_v15 = vld [vmem:[%s10193_s7 + $0x128] sm:$0xff] }
 0x25e   : > { %4770 = vmatprep.subr.bf16.mxu0 %v8186_v17  ;;  %v7507_v36 = vcombine.high %v4871_v24, %v4875_v16  ;;  %v7506_v41 = vcombine.low %v4871_v24, %v4875_v16  ;;  %v7484_v13 = vcombine.low %v4848_v14, %v4852_v15 }
 0x260   : > { %5625 = vmatprep.subr.bf16.mxu1 %v7507_v36 }
 0x261   : > { %4771 = vmatpush1.bf16.msra.mxu0 %v8184_v8  ;;  %5626 = vmatpush1.bf16.msra.mxu1 %v7506_v41  ;;  %v7482_v8 = vcombine.low %v4847_v62, %v4851_v10  ;;  %v4832_v41 = vld [vmem:[%s10193_s7 + $0x88] sm:$0xff] }
 0x262   : > { %v1409_v19 = vpop.f32.mrf.mxu1  ;;  %5666 = vmatprep.subr.bf16.mxu0 %v7509_v44  ;;  %5627 = vmatprep.subr.bf16.mxu1 %v7499_v50 }
 0x264   : > { %v1344_v21 = vpop.f32.mrf.mxu0  ;;  %v1411_v23 = vpop.f32.mrf.mxu1  ;;  %7449 = vmatmul.mubr.msk.bf16.vlgmr.msra.gmra.mxu0 %vm1299_vm5, %v1274_v11  ;;  %v7485_v11 = vcombine.high %v4848_v14, %v4852_v15 }
 0x265   : > { %v1410_v25 = vadd.f32 %v1409_v19, %v1344_v21  ;;  %5667 = vmatpush1.bf16.msra.mxu0 %v7508_v42  ;;  %5628 = vmatpush1.bf16.msra.mxu1 %v7498_v55  ;;  %v4824_v55 = vld [vmem:[%s10193_s7 + $0x48] sm:$0xff] }
 0x266   : > { %v1346_v26 = vpop.f32.mrf.mxu0  ;;  %v1413_v27 = vpop.f32.mrf.mxu1  ;;  %5668 = vmatprep.subr.bf16.mxu0 %v7501_v56  ;;  %5629 = vmatprep.subr.bf16.mxu1 %v7491_v60  ;;  %v4828_v56 = vld [vmem:[%s10193_s7 + $0x68] sm:$0xff] }
 0x267   : > { %v1412_v28 = vadd.f32 %v1411_v23, %v1346_v26  ;;  %v4843_v26 = vld [vmem:[%s10193_s7 + $0xe0] sm:$0xff]  ;;  %v4840_v27 = vld [vmem:[%s10193_s7 + $0xc8] sm:$0xff]  ;;  %v7460_v51 = vcombine.low %v4824_v55, %v4828_v56  ;;  %v7461_v31 = vcombine.high %v4824_v55, %v4828_v56 }
 0x268   : > { %v1348_v29 = vpop.f32.mrf.mxu0  ;;  %v1414_v30 = vpop.f32.mrf.mxu1 }
 0x269   : > { %5669 = vmatpush1.bf16.msra.mxu0 %v7500_v20  ;;  %5630 = vmatpush1.bf16.msra.mxu1 %v7490_v3  ;;  %v4844_v29 = vld [vmem:[%s10193_s7 + $0xe8] sm:$0xff] }
 0x26a   : > { %v1349_v32 = vpop.f32.mrf.mxu0  ;;  %v1551_v33 = vpop.f32.mrf.mxu1  ;;  %5670 = vmatprep.subr.bf16.mxu0 %v7493_v5  ;;  %5631 = vmatprep.subr.bf16.mxu1 %v7483_v35  ;;  %v7476_v24 = vcombine.low %v4840_v27, %v4844_v29  ;;  %v7477_v16 = vcombine.high %v4840_v27, %v4844_v29  ;;  %v4816_v3 = vld [vmem:[%s10193_s7 + $0x8] sm:$0xff] }
 0x26c   : > { %v1479_v39 = vpop.f32.mrf.mxu0  ;;  %v1553_v40 = vpop.f32.mrf.mxu1 }
 0x26d   : > { %v1486_v0 = vadd.f32 %v1479_v39, %v1410_v25  ;;  %5671 = vmatpush1.bf16.msra.mxu0 %v7492_v4  ;;  %5632 = vmatpush1.bf16.msra.mxu1 %v7482_v8  ;;  %v4839_v25 = vld [vmem:[%s10193_s7 + $0xc0] sm:$0xff]  ;;  %v4936_v8 = vld [vmem:[%s10193_s7 + $0x3c8] sm:$0xff] }
 0x26e   : > { %v1481_v12 = vpop.f32.mrf.mxu0  ;;  %v1555_v45 = vpop.f32.mrf.mxu1  ;;  %5672 = vmatprep.subr.bf16.mxu0 %v7485_v11  ;;  %v4831_v39 = vld [vmem:[%s10193_s7 + $0x80] sm:$0xff]  ;;  %v4940_v11 = vld [vmem:[%s10193_s7 + $0x3e8] sm:$0xff] }
 0x26f   : > { %v1487_v48 = vadd.f32 %v1481_v12, %v1412_v28  ;;  %v1558_v49 = vadd.f32 %v1551_v33, %v1486_v0  ;;  %v7475_v28 = vcombine.high %v4839_v25, %v4843_v26  ;;  %v7474_v33 = vcombine.low %v4839_v25, %v4843_v26  ;;  %v4836_v12 = vld [vmem:[%s10193_s7 + $0xa8] sm:$0xff] }
 0x270   : > { %v1483_v1 = vpop.f32.mrf.mxu0  ;;  %v1556_v43 = vpop.f32.mrf.mxu1  ;;  %v7468_v52 = vcombine.low %v4832_v41, %v4836_v12  ;;  %v7572_v25 = vcombine.low %v4936_v8, %v4940_v11  ;;  %v7573_v26 = vcombine.high %v4936_v8, %v4940_v11 }
 0x271   : > { %v1559_v57 = vadd.f32 %v1553_v40, %v1487_v48  ;;  %5673 = vmatpush1.bf16.msra.mxu0 %v7484_v13  ;;  %5633 = vmatprep.subr.bf16.mxu1 %v7475_v28  ;;  %v4835_v40 = vld [vmem:[%s10193_s7 + $0xa0] sm:$0xff]  ;;  %v7469_v48 = vcombine.high %v4832_v41, %v4836_v12 }
 0x272   : > { %v1484_v54 = vpop.f32.mrf.mxu0  ;;  %v1695_v58 = vpop.f32.mrf.mxu1  ;;  %5674 = vmatprep.subr.bf16.mxu0 %v7477_v16  ;;  %5634 = vmatpush1.bf16.msra.mxu1 %v7474_v33  ;;  %v7467_v0 = vcombine.high %v4831_v39, %v4835_v40  ;;  %v7466_v47 = vcombine.low %v4831_v39, %v4835_v40  ;;  %v4823_v1 = vld [vmem:[%s10193_s7 + $0x40] sm:$0xff]  ;;  %v4928_v33 = vld [vmem:[%s10193_s7 + $0x388] sm:$0xff] }
 0x273   : > { %v4827_v43 = vld [vmem:[%s10193_s7 + $0x60] sm:$0xff] }
 0x274   : > { %v1622_v63 = vpop.f32.mrf.mxu0  ;;  %v1697_v2 = vpop.f32.mrf.mxu1  ;;  %5635 = vmatprep.subr.bf16.mxu1 %v7467_v0  ;;  %v7459_v20 = vcombine.high %v4823_v1, %v4827_v43 }
 0x275   : > { %v1629_v6 = vadd.f32 %v1622_v63, %v1558_v49  ;;  %5675 = vmatpush1.bf16.msra.mxu0 %v7476_v24  ;;  %v4815_v63 = vld [vmem:[%s10193_s7] sm:$0xff] }
 0x276   : > { %v1624_v7 = vpop.f32.mrf.mxu0  ;;  %v1699_v9 = vpop.f32.mrf.mxu1  ;;  %5676 = vmatprep.subr.bf16.mxu0 %v7469_v48  ;;  %5636 = vmatpush1.bf16.msra.mxu1 %v7466_v47  ;;  %v4920_v47 = vld [vmem:[%s10193_s7 + $0x348] sm:$0xff] }
 0x277   : > { %v1630_v37 = vadd.f32 %v1624_v7, %v1559_v57  ;;  %v1702_v22 = vadd.f32 %v1695_v58, %v1629_v6  ;;  %v7458_v58 = vcombine.low %v4823_v1, %v4827_v43  ;;  %5637 = vmatprep.subr.bf16.mxu1 %v7459_v20  ;;  %v4820_v7 = vld [vmem:[%s10193_s7 + $0x28] sm:$0xff] }
 0x278   : > { %v1626_v17 = vpop.f32.mrf.mxu0  ;;  %v1700_v18 = vpop.f32.mrf.mxu1  ;;  %v7452_v14 = vcombine.low %v4816_v3, %v4820_v7  ;;  %v4924_v48 = vld [vmem:[%s10193_s7 + $0x368] sm:$0xff] }
 0x279   : > { %v1703_v19 = vadd.f32 %v1697_v2, %v1630_v37  ;;  %5677 = vmatpush1.bf16.msra.mxu0 %v7468_v52  ;;  %v4819_v2 = vld [vmem:[%s10193_s7 + $0x20] sm:$0xff]  ;;  %v7453_v37 = vcombine.high %v4816_v3, %v4820_v7  ;;  %v7556_v1 = vcombine.low %v4920_v47, %v4924_v48  ;;  %v7557_v43 = vcombine.high %v4920_v47, %v4924_v48 }
 0x27a   : > { %v1627_v21 = vpop.f32.mrf.mxu0  ;;  %v1839_v23 = vpop.f32.mrf.mxu1  ;;  %5678 = vmatprep.subr.bf16.mxu0 %v7461_v31  ;;  %5638 = vmatpush1.bf16.msra.mxu1 %v7458_v58  ;;  %v7451_v6 = vcombine.high %v4815_v63, %v4819_v2  ;;  %v7450_v10 = vcombine.low %v4815_v63, %v4819_v2  ;;  %v4935_v17 = vld [vmem:[%s10193_s7 + $0x3c0] sm:$0xff]  ;;  %v4912_v58 = vld [vmem:[%s10193_s7 + $0x308] sm:$0xff] }
 0x27b   : > { %v4939_v18 = vld [vmem:[%s10193_s7 + $0x3e0] sm:$0xff] }
 0x27c   : > { %v1767_v30 = vpop.f32.mrf.mxu0  ;;  %v1841_v32 = vpop.f32.mrf.mxu1  ;;  %5639 = vmatprep.subr.bf16.mxu1 %v7451_v6  ;;  %v7571_v13 = vcombine.high %v4935_v17, %v4939_v18 }
 0x27d   : > { %v1774_v34 = vadd.f32 %v1767_v30, %v1702_v22  ;;  %5679 = vmatpush1.bf16.msra.mxu0 %v7460_v51  ;;  %v4927_v30 = vld [vmem:[%s10193_s7 + $0x380] sm:$0xff] }
 0x27e   : > { %v1769_v36 = vpop.f32.mrf.mxu0  ;;  %v1843_v38 = vpop.f32.mrf.mxu1  ;;  %5680 = vmatprep.subr.bf16.mxu0 %v7453_v37  ;;  %5640 = vmatpush1.bf16.msra.mxu1 %v7450_v10  ;;  %v4904_v10 = vld [vmem:[%s10193_s7 + $0x2c8] sm:$0xff] }
 0x27f   : > { %v1775_v42 = vadd.f32 %v1769_v36, %v1703_v19  ;;  %v1846_v44 = vadd.f32 %v1839_v23, %v1774_v34  ;;  %v7570_v23 = vcombine.low %v4935_v17, %v4939_v18  ;;  %5641 = vmatprep.subr.bf16.mxu1 %v7571_v13  ;;  %v4932_v36 = vld [vmem:[%s10193_s7 + $0x3a8] sm:$0xff] }
 0x280   : > { %v1771_v45 = vpop.f32.mrf.mxu0  ;;  %v1844_v46 = vpop.f32.mrf.mxu1  ;;  %v7564_v41 = vcombine.low %v4928_v33, %v4932_v36  ;;  %v4908_v37 = vld [vmem:[%s10193_s7 + $0x2e8] sm:$0xff] }
 0x281   : > { %v1847_v49 = vadd.f32 %v1841_v32, %v1775_v42  ;;  %5681 = vmatpush1.bf16.msra.mxu0 %v7452_v14  ;;  %v4931_v32 = vld [vmem:[%s10193_s7 + $0x3a0] sm:$0xff]  ;;  %v7565_v42 = vcombine.high %v4928_v33, %v4932_v36  ;;  %v7540_v17 = vcombine.low %v4904_v10, %v4908_v37  ;;  %v7541_v18 = vcombine.high %v4904_v10, %v4908_v37 }
 0x282   : > { %v1772_v50 = vpop.f32.mrf.mxu0  ;;  %v1983_v53 = vpop.f32.mrf.mxu1  ;;  %5682 = vmatprep.subr.bf16.mxu0 %v7573_v26  ;;  %5642 = vmatpush2.bf16.msra.mxu1 %v7570_v23  ;;  %v7563_v34 = vcombine.high %v4927_v30, %v4931_v32  ;;  %v7562_v40 = vcombine.low %v4927_v30, %v4931_v32  ;;  %v4919_v45 = vld [vmem:[%s10193_s7 + $0x340] sm:$0xff]  ;;  %v4896_v23 = vld [vmem:[%s10193_s7 + $0x288] sm:$0xff] }
 0x283   : > { %v4923_v46 = vld [vmem:[%s10193_s7 + $0x360] sm:$0xff] }
 0x284   : > { %v1910_v57 = vpop.f32.mrf.mxu0  ;;  %v1985_v54 = vpop.f32.mrf.mxu1  ;;  %5643 = vmatprep.subr.bf16.mxu1 %v7563_v34  ;;  %v7555_v52 = vcombine.high %v4919_v45, %v4923_v46 }
 0x285   : > { %v1917_v59 = vadd.f32 %v1910_v57, %v1846_v44  ;;  %5683 = vmatpush2.bf16.msra.mxu0 %v7572_v25  ;;  %v4911_v57 = vld [vmem:[%s10193_s7 + $0x300] sm:$0xff] }
 0x286   : > { %v1912_v60 = vpop.f32.mrf.mxu0  ;;  %v1987_v61 = vpop.f32.mrf.mxu1  ;;  %5684 = vmatprep.subr.bf16.mxu0 %v7565_v42  ;;  %5644 = vmatpush2.bf16.msra.mxu1 %v7562_v40  ;;  %v4888_v40 = vld [vmem:[%s10193_s7 + $0x248] sm:$0xff] }
 0x287   : > { %v1918_v4 = vadd.f32 %v1912_v60, %v1847_v49  ;;  %v1990_v5 = vadd.f32 %v1983_v53, %v1917_v59  ;;  %v7554_v53 = vcombine.low %v4919_v45, %v4923_v46  ;;  %5645 = vmatprep.subr.bf16.mxu1 %v7555_v52  ;;  %v4916_v60 = vld [vmem:[%s10193_s7 + $0x328] sm:$0xff] }
 0x288   : > { %v1914_v9 = vpop.f32.mrf.mxu0  ;;  %v1988_v62 = vpop.f32.mrf.mxu1  ;;  %v7548_v3 = vcombine.low %v4912_v58, %v4916_v60  ;;  %v4892_v42 = vld [vmem:[%s10193_s7 + $0x268] sm:$0xff] }
 0x289   : > { %v1991_v22 = vadd.f32 %v1985_v54, %v1918_v4  ;;  %5685 = vmatpush2.bf16.msra.mxu0 %v7564_v41  ;;  %v4915_v54 = vld [vmem:[%s10193_s7 + $0x320] sm:$0xff]  ;;  %v7549_v4 = vcombine.high %v4912_v58, %v4916_v60  ;;  %v7524_v45 = vcombine.low %v4888_v40, %v4892_v42  ;;  %v7525_v46 = vcombine.high %v4888_v40, %v4892_v42 }
 0x28a   : > { %v1915_v35 = vpop.f32.mrf.mxu0  ;;  %v2127_v15 = vpop.f32.mrf.mxu1  ;;  %5686 = vmatprep.subr.bf16.mxu0 %v7557_v43  ;;  %5646 = vmatpush2.bf16.msra.mxu1 %v7554_v53  ;;  %v7547_v59 = vcombine.high %v4911_v57, %v4915_v54  ;;  %v7546_v2 = vcombine.low %v4911_v57, %v4915_v54  ;;  %v4903_v9 = vld [vmem:[%s10193_s7 + $0x2c0] sm:$0xff]  ;;  %v4880_v53 = vld [vmem:[%s10193_s7 + $0x208] sm:$0xff] }
 0x28b   : > { %v4907_v62 = vld [vmem:[%s10193_s7 + $0x2e0] sm:$0xff] }
 0x28c   : > { %v2055_v19 = vpop.f32.mrf.mxu0  ;;  %v2129_v21 = vpop.f32.mrf.mxu1  ;;  %5647 = vmatprep.subr.bf16.mxu1 %v7547_v59  ;;  %v7539_v14 = vcombine.high %v4903_v9, %v4907_v62 }
 0x28d   : > { %v2062_v27 = vadd.f32 %v2055_v19, %v1990_v5  ;;  %5687 = vmatpush2.bf16.msra.mxu0 %v7556_v1  ;;  %v4895_v19 = vld [vmem:[%s10193_s7 + $0x280] sm:$0xff] }
 0x28e   : > { %v2057_v28 = vpop.f32.mrf.mxu0  ;;  %v2131_v29 = vpop.f32.mrf.mxu1  ;;  %5688 = vmatprep.subr.bf16.mxu0 %v7549_v4  ;;  %5648 = vmatpush2.bf16.msra.mxu1 %v7546_v2  ;;  %v9527_v2 = vld [vmem:[%s10193_s7 + $0x1d8] sm:$0xff] }
 0x28f   : > { %v2063_v24 = vadd.f32 %v2057_v28, %v1991_v22  ;;  %v2134_v16 = vadd.f32 %v2127_v15, %v2062_v27  ;;  %v7538_v15 = vcombine.low %v4903_v9, %v4907_v62  ;;  %5649 = vmatprep.subr.bf16.mxu1 %v7539_v14  ;;  %v4900_v28 = vld [vmem:[%s10193_s7 + $0x2a8] sm:$0xff]  ;;  %v9534_v4 = vld [vmem:[%s10193_s7 + $0x1f8] sm:$0xff] }
 0x290   : > { %v2059_v38 = vpop.f32.mrf.mxu0  ;;  %v2132_v39 = vpop.f32.mrf.mxu1  ;;  %v7532_v33 = vcombine.low %v4896_v23, %v4900_v28  ;;  %v7512_v9 = vcombine.low %v9527_v2, %v9534_v4  ;;  %v7513_v62 = vcombine.high %v9527_v2, %v9534_v4  ;;  %v4854_v2 = vld [vmem:[%s10193_s7 + $0x138] sm:$0xff] }
 0x291   : > { %v2135_v44 = vadd.f32 %v2129_v21, %v2063_v24  ;;  %5689 = vmatpush2.bf16.msra.mxu0 %v7548_v3  ;;  %v4899_v21 = vld [vmem:[%s10193_s7 + $0x2a0] sm:$0xff]  ;;  %v7533_v24 = vcombine.high %v4896_v23, %v4900_v28 }
 0x292   : > { %v2060_v0 = vpop.f32.mrf.mxu0  ;;  %v2271_v12 = vpop.f32.mrf.mxu1  ;;  %5690 = vmatprep.subr.bf16.mxu0 %v7541_v18  ;;  %5650 = vmatpush2.bf16.msra.mxu1 %v7538_v15  ;;  %v7531_v27 = vcombine.high %v4895_v19, %v4899_v21  ;;  %v7530_v32 = vcombine.low %v4895_v19, %v4899_v21  ;;  %v4887_v38 = vld [vmem:[%s10193_s7 + $0x240] sm:$0xff] }
 0x293   : > { %v4891_v39 = vld [vmem:[%s10193_s7 + $0x260] sm:$0xff] }
 0x294   : > { %v2198_v49 = vpop.f32.mrf.mxu0  ;;  %v2273_v50 = vpop.f32.mrf.mxu1  ;;  %5651 = vmatprep.subr.bf16.mxu1 %v7531_v27  ;;  %v7523_v41 = vcombine.high %v4887_v38, %v4891_v39 }
 0x295   : > { %v2205_v55 = vadd.f32 %v2198_v49, %v2134_v16  ;;  %5691 = vmatpush2.bf16.msra.mxu0 %v7540_v17  ;;  %v4879_v49 = vld [vmem:[%s10193_s7 + $0x200] sm:$0xff] }
 0x296   : > { %v2200_v20 = vpop.f32.mrf.mxu0  ;;  %v2275_v56 = vpop.f32.mrf.mxu1  ;;  %5692 = vmatprep.subr.bf16.mxu0 %v7533_v24  ;;  %5652 = vmatpush2.bf16.msra.mxu1 %v7530_v32 }
 0x297   : > { %v2206_v51 = vadd.f32 %v2200_v20, %v2135_v44  ;;  %v2278_v31 = vadd.f32 %v2271_v12, %v2205_v55  ;;  %v7522_v12 = vcombine.low %v4887_v38, %v4891_v39  ;;  %5653 = vmatprep.subr.bf16.mxu1 %v7523_v41  ;;  %v4884_v20 = vld [vmem:[%s10193_s7 + $0x228] sm:$0xff] }
 0x298   : > { %v2202_v61 = vpop.f32.mrf.mxu0  ;;  %v2276_v63 = vpop.f32.mrf.mxu1  ;;  %v7516_v58 = vcombine.low %v4880_v53, %v4884_v20 }
 0x299   : > { %v2279_v5 = vadd.f32 %v2273_v50, %v2206_v51  ;;  %5693 = vmatpush2.bf16.msra.mxu0 %v7532_v33  ;;  %v4883_v50 = vld [vmem:[%s10193_s7 + $0x220] sm:$0xff]  ;;  %v7517_v51 = vcombine.high %v4880_v53, %v4884_v20  ;;  %v9517_v61 = vld [vmem:[%s10193_s7 + $0x1d0] sm:$0xff] }
 0x29a   : > { %v2203_v6 = vpop.f32.mrf.mxu0  ;;  %v2415_v7 = vpop.f32.mrf.mxu1  ;;  %5694 = vmatprep.subr.bf16.mxu0 %v7525_v46  ;;  %5654 = vmatpush2.bf16.msra.mxu1 %v7522_v12  ;;  %v7515_v55 = vcombine.high %v4879_v49, %v4883_v50  ;;  %v7514_v54 = vcombine.low %v4879_v49, %v4883_v50  ;;  %v9522_v63 = vld [vmem:[%s10193_s7 + $0x1f0] sm:$0xff] }
 0x29b   : > { %v7511_v3 = vcombine.high %v9517_v61, %v9522_v63 }
 0x29c   : > { %v2343_v22 = vpop.f32.mrf.mxu0  ;;  %v2417_v35 = vpop.f32.mrf.mxu1  ;;  %5655 = vmatprep.subr.bf16.mxu1 %v7515_v55 }
 0x29d   : > { %v2350_v8 = vadd.f32 %v2343_v22, %v2278_v31  ;;  %5695 = vmatpush2.bf16.msra.mxu0 %v7524_v45 }
 0x29e   : > { %v2345_v13 = vpop.f32.mrf.mxu0  ;;  %v2419_v11 = vpop.f32.mrf.mxu1  ;;  %5696 = vmatprep.subr.bf16.mxu0 %v7517_v51  ;;  %5656 = vmatpush2.bf16.msra.mxu1 %v7514_v54 }
 0x29f   : > { %v2351_v25 = vadd.f32 %v2345_v13, %v2279_v5  ;;  %v2422_v26 = vadd.f32 %v2415_v7, %v2350_v8  ;;  %v7510_v7 = vcombine.low %v9517_v61, %v9522_v63  ;;  %5707 = vmatprep.subr.bf16.mxu1 %v7511_v3  ;;  %v4853_v61 = vld [vmem:[%s10193_s7 + $0x130] sm:$0xff]  ;;  %v4850_v63 = vld [vmem:[%s10193_s7 + $0x118] sm:$0xff] }
 0x2a0   : > { %v2347_v29 = vpop.f32.mrf.mxu0  ;;  %v2420_v30 = vpop.f32.mrf.mxu1 }
 0x2a1   : > { %v2423_v16 = vadd.f32 %v2417_v35, %v2351_v25  ;;  %5697 = vmatpush2.bf16.msra.mxu0 %v7516_v58 }
 0x2a2   : > { %v2348_v34 = vpop.f32.mrf.mxu0  ;;  %v2559_v36 = vpop.f32.mrf.mxu1  ;;  %5748 = vmatprep.subr.bf16.mxu0 %v7513_v62 }
 0x2a4   : > { %v2486_v44 = vpop.f32.mrf.mxu0  ;;  %v2561_v0 = vpop.f32.mrf.mxu1 }
 0x2a5   : > { %v2493_v47 = vadd.f32 %v2486_v44, %v2422_v26 }
 0x2a6   : > { %v2488_v52 = vpop.f32.mrf.mxu0  ;;  %v2563_v48 = vpop.f32.mrf.mxu1 }
 0x2a7   : > { %v2494_v1 = vadd.f32 %v2488_v52, %v2423_v16  ;;  %v2566_v43 = vadd.f32 %v2559_v36, %v2493_v47 }
 0x2a8   : > { %v2490_v56 = vpop.f32.mrf.mxu0  ;;  %v2564_v57 = vpop.f32.mrf.mxu1 }
 0x2a9   : > { %v2567_v31 = vadd.f32 %v2561_v0, %v2494_v1 }
 0x2aa   : > { %v2491_v59 = vpop.f32.mrf.mxu0  ;;  %v2703_v60 = vpop.f32.mrf.mxu1 }
 0x2ac   : > { %v2631_v5 = vpop.f32.mrf.mxu0  ;;  %v2705_v6 = vpop.f32.mrf.mxu1 }
 0x2ad   : > { %v2638_v10 = vadd.f32 %v2631_v5, %v2566_v43 }
 0x2ae   : > { %v2633_v14 = vpop.f32.mrf.mxu0  ;;  %v2707_v37 = vpop.f32.mrf.mxu1 }
 0x2af   : > { %v2639_v22 = vadd.f32 %v2633_v14, %v2567_v31  ;;  %v2710_v35 = vadd.f32 %v2703_v60, %v2638_v10 }
 0x2b0   : > { %v2635_v15 = vpop.f32.mrf.mxu0  ;;  %v2708_v17 = vpop.f32.mrf.mxu1 }
 0x2b1   : > { %v2711_v18 = vadd.f32 %v2705_v6, %v2639_v22 }
 0x2b2   : > { %v2636_v8 = vpop.f32.mrf.mxu0  ;;  %v2847_v13 = vpop.f32.mrf.mxu1 }
 0x2b4   : > { %v2774_v11 = vpop.f32.mrf.mxu0  ;;  %v2849_v19 = vpop.f32.mrf.mxu1 }
 0x2b5   : > { %v2781_v50 = vadd.f32 %v2774_v11, %v2710_v35 }
 0x2b6   : > { %v2776_v21 = vpop.f32.mrf.mxu0  ;;  %v2851_v23 = vpop.f32.mrf.mxu1 }
 0x2b7   : > { %v2782_v43 = vadd.f32 %v2776_v21, %v2711_v18  ;;  %v2854_v56 = vadd.f32 %v2847_v13, %v2781_v50 }
 0x2b8   : > { %v2778_v25 = vpop.f32.mrf.mxu0  ;;  %v2852_v26 = vpop.f32.mrf.mxu1 }
 0x2b9   : > { %v2855_v51 = vadd.f32 %v2849_v19, %v2782_v43 }
 0x2ba   : > { %v2779_v27 = vpop.f32.mrf.mxu0  ;;  %v2991_v28 = vpop.f32.mrf.mxu1 }
 0x2bc   : > { %v2919_v29 = vpop.f32.mrf.mxu0  ;;  %v2993_v30 = vpop.f32.mrf.mxu1 }
 0x2bd   : > { %v2926_v58 = vadd.f32 %v2919_v29, %v2854_v56 }
 0x2be   : > { %v2921_v32 = vpop.f32.mrf.mxu0  ;;  %v2995_v33 = vpop.f32.mrf.mxu1 }
 0x2bf   : > { %v2927_v60 = vadd.f32 %v2921_v32, %v2855_v51  ;;  %v2998_v6 = vadd.f32 %v2991_v28, %v2926_v58 }
 0x2c0   : > { %v2923_v24 = vpop.f32.mrf.mxu0  ;;  %v2996_v16 = vpop.f32.mrf.mxu1 }
 0x2c1   : > { %v2999_v37 = vadd.f32 %v2993_v30, %v2927_v60 }
 0x2c2   : > { %v2924_v34 = vpop.f32.mrf.mxu0  ;;  %v3135_v36 = vpop.f32.mrf.mxu1 }
 0x2c4   : > { %v3062_v38 = vpop.f32.mrf.mxu0  ;;  %v3137_v39 = vpop.f32.mrf.mxu1 }
 0x2c5   : > { %v3069_v14 = vadd.f32 %v3062_v38, %v2998_v6 }
 0x2c6   : > { %v3064_v40 = vpop.f32.mrf.mxu0  ;;  %v3139_v41 = vpop.f32.mrf.mxu1 }
 0x2c7   : > { %v3070_v15 = vadd.f32 %v3064_v40, %v2999_v37  ;;  %v3142_v8 = vadd.f32 %v3135_v36, %v3069_v14 }
 0x2c8   : > { %v3066_v42 = vpop.f32.mrf.mxu0  ;;  %v3140_v44 = vpop.f32.mrf.mxu1 }
 0x2c9   : > { %v3143_v19 = vadd.f32 %v3137_v39, %v3070_v15 }
 0x2ca   : > { %v3067_v0 = vpop.f32.mrf.mxu0  ;;  %v3279_v12 = vpop.f32.mrf.mxu1 }
 0x2cc   : > { %v3207_v45 = vpop.f32.mrf.mxu0  ;;  %v3281_v46 = vpop.f32.mrf.mxu1 }
 0x2cd   : > { %v3214_v21 = vadd.f32 %v3207_v45, %v3142_v8 }
 0x2ce   : > { %v3209_v47 = vpop.f32.mrf.mxu0  ;;  %v3283_v52 = vpop.f32.mrf.mxu1 }
 0x2cf   : > { %v3215_v26 = vadd.f32 %v3209_v47, %v3143_v19  ;;  %v3286_v28 = vadd.f32 %v3279_v12, %v3214_v21 }
 0x2d0   : > { %v3211_v48 = vpop.f32.mrf.mxu0  ;;  %v3284_v49 = vpop.f32.mrf.mxu1 }
 0x2d1   : > { %v3287_v30 = vadd.f32 %v3281_v46, %v3215_v26 }
 0x2d2   : > { %v3212_v53 = vpop.f32.mrf.mxu0  ;;  %v3423_v1 = vpop.f32.mrf.mxu1 }
 0x2d4   : > { %v3350_v55 = vpop.f32.mrf.mxu0  ;;  %v3425_v20 = vpop.f32.mrf.mxu1 }
 0x2d5   : > { %v3357_v24 = vadd.f32 %v3350_v55, %v3286_v28 }
 0x2d6   : > { %v3352_v57 = vpop.f32.mrf.mxu0  ;;  %v3427_v54 = vpop.f32.mrf.mxu1 }
 0x2d7   : > { %v3358_v38 = vadd.f32 %v3352_v57, %v3287_v30  ;;  %v3430_v36 = vadd.f32 %v3423_v1, %v3357_v24 }
 0x2d8   : > { %v3354_v31 = vpop.f32.mrf.mxu0  ;;  %v3428_v59 = vpop.f32.mrf.mxu1 }
 0x2d9   : > { %v3431_v39 = vadd.f32 %v3425_v20, %v3358_v38 }
 0x2da   : > { %v3355_v3 = vpop.f32.mrf.mxu0  ;;  %v3567_v5 = vpop.f32.mrf.mxu1 }
 0x2dc   : > { %v3495_v62 = vpop.f32.mrf.mxu0  ;;  %v3569_v10 = vpop.f32.mrf.mxu1 }
 0x2dd   : > { %v3502_v0 = vadd.f32 %v3495_v62, %v3430_v36 }
 0x2de   : > { %v3497_v22 = vpop.f32.mrf.mxu0  ;;  %v3571_v35 = vpop.f32.mrf.mxu1 }
 0x2df   : > { %v3503_v47 = vadd.f32 %v3497_v22, %v3431_v39  ;;  %v3574_v12 = vadd.f32 %v3567_v5, %v3502_v0 }
 0x2e0   : > { %v3499_v17 = vpop.f32.mrf.mxu0  ;;  %v3572_v18 = vpop.f32.mrf.mxu1 }
 0x2e1   : > { %v3575_v46 = vadd.f32 %v3569_v10, %v3503_v47 }
 0x2e2   : > { %v3500_v13 = vpop.f32.mrf.mxu0  ;;  %v3711_v11 = vpop.f32.mrf.mxu1 }
 0x2e4   : > { %v3638_v23 = vpop.f32.mrf.mxu0  ;;  %v3713_v25 = vpop.f32.mrf.mxu1 }
 0x2e5   : > { %v3645_v43 = vadd.f32 %v3638_v23, %v3574_v12 }
 0x2e6   : > { %v3640_v27 = vpop.f32.mrf.mxu0  ;;  %v3715_v29 = vpop.f32.mrf.mxu1 }
 0x2e7   : > { %v3646_v57 = vadd.f32 %v3640_v27, %v3575_v46  ;;  %v3718_v1 = vadd.f32 %v3711_v11, %v3645_v43 }
 0x2e8   : > { %v3642_v32 = vpop.f32.mrf.mxu0  ;;  %v3716_v33 = vpop.f32.mrf.mxu1 }
 0x2e9   : > { %v3719_v20 = vadd.f32 %v3713_v25, %v3646_v57 }
 0x2ea   : > { %v3643_v16 = vpop.f32.mrf.mxu0  ;;  %v3855_v34 = vpop.f32.mrf.mxu1 }
 0x2ec   : > { %v3783_v40 = vpop.f32.mrf.mxu0  ;;  %v3857_v41 = vpop.f32.mrf.mxu1 }
 0x2ed   : > { %v3790_v59 = vadd.f32 %v3783_v40, %v3718_v1 }
 0x2ee   : > { %v3785_v42 = vpop.f32.mrf.mxu0  ;;  %v3859_v44 = vpop.f32.mrf.mxu1 }
 0x2ef   : > { %v3791_v6 = vadd.f32 %v3785_v42, %v3719_v20  ;;  %v3862_v5 = vadd.f32 %v3855_v34, %v3790_v59 }
 0x2f0   : > { %v3787_v45 = vpop.f32.mrf.mxu0  ;;  %v3860_v52 = vpop.f32.mrf.mxu1 }
 0x2f1   : > { %v3863_v10 = vadd.f32 %v3857_v41, %v3791_v6 }
 0x2f2   : > { %v3788_v48 = vpop.f32.mrf.mxu0  ;;  %v3999_v49 = vpop.f32.mrf.mxu1 }
 0x2f4   : > { %v3926_v50 = vpop.f32.mrf.mxu0  ;;  %v4001_v53 = vpop.f32.mrf.mxu1 }
 0x2f5   : > { %v3933_v35 = vadd.f32 %v3926_v50, %v3862_v5 }
 0x2f6   : > { %v3928_v55 = vpop.f32.mrf.mxu0  ;;  %v4003_v56 = vpop.f32.mrf.mxu1 }
 0x2f7   : > { %v3934_v18 = vadd.f32 %v3928_v55, %v3863_v10  ;;  %v4006_v11 = vadd.f32 %v3999_v49, %v3933_v35  ;;  %v4801_v55 = vlaneseq  ;;  %v4799_v35 = vld [vmem:[%s10192_s6] sm:$0x3] }
 0x2f8   : > { %v3930_v54 = vpop.f32.mrf.mxu0  ;;  %v4004_v58 = vpop.f32.mrf.mxu1 }
 0x2f9   : > { %v4007_v25 = vadd.f32 %v4001_v53, %v3934_v18  ;;  %v9542_v59 = vshrl.u32 %v4801_v55, 7 }
 0x2fa   : > { %v3931_v51 = vpop.f32.mrf.mxu0  ;;  %v4143_v31 = vpop.f32.mrf.mxu1 }
 0x2fb   : > { %v4807_v10 = vsub.s32 1, %v9542_v59 }
 0x2fc   : > { %v4071_v60 = vpop.f32.mrf.mxu0  ;;  %v4145_v3 = vpop.f32.mrf.mxu1 }
 0x2fd   : > { %v4078_v23 = vadd.f32 %v4071_v60, %v4006_v11 }
 0x2fe   : > { %v4073_v62 = vpop.f32.mrf.mxu0  ;;  %v4147_v14 = vpop.f32.mrf.mxu1 }
 0x2ff   : > { %v4079_v29 = vadd.f32 %v4073_v62, %v4007_v25  ;;  %v4150_v33 = vadd.f32 %v4143_v31, %v4078_v23 }
 0x300   : > { %v4075_v37 = vpop.f32.mrf.mxu0  ;;  %v4148_v22 = vpop.f32.mrf.mxu1 }
 0x301   : > { %v4151_v34 = vadd.f32 %v4145_v3, %v4079_v29  ;;  %v4803_v37 = vsub.s32 0, %v9542_v59  ;;  %v4865_v29 = vld [vmem:[%s10193_s7 + $0x190] sm:$0xff] }
 0x302   : > { %v4076_v15 = vpop.f32.mrf.mxu0  ;;  %v4287_v17 = vpop.f32.mrf.mxu1 }
 0x304   : > { %v4214_v8 = vpop.f32.mrf.mxu0  ;;  %v4289_v13 = vpop.f32.mrf.mxu1 }
 0x305   : > { %v4221_v16 = vadd.f32 %v4214_v8, %v4150_v33  ;;  %v4804_v8 = vrot.slane %v4799_v35, %v4803_v37  ;;  %v4866_v33 = vld [vmem:[%s10193_s7 + $0x198] sm:$0xff] }
 0x306   : > { %v4216_v21 = vpop.f32.mrf.mxu0  ;;  %v4291_v19 = vpop.f32.mrf.mxu1 }
 0x307   : > { %v4222_v41 = vadd.f32 %v4216_v21, %v4151_v34  ;;  %v4294_v44 = vadd.f32 %v4287_v17, %v4221_v16  ;;  %v4808_v21 = vrot.slane %v4799_v35, %v4807_v10  ;;  %v4857_v34 = vld [vmem:[%s10193_s7 + $0x150] sm:$0xff] }
 0x308   : > { %v4218_v26 = vpop.f32.mrf.mxu0  ;;  %v4292_v27 = vpop.f32.mrf.mxu1 }
 0x309   : > { %v4295_v52 = vadd.f32 %v4289_v13, %v4222_v41  ;;  %v4861_v41 = vld [vmem:[%s10193_s7 + $0x170] sm:$0xff] }
 0x30a   : > { %v4219_v28 = vpop.f32.mrf.mxu0  ;;  %v4431_v32 = vpop.f32.mrf.mxu1  ;;  %v7494_v4 = vcombine.low %v4857_v34, %v4861_v41 }
 0x30c   : > { %v4359_v24 = vpop.f32.mrf.mxu0  ;;  %v4433_v30 = vpop.f32.mrf.mxu1 }
 0x30d   : > { %v4366_v45 = vadd.f32 %v4359_v24, %v4294_v44  ;;  %v4870_v24 = vld [vmem:[%s10193_s7 + $0x1b8] sm:$0xff] }
 0x30e   : > { %v4361_v38 = vpop.f32.mrf.mxu0  ;;  %v4435_v40 = vpop.f32.mrf.mxu1 }
 0x30f   : > { %v4367_v49 = vadd.f32 %v4361_v38, %v4295_v52  ;;  %v4438_v53 = vadd.f32 %v4431_v32, %v4366_v45  ;;  %v4869_v32 = vld [vmem:[%s10193_s7 + $0x1b0] sm:$0xff]  ;;  %v7505_v40 = vcombine.high %v4866_v33, %v4870_v24 }
 0x310   : > { %v4363_v36 = vpop.f32.mrf.mxu0  ;;  %v4436_v42 = vpop.f32.mrf.mxu1  ;;  %v7503_v38 = vcombine.high %v4865_v29, %v4869_v32  ;;  %v7502_v44 = vcombine.low %v4865_v29, %v4869_v32  ;;  %v4849_v52 = vld [vmem:[%s10193_s7 + $0x110] sm:$0xff] }
 0x311   : > { %v4439_v57 = vadd.f32 %v4433_v30, %v4367_v49  ;;  %v4858_v36 = vld [vmem:[%s10193_s7 + $0x158] sm:$0xff]  ;;  %v4845_v49 = vld [vmem:[%s10193_s7 + $0xf0] sm:$0xff] }
 0x312   : > { %v4364_v0 = vpop.f32.mrf.mxu0  ;;  %v4575_v39 = vpop.f32.mrf.mxu1  ;;  %v4862_v42 = vld [vmem:[%s10193_s7 + $0x178] sm:$0xff] }
 0x313   : > { %v7504_v0 = vcombine.low %v4866_v33, %v4870_v24  ;;  %v7497_v45 = vcombine.high %v4858_v36, %v4862_v42  ;;  %v4929_v24 = vld [vmem:[%s10193_s7 + $0x390] sm:$0xff] }
 0x314   : > { %v4502_v47 = vpop.f32.mrf.mxu0  ;;  %v4577_v48 = vpop.f32.mrf.mxu1 }
 0x315   : > { %v4509_v56 = vadd.f32 %v4502_v47, %v4438_v53  ;;  %v7489_v47 = vcombine.high %v4850_v63, %v4854_v2  ;;  %v7486_v53 = vcombine.low %v4849_v52, %v4853_v61 }
 0x316   : > { %v4504_v12 = vpop.f32.mrf.mxu0  ;;  %v4579_v50 = vpop.f32.mrf.mxu1 }
 0x317   : > { %v4510_v1 = vadd.f32 %v4504_v12, %v4439_v57  ;;  %v4582_v20 = vadd.f32 %v4575_v39, %v4509_v56  ;;  %v7495_v39 = vcombine.high %v4857_v34, %v4861_v41  ;;  %v4842_v12 = vld [vmem:[%s10193_s7 + $0xd8] sm:$0xff]  ;;  %v4833_v56 = vld [vmem:[%s10193_s7 + $0x90] sm:$0xff] }
 0x318   : > { %v4506_v43 = vpop.f32.mrf.mxu0  ;;  %v4580_v46 = vpop.f32.mrf.mxu1  ;;  %v4846_v50 = vld [vmem:[%s10193_s7 + $0xf8] sm:$0xff]  ;;  %v4837_v57 = vld [vmem:[%s10193_s7 + $0xb0] sm:$0xff] }
 0x319   : > { %v4583_v62 = vadd.f32 %v4577_v48, %v4510_v1  ;;  %v4841_v48 = vld [vmem:[%s10193_s7 + $0xd0] sm:$0xff]  ;;  %v7488_v43 = vcombine.low %v4850_v63, %v4854_v2  ;;  %v7481_v55 = vcombine.high %v4842_v12, %v4846_v50  ;;  %v4930_v34 = vld [vmem:[%s10193_s7 + $0x398] sm:$0xff] }
 0x31a   : > { %v4507_v54 = vpop.f32.mrf.mxu0  ;;  %v4719_v58 = vpop.f32.mrf.mxu1  ;;  %v7479_v46 = vcombine.high %v4841_v48, %v4845_v49  ;;  %v7478_v1 = vcombine.low %v4841_v48, %v4845_v49 }
 0x31b   : > { %v4834_v54 = vld [vmem:[%s10193_s7 + $0x98] sm:$0xff] }
 0x31c   : > { %v4647_v51 = vpop.f32.mrf.mxu0  ;;  %v4721_v31 = vpop.f32.mrf.mxu1 }
 0x31d   : > { %v4654_v6 = vadd.f32 %v4647_v51, %v4582_v20  ;;  %v7480_v51 = vcombine.low %v4842_v12, %v4846_v50 }
 0x31e   : > { %v4649_v60 = vpop.f32.mrf.mxu0  ;;  %v4723_v3 = vpop.f32.mrf.mxu1 }
 0x31f   : > { %v4655_v22 = vadd.f32 %v4649_v60, %v4583_v62  ;;  %v4726_v17 = vadd.f32 %v4719_v58, %v4654_v6  ;;  %v4838_v58 = vld [vmem:[%s10193_s7 + $0xb8] sm:$0xff]  ;;  %v4825_v60 = vld [vmem:[%s10193_s7 + $0x50] sm:$0xff] }
 0x320   : > { %v4651_v14 = vpop.f32.mrf.mxu0  ;;  %v4724_v5 = vpop.f32.mrf.mxu1  ;;  %v7473_v20 = vcombine.high %v4834_v54, %v4838_v58  ;;  %v4829_v3 = vld [vmem:[%s10193_s7 + $0x70] sm:$0xff]  ;;  %v4826_v6 = vld [vmem:[%s10193_s7 + $0x58] sm:$0xff] }
 0x321   : > { %v4727_v11 = vadd.f32 %v4721_v31, %v4655_v22  ;;  %v7471_v31 = vcombine.high %v4833_v56, %v4837_v57  ;;  %v4830_v62 = vld [vmem:[%s10193_s7 + $0x78] sm:$0xff]  ;;  %v7470_v14 = vcombine.low %v4833_v56, %v4837_v57  ;;  %v7472_v5 = vcombine.low %v4834_v54, %v4838_v58 }
 0x322   : > { %v4652_v15 = vpop.f32.mrf.mxu0  ;;  %v7463_v22 = vcombine.high %v4825_v60, %v4829_v3  ;;  %v7465_v35 = vcombine.high %v4826_v6, %v4830_v62 }
 0x323   : > { %v4817_v15 = vld [vmem:[%s10193_s7 + $0x10] sm:$0xff] }
 0x324   : > { %v4790_v18 = vpop.f32.mrf.mxu0 }
 0x325   : > { %v4797_v13 = vadd.f32 %v4790_v18, %v4726_v17  ;;  %v4821_v17 = vld [vmem:[%s10193_s7 + $0x30] sm:$0xff]  ;;  %v4818_v18 = vld [vmem:[%s10193_s7 + $0x18] sm:$0xff] }
 0x326   : > { %v4792_v19 = vpop.f32.mrf.mxu0  ;;  %v7454_v29 = vcombine.low %v4817_v15, %v4821_v17 }
 0x327   : > { %v4798_v23 = vadd.f32 %v4792_v19, %v4727_v11  ;;  %v4811_v25 = vadd.f32 %v4804_v8, %v4797_v13  ;;  %v4822_v8 = vld [vmem:[%s10193_s7 + $0x38] sm:$0xff]  ;;  %v7462_v13 = vcombine.low %v4825_v60, %v4829_v3  ;;  %v7464_v11 = vcombine.low %v4826_v6, %v4830_v62 }
 0x328   : > { %v4794_v26 = vpop.f32.mrf.mxu0  ;;  %v7457_v19 = vcombine.high %v4818_v18, %v4822_v8 }
 0x329   : > { %v4812_v27 = vadd.f32 %v4808_v21, %v4798_v23  ;;  %v9565_v16 = vpack.c.bf16 %v4811_v25, %v4811_v25  ;;  %v7455_v21 = vcombine.high %v4817_v15, %v4821_v17  ;;  %v4937_v23 = vld [vmem:[%s10193_s7 + $0x3d0] sm:$0xff]  ;;  %v4938_v26 = vld [vmem:[%s10193_s7 + $0x3d8] sm:$0xff] }
 0x32a   : > { %v4795_v28 = vpop.f32.mrf.mxu0  ;;  %v4941_v25 = vld [vmem:[%s10193_s7 + $0x3f0] sm:$0xff] }
 0x32b   : > { %v4814_v30 = vpack.c.bf16 %v4812_v27, %v4812_v27  ;;  %v4942_v27 = vld [vmem:[%s10193_s7 + $0x3f8] sm:$0xff]  ;;  %v7456_v28 = vcombine.low %v4818_v18, %v4822_v8  ;;  %v7575_v32 = vcombine.high %v4937_v23, %v4941_v25 }
 0x32c   : > { %v7577_v33 = vcombine.high %v4938_v26, %v4942_v27  ;;  %v7576_v41 = vcombine.low %v4938_v26, %v4942_v27 }
 0x32d   : > { %5657 = vmatprep.mubr.bf16.mxu1 %v4814_v30  ;;  %5698 = vmatprep.mubr.bf16.mxu0 %v4814_v30 }
 0x32e   : > { %5658 = vmatmul.mubr.bf16.vlgmr.msra.gmra.mxu1 %v9565_v16  ;;  %5699 = vmatmul.mubr.bf16.vlgmr.msra.gmra.mxu0 %v9565_v16 }
 0x32f   : > { %5708 = vmatpush1.bf16.msra.mxu1 %v7510_v7  ;;  %5749 = vmatpush1.bf16.msra.mxu0 %v7512_v9  ;;  %v7496_v7 = vcombine.low %v4858_v36, %v4862_v42  ;;  %v7487_v9 = vcombine.high %v4849_v52, %v4853_v61 }
 0x330   : > { %5739 = vmatprep.mubr.bf16.mxu1 %v4814_v30  ;;  %5780 = vmatprep.mubr.bf16.mxu0 %v4814_v30  ;;  %v4933_v30 = vld [vmem:[%s10193_s7 + $0x3b0] sm:$0xff] }
 0x331   : > { %5709 = vmatprep.subr.bf16.mxu1 %v7503_v38  ;;  %5750 = vmatprep.subr.bf16.mxu0 %v7505_v40  ;;  %v4934_v38 = vld [vmem:[%s10193_s7 + $0x3b8] sm:$0xff]  ;;  %v7574_v40 = vcombine.low %v4937_v23, %v4941_v25  ;;  %v7567_v36 = vcombine.high %v4929_v24, %v4933_v30  ;;  %v7566_v52 = vcombine.low %v4929_v24, %v4933_v30  ;;  %v9762_v24 = vld [vmem:[%s512_s25] sm:$0xff]  ;;  %s522_s25 = scalar_lea.vmem %s10198_s12, %s9735_s17 }
 0x332   : > { %v7569_v42 = vcombine.high %v4930_v34, %v4934_v38  ;;  %v7568_v61 = vcombine.low %v4930_v34, %v4934_v38 }
 0x333   : > { %5710 = vmatpush1.bf16.msra.mxu1 %v7502_v44  ;;  %5751 = vmatpush1.bf16.msra.mxu0 %v7504_v0  ;;  %v4921_v44 = vld [vmem:[%s10193_s7 + $0x350] sm:$0xff] }
 0x334   : > { %5711 = vmatprep.subr.bf16.mxu1 %v7495_v39  ;;  %5752 = vmatprep.subr.bf16.mxu0 %v7497_v45  ;;  %v4925_v0 = vld [vmem:[%s10193_s7 + $0x370] sm:$0xff]  ;;  %v4922_v39 = vld [vmem:[%s10193_s7 + $0x358] sm:$0xff] }
 0x335   : > { %v4926_v45 = vld [vmem:[%s10193_s7 + $0x378] sm:$0xff]  ;;  %v7559_v63 = vcombine.high %v4921_v44, %v4925_v0  ;;  %v7558_v48 = vcombine.low %v4921_v44, %v4925_v0  ;;  %v5842_v44 = vld [vmem:[%s10194_s8 + $0x1a8] sm:$0xff]  ;;  %v5920_v0 = vcombine.high %v9762_v24, %v9762_v24 }
 0x336   : > { %v7561_v2 = vcombine.high %v4922_v39, %v4926_v45  ;;  %v7560_v49 = vcombine.low %v4922_v39, %v4926_v45 }
 0x337   : > { %5712 = vmatpush1.bf16.msra.mxu1 %v7494_v4  ;;  %5753 = vmatpush1.bf16.msra.mxu0 %v7496_v7  ;;  %v4913_v4 = vld [vmem:[%s10193_s7 + $0x310] sm:$0xff] }
 0x338   : > { %5713 = vmatprep.subr.bf16.mxu1 %v7487_v9  ;;  %5754 = vmatprep.subr.bf16.mxu0 %v7489_v47  ;;  %v4917_v7 = vld [vmem:[%s10193_s7 + $0x330] sm:$0xff]  ;;  %v4914_v9 = vld [vmem:[%s10193_s7 + $0x318] sm:$0xff] }
 0x339   : > { %v4918_v47 = vld [vmem:[%s10193_s7 + $0x338] sm:$0xff]  ;;  %v7551_v12 = vcombine.high %v4913_v4, %v4917_v7  ;;  %v7550_v56 = vcombine.low %v4913_v4, %v4917_v7  ;;  %v5830_v4 = vld [vmem:[%s10194_s8 + $0x148] sm:$0xff] }
 0x33a   : > { %v7553_v50 = vcombine.high %v4914_v9, %v4918_v47  ;;  %v7552_v57 = vcombine.low %v4914_v9, %v4918_v47  ;;  %v5834_v7 = vld [vmem:[%s10194_s8 + $0x168] sm:$0xff]  ;;  %v9790_v9 = vpack.c.bf16 %v5920_v0, %v5920_v0 }
 0x33b   : > { %5714 = vmatpush1.bf16.msra.mxu1 %v7486_v53  ;;  %5755 = vmatpush1.bf16.msra.mxu0 %v7488_v43  ;;  %v4905_v53 = vld [vmem:[%s10193_s7 + $0x2d0] sm:$0xff] }
 0x33c   : > { %5715 = vmatprep.subr.bf16.mxu1 %v7479_v46  ;;  %5756 = vmatprep.subr.bf16.mxu0 %v7481_v55  ;;  %v4909_v43 = vld [vmem:[%s10193_s7 + $0x2f0] sm:$0xff]  ;;  %v4906_v46 = vld [vmem:[%s10193_s7 + $0x2d8] sm:$0xff] }
 0x33d   : > { %v4910_v55 = vld [vmem:[%s10193_s7 + $0x2f8] sm:$0xff]  ;;  %v7543_v54 = vcombine.high %v4905_v53, %v4909_v43  ;;  %v7542_v60 = vcombine.low %v4905_v53, %v4909_v43  ;;  %v5825_v53 = vld [vmem:[%s10194_s8 + $0x120] sm:$0xff]  ;;  %v5826_v43 = vld [vmem:[%s10194_s8 + $0x128] sm:$0xff] }
 0x33e   : > { %v7545_v58 = vcombine.high %v4906_v46, %v4910_v55  ;;  %v7544_v3 = vcombine.low %v4906_v46, %v4910_v55  ;;  %v7620_v55 = vcombine.low %v5830_v4, %v5834_v7 }
 0x33f   : > { %5716 = vmatpush1.bf16.msra.mxu1 %v7478_v1  ;;  %5757 = vmatpush1.bf16.msra.mxu0 %v7480_v51  ;;  %v4897_v1 = vld [vmem:[%s10193_s7 + $0x290] sm:$0xff] }
 0x340   : > { %5717 = vmatprep.subr.bf16.mxu1 %v7471_v31  ;;  %5758 = vmatprep.subr.bf16.mxu0 %v7473_v20  ;;  %v4901_v51 = vld [vmem:[%s10193_s7 + $0x2b0] sm:$0xff]  ;;  %v4898_v31 = vld [vmem:[%s10193_s7 + $0x298] sm:$0xff] }
 0x341   : > { %v4902_v20 = vld [vmem:[%s10193_s7 + $0x2b8] sm:$0xff]  ;;  %v7535_v6 = vcombine.high %v4897_v1, %v4901_v51  ;;  %v7534_v15 = vcombine.low %v4897_v1, %v4901_v51  ;;  %v5814_v1 = vld [vmem:[%s10194_s8 + $0xc8] sm:$0xff] }
 0x342   : > { %v7537_v62 = vcombine.high %v4898_v31, %v4902_v20  ;;  %v7536_v17 = vcombine.low %v4898_v31, %v4902_v20  ;;  %v5818_v51 = vld [vmem:[%s10194_s8 + $0xe8] sm:$0xff] }
 0x343   : > { %5718 = vmatpush1.bf16.msra.mxu1 %v7470_v14  ;;  %5759 = vmatpush1.bf16.msra.mxu0 %v7472_v5  ;;  %v4889_v14 = vld [vmem:[%s10193_s7 + $0x250] sm:$0xff] }
 0x344   : > { %5719 = vmatprep.subr.bf16.mxu1 %v7463_v22  ;;  %5760 = vmatprep.subr.bf16.mxu0 %v7465_v35  ;;  %v4893_v5 = vld [vmem:[%s10193_s7 + $0x270] sm:$0xff]  ;;  %v4890_v22 = vld [vmem:[%s10193_s7 + $0x258] sm:$0xff] }
 0x345   : > { %v4894_v35 = vld [vmem:[%s10193_s7 + $0x278] sm:$0xff]  ;;  %v7527_v18 = vcombine.high %v4889_v14, %v4893_v5  ;;  %v7526_v23 = vcombine.low %v4889_v14, %v4893_v5  ;;  %v5806_v14 = vld [vmem:[%s10194_s8 + $0x88] sm:$0xff] }
 0x346   : > { %v7529_v8 = vcombine.high %v4890_v22, %v4894_v35  ;;  %v7528_v25 = vcombine.low %v4890_v22, %v4894_v35  ;;  %v5810_v5 = vld [vmem:[%s10194_s8 + $0xa8] sm:$0xff]  ;;  %v7604_v35 = vcombine.low %v5814_v1, %v5818_v51 }
 0x347   : > { %5720 = vmatpush1.bf16.msra.mxu1 %v7462_v13  ;;  %5761 = vmatpush1.bf16.msra.mxu0 %v7464_v11  ;;  %v4881_v13 = vld [vmem:[%s10193_s7 + $0x210] sm:$0xff] }
 0x348   : > { %5721 = vmatprep.subr.bf16.mxu1 %v7455_v21  ;;  %5762 = vmatprep.subr.bf16.mxu0 %v7457_v19  ;;  %v4885_v11 = vld [vmem:[%s10193_s7 + $0x230] sm:$0xff]  ;;  %v4882_v21 = vld [vmem:[%s10193_s7 + $0x218] sm:$0xff] }
 0x349   : > { %v4886_v19 = vld [vmem:[%s10193_s7 + $0x238] sm:$0xff]  ;;  %v7519_v26 = vcombine.high %v4881_v13, %v4885_v11  ;;  %v7518_v30 = vcombine.low %v4881_v13, %v4885_v11  ;;  %v5798_v13 = vld [vmem:[%s10194_s8 + $0x48] sm:$0xff] }
 0x34a   : > { %v7521_v27 = vcombine.high %v4882_v21, %v4886_v19  ;;  %v7520_v34 = vcombine.low %v4882_v21, %v4886_v19  ;;  %v5802_v11 = vld [vmem:[%s10194_s8 + $0x68] sm:$0xff]  ;;  %v7596_v19 = vcombine.low %v5806_v14, %v5810_v5 }
 0x34b   : > { %5722 = vmatpush1.bf16.msra.mxu1 %v7454_v29  ;;  %5763 = vmatpush1.bf16.msra.mxu0 %v7456_v28  ;;  %v5845_v29 = vld [vmem:[%s10194_s8 + $0x1c0] sm:$0xff] }
 0x34c   : > { %5723 = vmatprep.subr.bf16.mxu1 %v7575_v32  ;;  %5764 = vmatprep.subr.bf16.mxu0 %v7577_v33  ;;  %v5849_v28 = vld [vmem:[%s10194_s8 + $0x1e0] sm:$0xff]  ;;  %v5846_v32 = vld [vmem:[%s10194_s8 + $0x1c8] sm:$0xff] }
 0x34d   : > { %v5850_v33 = vld [vmem:[%s10194_s8 + $0x1e8] sm:$0xff]  ;;  %v7635_v38 = vcombine.high %v5845_v29, %v5849_v28  ;;  %v7634_v39 = vcombine.low %v5845_v29, %v5849_v28 }
 0x34e   : > { %v7636_v45 = vcombine.low %v5846_v32, %v5850_v33  ;;  %v5790_v29 = vld [vmem:[%s10194_s8 + $0x8] sm:$0xff] }
 0x34f   : > { %5724 = vmatpush2.bf16.msra.mxu1 %v7574_v40  ;;  %5765 = vmatpush2.bf16.msra.mxu0 %v7576_v41  ;;  %v7637_v40 = vcombine.high %v5846_v32, %v5850_v33  ;;  %v5837_v41 = vld [vmem:[%s10194_s8 + $0x180] sm:$0xff]  ;;  %v5794_v28 = vld [vmem:[%s10194_s8 + $0x28] sm:$0xff]  ;;  %v7588_v33 = vcombine.low %v5798_v13, %v5802_v11 }
 0x350   : > { %5725 = vmatprep.subr.bf16.mxu1 %v7567_v36  ;;  %5766 = vmatprep.subr.bf16.mxu0 %v7569_v42  ;;  %v5841_v36 = vld [vmem:[%s10194_s8 + $0x1a0] sm:$0xff]  ;;  %v5838_v42 = vld [vmem:[%s10194_s8 + $0x188] sm:$0xff] }
 0x351   : > { %v7626_v47 = vcombine.low %v5837_v41, %v5841_v36 }
 0x353   : > { %5726 = vmatpush2.bf16.msra.mxu1 %v7566_v52  ;;  %5767 = vmatpush2.bf16.msra.mxu0 %v7568_v61  ;;  %v7627_v52 = vcombine.high %v5837_v41, %v5841_v36  ;;  %v7629_v61 = vcombine.high %v5838_v42, %v5842_v44  ;;  %v5910_v41 = vld [vmem:[%s10194_s8 + $0x3c8] sm:$0xff] }
 0x354   : > { %5727 = vmatprep.subr.bf16.mxu1 %v7559_v63  ;;  %5768 = vmatprep.subr.bf16.mxu0 %v7561_v2  ;;  %v5829_v63 = vld [vmem:[%s10194_s8 + $0x140] sm:$0xff]  ;;  %v5914_v36 = vld [vmem:[%s10194_s8 + $0x3e8] sm:$0xff] }
 0x355   : > { %v5833_v2 = vld [vmem:[%s10194_s8 + $0x160] sm:$0xff] }
 0x356   : > { %v7618_v46 = vcombine.low %v5829_v63, %v5833_v2 }
 0x357   : > { %5728 = vmatpush2.bf16.msra.mxu1 %v7558_v48  ;;  %5769 = vmatpush2.bf16.msra.mxu0 %v7560_v49  ;;  %v7628_v48 = vcombine.low %v5838_v42, %v5842_v44  ;;  %v7619_v49 = vcombine.high %v5829_v63, %v5833_v2  ;;  %v7580_v44 = vcombine.low %v5790_v29, %v5794_v28  ;;  %v5906_v63 = vld [vmem:[%s10194_s8 + $0x3a8] sm:$0xff] }
 0x358   : > { %5729 = vmatprep.subr.bf16.mxu1 %v7551_v12  ;;  %5770 = vmatprep.subr.bf16.mxu0 %v7553_v50  ;;  %v7621_v12 = vcombine.high %v5830_v4, %v5834_v7  ;;  %v5821_v50 = vld [vmem:[%s10194_s8 + $0x100] sm:$0xff]  ;;  %v7700_v4 = vcombine.low %v5910_v41, %v5914_v36 }
 0x359   : > { %v7610_v31 = vcombine.low %v5821_v50, %v5825_v53 }
 0x35b   : > { %5730 = vmatpush2.bf16.msra.mxu1 %v7550_v56  ;;  %5771 = vmatpush2.bf16.msra.mxu0 %v7552_v57  ;;  %v7611_v56 = vcombine.high %v5821_v50, %v5825_v53  ;;  %v5898_v50 = vld [vmem:[%s10194_s8 + $0x368] sm:$0xff] }
 0x35c   : > { %5731 = vmatprep.subr.bf16.mxu1 %v7543_v54  ;;  %5772 = vmatprep.subr.bf16.mxu0 %v7545_v58  ;;  %v5813_v54 = vld [vmem:[%s10194_s8 + $0xc0] sm:$0xff] }
 0x35d   : > { %v5817_v58 = vld [vmem:[%s10194_s8 + $0xe0] sm:$0xff] }
 0x35e   : > { %v7602_v22 = vcombine.low %v5813_v54, %v5817_v58 }
 0x35f   : > { %5732 = vmatpush2.bf16.msra.mxu1 %v7542_v60  ;;  %5773 = vmatpush2.bf16.msra.mxu0 %v7544_v3  ;;  %v7603_v60 = vcombine.high %v5813_v54, %v5817_v58  ;;  %v7605_v3 = vcombine.high %v5814_v1, %v5818_v51  ;;  %v5890_v54 = vld [vmem:[%s10194_s8 + $0x328] sm:$0xff] }
 0x360   : > { %5733 = vmatprep.subr.bf16.mxu1 %v7535_v6  ;;  %5774 = vmatprep.subr.bf16.mxu0 %v7537_v62  ;;  %v5805_v6 = vld [vmem:[%s10194_s8 + $0x80] sm:$0xff] }
 0x361   : > { %v5809_v62 = vld [vmem:[%s10194_s8 + $0xa0] sm:$0xff] }
 0x362   : > { %v7594_v21 = vcombine.low %v5805_v6, %v5809_v62 }
 0x363   : > { %5734 = vmatpush2.bf16.msra.mxu1 %v7534_v15  ;;  %5775 = vmatpush2.bf16.msra.mxu0 %v7536_v17  ;;  %v7595_v15 = vcombine.high %v5805_v6, %v5809_v62  ;;  %v7597_v17 = vcombine.high %v5806_v14, %v5810_v5  ;;  %v5882_v6 = vld [vmem:[%s10194_s8 + $0x2e8] sm:$0xff] }
 0x364   : > { %5735 = vmatprep.subr.bf16.mxu1 %v7527_v18  ;;  %5776 = vmatprep.subr.bf16.mxu0 %v7529_v8  ;;  %v5797_v18 = vld [vmem:[%s10194_s8 + $0x40] sm:$0xff] }
 0x365   : > { %v5801_v8 = vld [vmem:[%s10194_s8 + $0x60] sm:$0xff] }
 0x366   : > { %v7586_v32 = vcombine.low %v5797_v18, %v5801_v8 }
 0x367   : > { %5736 = vmatpush2.bf16.msra.mxu1 %v7526_v23  ;;  %5777 = vmatpush2.bf16.msra.mxu0 %v7528_v25  ;;  %v7587_v23 = vcombine.high %v5797_v18, %v5801_v8  ;;  %v7589_v25 = vcombine.high %v5798_v13, %v5802_v11  ;;  %v5874_v18 = vld [vmem:[%s10194_s8 + $0x2a8] sm:$0xff] }
 0x368   : > { %5737 = vmatprep.subr.bf16.mxu1 %v7519_v26  ;;  %5778 = vmatprep.subr.bf16.mxu0 %v7521_v27  ;;  %v5789_v26 = vld [vmem:[%s10194_s8] sm:$0xff] }
 0x369   : > { %v5793_v27 = vld [vmem:[%s10194_s8 + $0x20] sm:$0xff] }
 0x36a   : > { %v7578_v42 = vcombine.low %v5789_v26, %v5793_v27 }
 0x36b   : > { %5738 = vmatpush2.bf16.msra.mxu1 %v7518_v30  ;;  %5779 = vmatpush2.bf16.msra.mxu0 %v7520_v34  ;;  %v7579_v30 = vcombine.high %v5789_v26, %v5793_v27  ;;  %v7581_v34 = vcombine.high %v5790_v29, %v5794_v28  ;;  %v5866_v26 = vld [vmem:[%s10194_s8 + $0x268] sm:$0xff] }
 0x36c   : > { %6564 = vmatprep.subr.bf16.mxu1 %v7635_v38  ;;  %6605 = vmatprep.subr.bf16.mxu0 %v7637_v40  ;;  %v5909_v38 = vld [vmem:[%s10194_s8 + $0x3c0] sm:$0xff] }
 0x36d   : > { %v5913_v40 = vld [vmem:[%s10194_s8 + $0x3e0] sm:$0xff] }
 0x36e   : > { %5740 = vmatmul.mubr.bf16.vlgmr.msra.gmra.mxu1 %v9565_v16  ;;  %5781 = vmatmul.mubr.bf16.vlgmr.msra.gmra.mxu0 %v9565_v16  ;;  %v5822_v16 = vld [vmem:[%s10194_s8 + $0x108] sm:$0xff]  ;;  %v7699_v0 = vcombine.high %v5909_v38, %v5913_v40  ;;  %v7698_v2 = vcombine.low %v5909_v38, %v5913_v40 }
 0x36f   : > { %6565 = vmatpush1.bf16.msra.mxu1 %v7634_v39  ;;  %6606 = vmatpush1.bf16.msra.mxu0 %v7636_v45  ;;  %v7613_v57 = vcombine.high %v5822_v16, %v5826_v43  ;;  %v7612_v20 = vcombine.low %v5822_v16, %v5826_v43  ;;  %v7701_v39 = vcombine.high %v5910_v41, %v5914_v36  ;;  %v5901_v45 = vld [vmem:[%s10194_s8 + $0x380] sm:$0xff]  ;;  %v5858_v38 = vld [vmem:[%s10194_s8 + $0x228] sm:$0xff] }
 0x370   : > { %6566 = vmatprep.subr.bf16.mxu1 %v7627_v52  ;;  %6607 = vmatprep.subr.bf16.mxu0 %v7629_v61  ;;  %v5905_v52 = vld [vmem:[%s10194_s8 + $0x3a0] sm:$0xff]  ;;  %v5902_v61 = vld [vmem:[%s10194_s8 + $0x388] sm:$0xff] }
 0x371   : > { %6596 = vmatprep.mubr.bf16.mxu1 %v9790_v9  ;;  %6637 = vmatprep.mubr.bf16.mxu0 %v9790_v9  ;;  %v7691_v7 = vcombine.high %v5901_v45, %v5905_v52  ;;  %v7690_v53 = vcombine.low %v5901_v45, %v5905_v52  ;;  %v7692_v16 = vcombine.low %v5902_v61, %v5906_v63  ;;  %v5852_v45 = vld [vmem:[%s10194_s8 + $0x1f8] sm:$0xff] }
 0x373   : > { %6567 = vmatpush1.bf16.msra.mxu1 %v7626_v47  ;;  %6608 = vmatpush1.bf16.msra.mxu0 %v7628_v48  ;;  %v7693_v47 = vcombine.high %v5902_v61, %v5906_v63  ;;  %v5893_v48 = vld [vmem:[%s10194_s8 + $0x340] sm:$0xff] }
 0x374   : > { %6568 = vmatprep.subr.bf16.mxu1 %v7619_v49  ;;  %6609 = vmatprep.subr.bf16.mxu0 %v7621_v12  ;;  %v5897_v49 = vld [vmem:[%s10194_s8 + $0x360] sm:$0xff]  ;;  %v5894_v12 = vld [vmem:[%s10194_s8 + $0x348] sm:$0xff] }
 0x375   : > { %v7683_v43 = vcombine.high %v5893_v48, %v5897_v49  ;;  %v7682_v58 = vcombine.low %v5893_v48, %v5897_v49  ;;  %v7684_v1 = vcombine.low %v5894_v12, %v5898_v50  ;;  %v5844_v48 = vld [vmem:[%s10194_s8 + $0x1b8] sm:$0xff]  ;;  %v9978_v49 = vpack.c.bf16 %v9762_v24, %v9762_v24 }
 0x376   : > { %v5832_v24 = vld [vmem:[%s10194_s8 + $0x158] sm:$0xff] }
 0x377   : > { %6569 = vmatpush1.bf16.msra.mxu1 %v7618_v46  ;;  %6610 = vmatpush1.bf16.msra.mxu0 %v7620_v55  ;;  %v7685_v46 = vcombine.high %v5894_v12, %v5898_v50  ;;  %v5885_v55 = vld [vmem:[%s10194_s8 + $0x300] sm:$0xff] }
 0x378   : > { %6570 = vmatprep.subr.bf16.mxu1 %v7611_v56  ;;  %6611 = vmatprep.subr.bf16.mxu0 %v7613_v57  ;;  %v5889_v56 = vld [vmem:[%s10194_s8 + $0x320] sm:$0xff]  ;;  %v5886_v57 = vld [vmem:[%s10194_s8 + $0x308] sm:$0xff] }
 0x379   : > { %v7675_v51 = vcombine.high %v5885_v55, %v5889_v56  ;;  %v7674_v62 = vcombine.low %v5885_v55, %v5889_v56  ;;  %v7676_v14 = vcombine.low %v5886_v57, %v5890_v54  ;;  %v5836_v55 = vld [vmem:[%s10194_s8 + $0x178] sm:$0xff] }
 0x37b   : > { %6571 = vmatpush1.bf16.msra.mxu1 %v7610_v31  ;;  %6612 = vmatpush1.bf16.msra.mxu0 %v7612_v20  ;;  %v7677_v31 = vcombine.high %v5886_v57, %v5890_v54  ;;  %v5877_v20 = vld [vmem:[%s10194_s8 + $0x2c0] sm:$0xff] }
 0x37c   : > { %6572 = vmatprep.subr.bf16.mxu1 %v7603_v60  ;;  %6613 = vmatprep.subr.bf16.mxu0 %v7605_v3  ;;  %v5881_v60 = vld [vmem:[%s10194_s8 + $0x2e0] sm:$0xff]  ;;  %v5878_v3 = vld [vmem:[%s10194_s8 + $0x2c8] sm:$0xff] }
 0x37d   : > { %v7667_v5 = vcombine.high %v5877_v20, %v5881_v60  ;;  %v7666_v8 = vcombine.low %v5877_v20, %v5881_v60  ;;  %v7668_v13 = vcombine.low %v5878_v3, %v5882_v6  ;;  %v5828_v20 = vld [vmem:[%s10194_s8 + $0x138] sm:$0xff] }
 0x37f   : > { %6573 = vmatpush1.bf16.msra.mxu1 %v7602_v22  ;;  %6614 = vmatpush1.bf16.msra.mxu0 %v7604_v35  ;;  %v7669_v22 = vcombine.high %v5878_v3, %v5882_v6  ;;  %v5869_v35 = vld [vmem:[%s10194_s8 + $0x280] sm:$0xff]  ;;  %v7624_v3 = vcombine.low %v5832_v24, %v5836_v55 }
 0x380   : > { %6574 = vmatprep.subr.bf16.mxu1 %v7595_v15  ;;  %6615 = vmatprep.subr.bf16.mxu0 %v7597_v17  ;;  %v5873_v15 = vld [vmem:[%s10194_s8 + $0x2a0] sm:$0xff]  ;;  %v5870_v17 = vld [vmem:[%s10194_s8 + $0x288] sm:$0xff] }
 0x381   : > { %v7659_v11 = vcombine.high %v5869_v35, %v5873_v15  ;;  %v7658_v27 = vcombine.low %v5869_v35, %v5873_v15  ;;  %v7660_v29 = vcombine.low %v5870_v17, %v5874_v18 }
 0x383   : > { %6575 = vmatpush1.bf16.msra.mxu1 %v7594_v21  ;;  %6616 = vmatpush1.bf16.msra.mxu0 %v7596_v19  ;;  %v7661_v21 = vcombine.high %v5870_v17, %v5874_v18  ;;  %v5861_v19 = vld [vmem:[%s10194_s8 + $0x240] sm:$0xff] }
 0x384   : > { %6576 = vmatprep.subr.bf16.mxu1 %v7587_v23  ;;  %6617 = vmatprep.subr.bf16.mxu0 %v7589_v25  ;;  %v5865_v23 = vld [vmem:[%s10194_s8 + $0x260] sm:$0xff]  ;;  %v5862_v25 = vld [vmem:[%s10194_s8 + $0x248] sm:$0xff] }
 0x385   : > { %v7651_v28 = vcombine.high %v5861_v19, %v5865_v23  ;;  %v7650_v40 = vcombine.low %v5861_v19, %v5865_v23  ;;  %v7652_v41 = vcombine.low %v5862_v25, %v5866_v26 }
 0x387   : > { %6577 = vmatpush1.bf16.msra.mxu1 %v7586_v32  ;;  %6618 = vmatpush1.bf16.msra.mxu0 %v7588_v33  ;;  %v7653_v32 = vcombine.high %v5862_v25, %v5866_v26  ;;  %v5853_v33 = vld [vmem:[%s10194_s8 + $0x200] sm:$0xff] }
 0x388   : > { %6578 = vmatprep.subr.bf16.mxu1 %v7579_v30  ;;  %6619 = vmatprep.subr.bf16.mxu0 %v7581_v34  ;;  %v5857_v30 = vld [vmem:[%s10194_s8 + $0x220] sm:$0xff]  ;;  %v5854_v34 = vld [vmem:[%s10194_s8 + $0x208] sm:$0xff] }
 0x389   : > { %v7643_v36 = vcombine.high %v5853_v33, %v5857_v30  ;;  %v7642_v52 = vcombine.low %v5853_v33, %v5857_v30  ;;  %v7644_v61 = vcombine.low %v5854_v34, %v5858_v38 }
 0x38b   : > { %6579 = vmatpush1.bf16.msra.mxu1 %v7578_v42  ;;  %6620 = vmatpush1.bf16.msra.mxu0 %v7580_v44  ;;  %v7645_v42 = vcombine.high %v5854_v34, %v5858_v38  ;;  %v5847_v44 = vld [vmem:[%s10194_s8 + $0x1d0] sm:$0xff] }
 0x38c   : > { %6580 = vmatprep.subr.bf16.mxu1 %v7699_v0  ;;  %6621 = vmatprep.subr.bf16.mxu0 %v7701_v39  ;;  %v5851_v0 = vld [vmem:[%s10194_s8 + $0x1f0] sm:$0xff]  ;;  %v5848_v39 = vld [vmem:[%s10194_s8 + $0x1d8] sm:$0xff] }
 0x38d   : > { %v7639_v63 = vcombine.high %v5847_v44, %v5851_v0  ;;  %v7638_v12 = vcombine.low %v5847_v44, %v5851_v0  ;;  %v7640_v50 = vcombine.low %v5848_v39, %v5852_v45 }
 0x38f   : > { %6581 = vmatpush2.bf16.msra.mxu1 %v7698_v2  ;;  %6622 = vmatpush2.bf16.msra.mxu0 %v7700_v4  ;;  %v7641_v2 = vcombine.high %v5848_v39, %v5852_v45  ;;  %v5839_v4 = vld [vmem:[%s10194_s8 + $0x190] sm:$0xff] }
 0x390   : > { %6582 = vmatprep.subr.bf16.mxu1 %v7691_v7  ;;  %6623 = vmatprep.subr.bf16.mxu0 %v7693_v47  ;;  %v5843_v7 = vld [vmem:[%s10194_s8 + $0x1b0] sm:$0xff]  ;;  %v5840_v47 = vld [vmem:[%s10194_s8 + $0x198] sm:$0xff] }
 0x391   : > { %v7630_v56 = vcombine.low %v5839_v4, %v5843_v7  ;;  %v7632_v57 = vcombine.low %v5840_v47, %v5844_v48 }
 0x393   : > { %6583 = vmatpush2.bf16.msra.mxu1 %v7690_v53  ;;  %6624 = vmatpush2.bf16.msra.mxu0 %v7692_v16  ;;  %v7631_v53 = vcombine.high %v5839_v4, %v5843_v7  ;;  %v7633_v16 = vcombine.high %v5840_v47, %v5844_v48 }
 0x394   : > { %6584 = vmatprep.subr.bf16.mxu1 %v7683_v43  ;;  %6625 = vmatprep.subr.bf16.mxu0 %v7685_v46  ;;  %v5831_v43 = vld [vmem:[%s10194_s8 + $0x150] sm:$0xff] }
 0x395   : > { %v5835_v46 = vld [vmem:[%s10194_s8 + $0x170] sm:$0xff] }
 0x396   : > { %v7623_v54 = vcombine.high %v5831_v43, %v5835_v46  ;;  %v7622_v60 = vcombine.low %v5831_v43, %v5835_v46 }
 0x397   : > { %6585 = vmatpush2.bf16.msra.mxu1 %v7682_v58  ;;  %6626 = vmatpush2.bf16.msra.mxu0 %v7684_v1  ;;  %v7625_v58 = vcombine.high %v5832_v24, %v5836_v55  ;;  %v5823_v1 = vld [vmem:[%s10194_s8 + $0x110] sm:$0xff] }
 0x398   : > { %6586 = vmatprep.subr.bf16.mxu1 %v7675_v51  ;;  %6627 = vmatprep.subr.bf16.mxu0 %v7677_v31  ;;  %v5827_v51 = vld [vmem:[%s10194_s8 + $0x130] sm:$0xff]  ;;  %v5824_v31 = vld [vmem:[%s10194_s8 + $0x118] sm:$0xff] }
 0x399   : > { %v7615_v6 = vcombine.high %v5823_v1, %v5827_v51  ;;  %v7614_v35 = vcombine.low %v5823_v1, %v5827_v51  ;;  %v7616_v15 = vcombine.low %v5824_v31, %v5828_v20 }
 0x39b   : > { %6587 = vmatpush2.bf16.msra.mxu1 %v7674_v62  ;;  %6628 = vmatpush2.bf16.msra.mxu0 %v7676_v14  ;;  %v7617_v62 = vcombine.high %v5824_v31, %v5828_v20  ;;  %v5815_v14 = vld [vmem:[%s10194_s8 + $0xd0] sm:$0xff] }
 0x39c   : > { %6588 = vmatprep.subr.bf16.mxu1 %v7667_v5  ;;  %6629 = vmatprep.subr.bf16.mxu0 %v7669_v22  ;;  %v5819_v5 = vld [vmem:[%s10194_s8 + $0xf0] sm:$0xff]  ;;  %v5820_v22 = vld [vmem:[%s10194_s8 + $0xf8] sm:$0xff] }
 0x39d   : > { %v7607_v17 = vcombine.high %v5815_v14, %v5819_v5  ;;  %v7606_v19 = vcombine.low %v5815_v14, %v5819_v5 }
 0x39f   : > { %6589 = vmatpush2.bf16.msra.mxu1 %v7666_v8  ;;  %6630 = vmatpush2.bf16.msra.mxu0 %v7668_v13  ;;  %v5807_v8 = vld [vmem:[%s10194_s8 + $0x90] sm:$0xff] }
 0x3a0   : > { %6590 = vmatprep.subr.bf16.mxu1 %v7659_v11  ;;  %6631 = vmatprep.subr.bf16.mxu0 %v7661_v21  ;;  %v5811_v13 = vld [vmem:[%s10194_s8 + $0xb0] sm:$0xff]  ;;  %v5808_v11 = vld [vmem:[%s10194_s8 + $0x98] sm:$0xff] }
 0x3a1   : > { %v5812_v21 = vld [vmem:[%s10194_s8 + $0xb8] sm:$0xff]  ;;  %v7599_v25 = vcombine.high %v5807_v8, %v5811_v13  ;;  %v7598_v33 = vcombine.low %v5807_v8, %v5811_v13 }
 0x3a2   : > { %v7601_v26 = vcombine.high %v5808_v11, %v5812_v21  ;;  %v7600_v30 = vcombine.low %v5808_v11, %v5812_v21 }
 0x3a3   : > { %6591 = vmatpush2.bf16.msra.mxu1 %v7658_v27  ;;  %6632 = vmatpush2.bf16.msra.mxu0 %v7660_v29  ;;  %v5799_v27 = vld [vmem:[%s10194_s8 + $0x50] sm:$0xff] }
 0x3a4   : > { %6592 = vmatprep.subr.bf16.mxu1 %v7651_v28  ;;  %6633 = vmatprep.subr.bf16.mxu0 %v7653_v32  ;;  %v5803_v29 = vld [vmem:[%s10194_s8 + $0x70] sm:$0xff]  ;;  %v5800_v28 = vld [vmem:[%s10194_s8 + $0x58] sm:$0xff] }
 0x3a5   : > { %v5804_v32 = vld [vmem:[%s10194_s8 + $0x78] sm:$0xff]  ;;  %v7591_v34 = vcombine.high %v5799_v27, %v5803_v29  ;;  %v7590_v44 = vcombine.low %v5799_v27, %v5803_v29 }
 0x3a6   : > { %v7593_v38 = vcombine.high %v5800_v28, %v5804_v32  ;;  %v7592_v0 = vcombine.low %v5800_v28, %v5804_v32 }
 0x3a7   : > { %6593 = vmatpush2.bf16.msra.mxu1 %v7650_v40  ;;  %6634 = vmatpush2.bf16.msra.mxu0 %v7652_v41  ;;  %v5791_v40 = vld [vmem:[%s10194_s8 + $0x10] sm:$0xff] }
 0x3a8   : > { %6594 = vmatprep.subr.bf16.mxu1 %v7643_v36  ;;  %6635 = vmatprep.subr.bf16.mxu0 %v7645_v42  ;;  %v5795_v41 = vld [vmem:[%s10194_s8 + $0x30] sm:$0xff]  ;;  %v5792_v36 = vld [vmem:[%s10194_s8 + $0x18] sm:$0xff] }
 0x3a9   : > { %v5796_v42 = vld [vmem:[%s10194_s8 + $0x38] sm:$0xff]  ;;  %v7583_v39 = vcombine.high %v5791_v40, %v5795_v41  ;;  %v7582_v4 = vcombine.low %v5791_v40, %v5795_v41 }
 0x3aa   : > { %v7585_v45 = vcombine.high %v5792_v36, %v5796_v42  ;;  %v7584_v7 = vcombine.low %v5792_v36, %v5796_v42 }
 0x3ab   : > { %6595 = vmatpush2.bf16.msra.mxu1 %v7642_v52  ;;  %6636 = vmatpush2.bf16.msra.mxu0 %v7644_v61  ;;  %v5911_v52 = vld [vmem:[%s10194_s8 + $0x3d0] sm:$0xff] }
 0x3ac   : > { %6646 = vmatprep.subr.bf16.mxu1 %v7639_v63  ;;  %6687 = vmatprep.subr.bf16.mxu0 %v7641_v2  ;;  %v5915_v61 = vld [vmem:[%s10194_s8 + $0x3f0] sm:$0xff]  ;;  %v5912_v63 = vld [vmem:[%s10194_s8 + $0x3d8] sm:$0xff] }
 0x3ad   : > { %v5916_v2 = vld [vmem:[%s10194_s8 + $0x3f8] sm:$0xff]  ;;  %v7703_v47 = vcombine.high %v5911_v52, %v5915_v61  ;;  %v7702_v43 = vcombine.low %v5911_v52, %v5915_v61 }
 0x3ae   : > { %6597 = vmatmul.mubr.bf16.vlgmr.msra.gmra.mxu1 %v9978_v49  ;;  %6638 = vmatmul.mubr.bf16.vlgmr.msra.gmra.mxu0 %v9978_v49  ;;  %v7705_v48 = vcombine.high %v5912_v63, %v5916_v2  ;;  %v7704_v46 = vcombine.low %v5912_v63, %v5916_v2 }
 0x3af   : > { %6647 = vmatpush1.bf16.msra.mxu1 %v7638_v12  ;;  %6688 = vmatpush1.bf16.msra.mxu0 %v7640_v50  ;;  %v5903_v12 = vld [vmem:[%s10194_s8 + $0x390] sm:$0xff] }
 0x3b0   : > { %6648 = vmatprep.subr.bf16.mxu1 %v7631_v53  ;;  %6689 = vmatprep.subr.bf16.mxu0 %v7633_v16  ;;  %v5907_v50 = vld [vmem:[%s10194_s8 + $0x3b0] sm:$0xff]  ;;  %v5904_v53 = vld [vmem:[%s10194_s8 + $0x398] sm:$0xff] }
 0x3b1   : > { %6678 = vmatprep.mubr.bf16.mxu1 %v9790_v9  ;;  %6719 = vmatprep.mubr.bf16.mxu0 %v9790_v9  ;;  %v5816_v9 = vld [vmem:[%s10194_s8 + $0xd8] sm:$0xff]  ;;  %v7695_v24 = vcombine.high %v5903_v12, %v5907_v50  ;;  %v7694_v1 = vcombine.low %v5903_v12, %v5907_v50 }
 0x3b2   : > { %v7609_v18 = vcombine.high %v5816_v9, %v5820_v22  ;;  %v7608_v23 = vcombine.low %v5816_v9, %v5820_v22  ;;  %v5908_v16 = vld [vmem:[%s10194_s8 + $0x3b8] sm:$0xff] }
 0x3b3   : > { %6649 = vmatpush1.bf16.msra.mxu1 %v7630_v56  ;;  %6690 = vmatpush1.bf16.msra.mxu0 %v7632_v57  ;;  %v7697_v55 = vcombine.high %v5904_v53, %v5908_v16  ;;  %v5895_v56 = vld [vmem:[%s10194_s8 + $0x350] sm:$0xff]  ;;  %v7696_v51 = vcombine.low %v5904_v53, %v5908_v16 }
 0x3b4   : > { %6650 = vmatprep.subr.bf16.mxu1 %v7623_v54  ;;  %6691 = vmatprep.subr.bf16.mxu0 %v7625_v58  ;;  %v5899_v57 = vld [vmem:[%s10194_s8 + $0x370] sm:$0xff]  ;;  %v5896_v54 = vld [vmem:[%s10194_s8 + $0x358] sm:$0xff] }
 0x3b5   : > { %v5900_v58 = vld [vmem:[%s10194_s8 + $0x378] sm:$0xff]  ;;  %v7687_v31 = vcombine.high %v5895_v56, %v5899_v57  ;;  %v7686_v14 = vcombine.low %v5895_v56, %v5899_v57 }
 0x3b6   : > { %v7689_v20 = vcombine.high %v5896_v54, %v5900_v58  ;;  %v7688_v5 = vcombine.low %v5896_v54, %v5900_v58 }
 0x3b7   : > { %6651 = vmatpush1.bf16.msra.mxu1 %v7622_v60  ;;  %6692 = vmatpush1.bf16.msra.mxu0 %v7624_v3  ;;  %v5887_v60 = vld [vmem:[%s10194_s8 + $0x310] sm:$0xff] }
 0x3b8   : > { %6652 = vmatprep.subr.bf16.mxu1 %v7615_v6  ;;  %6693 = vmatprep.subr.bf16.mxu0 %v7617_v62  ;;  %v5891_v3 = vld [vmem:[%s10194_s8 + $0x330] sm:$0xff]  ;;  %v5888_v6 = vld [vmem:[%s10194_s8 + $0x318] sm:$0xff] }
 0x3b9   : > { %v5892_v62 = vld [vmem:[%s10194_s8 + $0x338] sm:$0xff]  ;;  %v7679_v9 = vcombine.high %v5887_v60, %v5891_v3  ;;  %v7678_v8 = vcombine.low %v5887_v60, %v5891_v3 }
 0x3ba   : > { %v7681_v22 = vcombine.high %v5888_v6, %v5892_v62  ;;  %v7680_v13 = vcombine.low %v5888_v6, %v5892_v62 }
 0x3bb   : > { %6653 = vmatpush1.bf16.msra.mxu1 %v7614_v35  ;;  %6694 = vmatpush1.bf16.msra.mxu0 %v7616_v15  ;;  %v5879_v35 = vld [vmem:[%s10194_s8 + $0x2d0] sm:$0xff] }
 0x3bc   : > { %6654 = vmatprep.subr.bf16.mxu1 %v7607_v17  ;;  %6695 = vmatprep.subr.bf16.mxu0 %v7609_v18  ;;  %v5883_v15 = vld [vmem:[%s10194_s8 + $0x2f0] sm:$0xff]  ;;  %v5880_v17 = vld [vmem:[%s10194_s8 + $0x2d8] sm:$0xff] }
 0x3bd   : > { %v5884_v18 = vld [vmem:[%s10194_s8 + $0x2f8] sm:$0xff]  ;;  %v7671_v11 = vcombine.high %v5879_v35, %v5883_v15  ;;  %v7670_v27 = vcombine.low %v5879_v35, %v5883_v15  ;;  %v4959_v35 = vsub.s32 3, %v9542_v59 }
 0x3be   : > { %v7673_v21 = vcombine.high %v5880_v17, %v5884_v18  ;;  %v7672_v29 = vcombine.low %v5880_v17, %v5884_v18 }
 0x3bf   : > { %6655 = vmatpush1.bf16.msra.mxu1 %v7606_v19  ;;  %6696 = vmatpush1.bf16.msra.mxu0 %v7608_v23  ;;  %v5871_v19 = vld [vmem:[%s10194_s8 + $0x290] sm:$0xff] }
 0x3c0   : > { %6656 = vmatprep.subr.bf16.mxu1 %v7599_v25  ;;  %6697 = vmatprep.subr.bf16.mxu0 %v7601_v26  ;;  %v5875_v23 = vld [vmem:[%s10194_s8 + $0x2b0] sm:$0xff]  ;;  %v5872_v25 = vld [vmem:[%s10194_s8 + $0x298] sm:$0xff] }
 0x3c1   : > { %v5876_v26 = vld [vmem:[%s10194_s8 + $0x2b8] sm:$0xff]  ;;  %v7663_v28 = vcombine.high %v5871_v19, %v5875_v23  ;;  %v7662_v40 = vcombine.low %v5871_v19, %v5875_v23 }
 0x3c2   : > { %v7665_v32 = vcombine.high %v5872_v25, %v5876_v26  ;;  %v7664_v41 = vcombine.low %v5872_v25, %v5876_v26 }
 0x3c3   : > { %6657 = vmatpush1.bf16.msra.mxu1 %v7598_v33  ;;  %6698 = vmatpush1.bf16.msra.mxu0 %v7600_v30  ;;  %v5863_v33 = vld [vmem:[%s10194_s8 + $0x250] sm:$0xff] }
 0x3c4   : > { %6658 = vmatprep.subr.bf16.mxu1 %v7591_v34  ;;  %6699 = vmatprep.subr.bf16.mxu0 %v7593_v38  ;;  %v5867_v30 = vld [vmem:[%s10194_s8 + $0x270] sm:$0xff]  ;;  %v5864_v34 = vld [vmem:[%s10194_s8 + $0x258] sm:$0xff] }
 0x3c5   : > { %v5868_v38 = vld [vmem:[%s10194_s8 + $0x278] sm:$0xff]  ;;  %v7655_v36 = vcombine.high %v5863_v33, %v5867_v30  ;;  %v7654_v52 = vcombine.low %v5863_v33, %v5867_v30  ;;  %v4967_v33 = vsub.s32 5, %v9542_v59 }
 0x3c6   : > { %v7657_v42 = vcombine.high %v5864_v34, %v5868_v38  ;;  %v7656_v61 = vcombine.low %v5864_v34, %v5868_v38  ;;  %v4975_v34 = vsub.s32 7, %v9542_v59 }
 0x3c7   : > { %6659 = vmatpush1.bf16.msra.mxu1 %v7590_v44  ;;  %6700 = vmatpush1.bf16.msra.mxu0 %v7592_v0  ;;  %v5855_v44 = vld [vmem:[%s10194_s8 + $0x210] sm:$0xff] }
 0x3c8   : > { %6660 = vmatprep.subr.bf16.mxu1 %v7583_v39  ;;  %6701 = vmatprep.subr.bf16.mxu0 %v7585_v45  ;;  %v5859_v0 = vld [vmem:[%s10194_s8 + $0x230] sm:$0xff]  ;;  %v5856_v39 = vld [vmem:[%s10194_s8 + $0x218] sm:$0xff] }
 0x3c9   : > { %v5860_v45 = vld [vmem:[%s10194_s8 + $0x238] sm:$0xff]  ;;  %v7647_v63 = vcombine.high %v5855_v44, %v5859_v0 }
 0x3ca   : > { %v7649_v2 = vcombine.high %v5856_v39, %v5860_v45 }
 0x3cb   : > { %6661 = vmatpush1.bf16.msra.mxu1 %v7582_v4  ;;  %6702 = vmatpush1.bf16.msra.mxu0 %v7584_v7  ;;  %v7646_v4 = vcombine.low %v5855_v44, %v5859_v0  ;;  %v7648_v7 = vcombine.low %v5856_v39, %v5860_v45 }
 0x3cc   : > { %6662 = vmatprep.subr.bf16.mxu1 %v7703_v47  ;;  %6703 = vmatprep.subr.bf16.mxu0 %v7705_v48 }
 0x3cf   : > { %6663 = vmatpush2.bf16.msra.mxu1 %v7702_v43  ;;  %6704 = vmatpush2.bf16.msra.mxu0 %v7704_v46 }
 0x3d0   : > { %6664 = vmatprep.subr.bf16.mxu1 %v7695_v24  ;;  %6705 = vmatprep.subr.bf16.mxu0 %v7697_v55 }
 0x3d3   : > { %6665 = vmatpush2.bf16.msra.mxu1 %v7694_v1  ;;  %6706 = vmatpush2.bf16.msra.mxu0 %v7696_v51 }
 0x3d4   : > { %6666 = vmatprep.subr.bf16.mxu1 %v7687_v31  ;;  %6707 = vmatprep.subr.bf16.mxu0 %v7689_v20 }
 0x3d7   : > { %6667 = vmatpush2.bf16.msra.mxu1 %v7686_v14  ;;  %6708 = vmatpush2.bf16.msra.mxu0 %v7688_v5  ;;  %v4943_v5 = vld [vmem:[%s10195_s9] sm:$0xff] }
 0x3d8   : > { %6668 = vmatprep.subr.bf16.mxu1 %v7679_v9  ;;  %6709 = vmatprep.subr.bf16.mxu0 %v7681_v22  ;;  %v4955_v9 = vsub.s32 2, %v9542_v59  ;;  %v4948_v22 = vrot.slane %v4943_v5, %v4803_v37  ;;  %v4952_v17 = vrot.slane %v4943_v5, %v4807_v10  ;;  %v4971_v10 = vsub.s32 6, %v9542_v59 }
 0x3d9   : > { %v4976_v39 = vrot.slane %v4943_v5, %v4975_v34 }
 0x3da   : > { %v4956_v15 = vrot.slane %v4943_v5, %v4955_v9 }
 0x3db   : > { %6669 = vmatpush2.bf16.msra.mxu1 %v7678_v8  ;;  %6710 = vmatpush2.bf16.msra.mxu0 %v7680_v13  ;;  %v4960_v8 = vrot.slane %v4943_v5, %v4959_v35 }
 0x3dc   : > { %6670 = vmatprep.subr.bf16.mxu1 %v7671_v11  ;;  %6711 = vmatprep.subr.bf16.mxu0 %v7673_v21 }
 0x3df   : > { %6671 = vmatpush2.bf16.msra.mxu1 %v7670_v27  ;;  %6712 = vmatpush2.bf16.msra.mxu0 %v7672_v29 }
 0x3e0   : > { %6672 = vmatprep.subr.bf16.mxu1 %v7663_v28  ;;  %6713 = vmatprep.subr.bf16.mxu0 %v7665_v32  ;;  %v4963_v32 = vsub.s32 4, %v9542_v59 }
 0x3e3   : > { %6673 = vmatpush2.bf16.msra.mxu1 %v7662_v40  ;;  %6714 = vmatpush2.bf16.msra.mxu0 %v7664_v41  ;;  %v4964_v41 = vrot.slane %v4943_v5, %v4963_v32 }
 0x3e4   : > { %6674 = vmatprep.subr.bf16.mxu1 %v7655_v36  ;;  %6715 = vmatprep.subr.bf16.mxu0 %v7657_v42  ;;  %v4972_v36 = vrot.slane %v4943_v5, %v4971_v10  ;;  %v4968_v42 = vrot.slane %v4943_v5, %v4967_v33 }
 0x3e7   : > { %6675 = vmatpush2.bf16.msra.mxu1 %v7654_v52  ;;  %6716 = vmatpush2.bf16.msra.mxu0 %v7656_v61 }
 0x3e8   : > { %6676 = vmatprep.subr.bf16.mxu1 %v7647_v63  ;;  %6717 = vmatprep.subr.bf16.mxu0 %v7649_v2 }
 0x3eb   : > { %6677 = vmatpush2.bf16.msra.mxu1 %v7646_v4  ;;  %6718 = vmatpush2.bf16.msra.mxu0 %v7648_v7 }
 0x3ee   : > { %6679 = vmatmul.mubr.bf16.vlgmr.msra.gmra.mxu1 %v9978_v49  ;;  %6720 = vmatmul.mubr.bf16.vlgmr.msra.gmra.mxu0 %v9978_v49  ;;  %v5659_v47 = vpop.f32.mrf.mxu1  ;;  %v5700_v48 = vpop.f32.mrf.mxu0 }
 0x3ef   : > { %v5660_v18 = vadd.f32 %v5659_v47, %v4948_v22  ;;  %v5701_v13 = vadd.f32 %v5700_v48, %v4956_v15 }
 0x3f0   : > { %v5661_v12 = vpop.f32.mrf.mxu1  ;;  %v5702_v50 = vpop.f32.mrf.mxu0 }
 0x3f1   : > { %v5662_v11 = vadd.f32 %v5661_v12, %v4952_v17  ;;  %v5703_v23 = vadd.f32 %v5702_v50, %v4960_v8 }
 0x3f2   : > { %v5663_v53 = vpop.f32.mrf.mxu1  ;;  %v5704_v16 = vpop.f32.mrf.mxu0 }
 0x3f4   : > { %v5664_v43 = vpop.f32.mrf.mxu1  ;;  %v5705_v46 = vpop.f32.mrf.mxu0 }
 0x42e   : > { %v5741_v24 = vpop.f32.mrf.mxu1  ;;  %v5782_v55 = vpop.f32.mrf.mxu0 }
 0x42f   : > { %v5742_v61 = vadd.f32 %v5741_v24, %v4964_v41  ;;  %v5783_v63 = vadd.f32 %v5782_v55, %v4972_v36 }
 0x430   : > { %v5743_v56 = vpop.f32.mrf.mxu1  ;;  %v5784_v57 = vpop.f32.mrf.mxu0 }
 0x431   : > { %v5744_v2 = vadd.f32 %v5743_v56, %v4968_v42  ;;  %v5785_v48 = vadd.f32 %v5784_v57, %v4976_v39 }
 0x432   : > { %v5745_v54 = vpop.f32.mrf.mxu1  ;;  %v5786_v58 = vpop.f32.mrf.mxu0 }
 0x434   : > { %v5746_v1 = vpop.f32.mrf.mxu1  ;;  %v5787_v51 = vpop.f32.mrf.mxu0 }
 0x435   : > { %v5918_v1 = vld [vmem:[%s517_s21] sm:$0xff] }
 0x46e   : > { %v6598_v31 = vpop.f32.mrf.mxu1  ;;  %v6639_v20 = vpop.f32.mrf.mxu0 }
 0x46f   : > { %v6728_v21 = vadd.f32 %v6598_v31, %v5660_v18  ;;  %v6730_v19 = vadd.f32 %v6639_v20, %v5701_v13 }
 0x470   : > { %v6600_v60 = vpop.f32.mrf.mxu1  ;;  %v6641_v49 = vpop.f32.mrf.mxu0 }
 0x471   : > { %v6729_v25 = vadd.f32 %v6600_v60, %v5662_v11  ;;  %v7706_v26 = vmul.f32 -1.442695, %v6728_v21  ;;  %v6731_v27 = vadd.f32 %v6641_v49, %v5703_v23  ;;  %v7708_v29 = vmul.f32 -1.442695, %v6730_v19 }
 0x472   : > { %v6602_v3 = vpop.f32.mrf.mxu1  ;;  %v6643_v6 = vpop.f32.mrf.mxu0  ;;  %v6775_v60 = vcombine.high %v5918_v1, %v5918_v1 }
 0x473   : > { %v7707_v28 = vmul.f32 -1.442695, %v6729_v25  ;;  %8189 = vpow2.f32 %v7706_v26  ;;  %v7709_v37 = vmul.f32 -1.442695, %v6731_v27 }
 0x474   : > { %v6603_v62 = vpop.f32.mrf.mxu1  ;;  %v6644_v14 = vpop.f32.mrf.mxu0  ;;  %8191 = vpow2.f32 %v7708_v29 }
 0x475   : > { %8193 = vpow2.f32 %v7707_v28 }
 0x476   : > { %8195 = vpow2.f32 %v7709_v37 }
 0x480   : > { %v8190_v30 = vpop.eup %8189 }
 0x481   : > { %v8192_v38 = vpop.eup %8191  ;;  %v6742_v44 = vadd.f32 1.0, %v8190_v30 }
 0x482   : > { %v8194_v40 = vpop.eup %8193  ;;  %v6754_v45 = vadd.f32 1.0, %v8192_v38 }
 0x483   : > { %v8196_v0 = vpop.eup %8195  ;;  %v6743_v52 = vadd.f32 1.0, %v8194_v40  ;;  %8197 = vrcp.f32 %v6742_v44 }
 0x484   : > { %v6755_v4 = vadd.f32 1.0, %v8196_v0  ;;  %8199 = vrcp.f32 %v6754_v45 }
 0x485   : > { %8201 = vrcp.f32 %v6743_v52 }
 0x490   : > { %v8198_v57 = vpop.eup %8197 }
 0x491   : > { %v8200_v51 = vpop.eup %8199 }
 0x492   : > { %v8202_v31 = vpop.eup %8201  ;;  %v6777_v3 = vmul.f32 %v8200_v51, %v5918_v1 }
 0x4ae   : > { %v6680_v7 = vpop.f32.mrf.mxu1  ;;  %v6721_v47 = vpop.f32.mrf.mxu0 }
 0x4af   : > { %v6732_v59 = vadd.f32 %v6680_v7, %v5742_v61  ;;  %v6734_v12 = vadd.f32 %v6721_v47, %v5783_v63 }
 0x4b0   : > { %v6682_v50 = vpop.f32.mrf.mxu1  ;;  %v6723_v53 = vpop.f32.mrf.mxu0 }
 0x4b1   : > { %8203 = vtanh.f32 %v6732_v59  ;;  %v7710_v16 = vmul.f32 -1.442695, %v6734_v12  ;;  %v6733_v43 = vadd.f32 %v6682_v50, %v5744_v2  ;;  %v6735_v46 = vadd.f32 %v6723_v53, %v5785_v48 }
 0x4b2   : > { %8205 = vrcp.f32 %v6755_v4  ;;  %v6684_v24 = vpop.f32.mrf.mxu1  ;;  %v6725_v55 = vpop.f32.mrf.mxu0 }
 0x4b3   : > { %8207 = vpow2.f32 %v7710_v16  ;;  %v7711_v56 = vmul.f32 -1.442695, %v6735_v46 }
 0x4b4   : > { %8209 = vtanh.f32 %v6733_v43  ;;  %v6685_v54 = vpop.f32.mrf.mxu1  ;;  %v6726_v58 = vpop.f32.mrf.mxu0 }
 0x4b5   : > { %8211 = vpow2.f32 %v7711_v56 }
 0x4be   : > { %v8204_v20 = vpop.eup %8203 }
 0x4bf   : > { %v8206_v49 = vpop.eup %8205  ;;  %v6779_v6 = vmul.f32 %v8204_v20, %v8198_v57 }
 0x4c0   : > { %v8208_v62 = vpop.eup %8207  ;;  %v6778_v35 = vmul.f32 %v8206_v49, %v6775_v60 }
 0x4c1   : > { %v8210_v14 = vpop.eup %8209  ;;  %v6781_v5 = vadd.f32 %v6779_v6, %v6777_v3  ;;  %v6768_v9 = vadd.f32 1.0, %v8208_v62 }
 0x4c2   : > { %v8212_v22 = vpop.eup %8211  ;;  %v6780_v15 = vmul.f32 %v8210_v14, %v8202_v31 }
 0x4c3   : > { %8213 = vtanh.f32 %v6781_v5  ;;  %v6769_v17 = vadd.f32 1.0, %v8212_v22 }
 0x4c4   : > { %8215 = vrcp.f32 %v6768_v9  ;;  %v6782_v18 = vadd.f32 %v6780_v15, %v6778_v35 }
 0x4c5   : > { %8217 = vrcp.f32 %v6769_v17 }
 0x4c6   : > { %8219 = vtanh.f32 %v6782_v18  ;;  %v6795_v8 = vcombine.low %v6781_v5, %v6782_v18 }
 0x4c8   : > { %6797 = vst [vmem:[%s532_s24] sm:$0xff] %v6795_v8 }
 0x4d0   : > { %v8214_v13 = vpop.eup %8213 }
 0x4d1   : > { %v8216_v11 = vpop.eup %8215 }
 0x4d2   : > { %v8218_v21 = vpop.eup %8217  ;;  %v6785_v19 = vmul.f32 %v8216_v11, %v8214_v13 }
 0x4d3   : > { %v8220_v23 = vpop.eup %8219 }
 0x4d4   : > { %v6786_v25 = vmul.f32 %v8220_v23, %v8218_v21 }
 0x4d6   : > { %v6789_v26 = vcombine.low %v6785_v19, %v6786_v25 }
 0x4d8   : > { %6791 = vst [vmem:[%s522_s25] sm:$0xff] %v6789_v26  ;;  %6792 = vst [vmem:[%s527_s15] sm:$0xff] %v6789_v26 }
 0x4d9 PF: > { %s25_s29 = sadd.s32 1, %s8228_s29  }
 0x4da   : > { %p22_p4 = scmp.ge.s32.totalorder %s25_s29, 4  }
 0x4dc   :  { %24 = sbr.rel (!%p22_p4) target bundleno = 1 (0x1), region = 176 }

</bundles_post_ra>
